<compile_context>
chip_gen: v7x
topology: tpu7x:2x2x1
jax: 0.10.0
libtpu: 0.0.40
codegen_flags: <defaults>
</compile_context>

<pallas_src>
import functools
import math

import jax
import jax.numpy as jnp
from jax import lax
from jax.experimental import pallas as pl
from jax.experimental.pallas import tpu as pltpu

LN_EPS = 1e-5  # PyTorch nn.LayerNorm default


# ---------------------------------------------------------------------------
# Shared math helpers (pure jnp; used by the kernel and by the pure-JAX ref).
# ---------------------------------------------------------------------------
def _layer_norm(z, gamma, beta):
    mu = jnp.mean(z, axis=-1, keepdims=True)
    var = jnp.mean((z - mu) ** 2, axis=-1, keepdims=True)
    return (z - mu) * lax.rsqrt(var + LN_EPS) * gamma + beta


def _attend(q, k, v, num_heads, keep, recip):
    """Scaled-dot-product attention core.

    q:    (Tq, D) f32 (1/sqrt(d_head) already folded into the Q projection)
    k, v: (Sk, D) bf16 (pre-projected, bias already added)
    keep: (Tq, Sk) bool mask (True = attend) or None
    recip: reciprocal function (pl.reciprocal inside the kernel, 1/x in the ref)
    """
    tq, d = q.shape
    dh = d // num_heads
    q_bf = q.astype(jnp.bfloat16)
    parts = []
    for h in range(num_heads):  # static unroll; scores are per-head by nature
        sl = slice(h * dh, (h + 1) * dh)
        s = lax.dot_general(q_bf[:, sl], k[:, sl],
                            (((1,), (1,)), ((), ())),
                            preferred_element_type=jnp.float32)      # (Tq, Sk)
        if keep is not None:
            s = jnp.where(keep, s, -1e30)
        s = s - jnp.max(s, axis=-1, keepdims=True)
        p = jnp.exp(s)
        p = p * recip(jnp.sum(p, axis=-1, keepdims=True))
        parts.append(jnp.dot(p.astype(jnp.bfloat16), v[:, sl],
                             preferred_element_type=jnp.float32))    # (Tq, dh)
    return jnp.concatenate(parts, axis=-1)                           # (Tq, D)


def _kernel_recip(x):
    return pl.reciprocal(x, approx=True)


def _ref_recip(x):
    return 1.0 / x


# ---------------------------------------------------------------------------
# Pallas kernel: one decoder block for one (batch, query-tile) grid point.
# Vector row indices in `vecs_ref` (11, D):
#   0 bq1*scale  1 bo1  2 g1  3 b1(LN)  4 bq2*scale  5 bo2  6 g2  7 b2(LN)
#   8 b2(FFN)    9 g3  10 b3(LN)
# ---------------------------------------------------------------------------
def _decoder_block_kernel(x_q_ref, kvs_ref, kvc_ref,
                          wq1_ref, wo1_ref, wq2_ref, wo2_ref,
                          wf1_ref, wf2_ref, vecs_ref, bf1_ref,
                          o_ref, *, num_heads):
    tq = x_q_ref.shape[1]
    d = x_q_ref.shape[2]
    s_self = kvs_ref.shape[1]
    qt = pl.program_id(1)

    vecs = vecs_ref[...]                               # (11, D) f32

    def vrow(i):
        return vecs[i:i + 1, :]                        # (1, D)

    x_q = x_q_ref[0]                                   # (tq, D) f32 residual
    x_q_bf = x_q.astype(jnp.bfloat16)

    # Boolean causal mask built once per grid point (no additive f32 mask array).
    rows = qt * tq + lax.broadcasted_iota(jnp.int32, (tq, s_self), 0)
    cols = lax.broadcasted_iota(jnp.int32, (tq, s_self), 1)
    keep = cols <= rows

    # ---- masked self-attention + Add & Norm ---------------------------------
    # K/V already projected (hoisted out of the grid), packed as [K | V] bf16.
    q1 = jnp.dot(x_q_bf, wq1_ref[...],
                 preferred_element_type=jnp.float32) + vrow(0)
    kvs = kvs_ref[0]                                   # (S, 2D) bf16
    ctx1 = _attend(q1, kvs[:, :d], kvs[:, d:], num_heads, keep, _kernel_recip)
    sa = jnp.dot(ctx1.astype(jnp.bfloat16), wo1_ref[...],
                 preferred_element_type=jnp.float32) + vrow(1)
    x1 = _layer_norm(x_q + sa, vrow(2), vrow(3))

    # ---- cross-attention (K/V pre-projected outside the grid) + Add & Norm ---
    q2 = jnp.dot(x1.astype(jnp.bfloat16), wq2_ref[...],
                 preferred_element_type=jnp.float32) + vrow(4)
    kvc = kvc_ref[0]                                   # (S_kv, 2D) bf16
    ctx2 = _attend(q2, kvc[:, :d], kvc[:, d:], num_heads, None, _kernel_recip)
    ca = jnp.dot(ctx2.astype(jnp.bfloat16), wo2_ref[...],
                 preferred_element_type=jnp.float32) + vrow(5)
    x2 = _layer_norm(x1 + ca, vrow(6), vrow(7))

    # ---- feed-forward + Add & Norm -------------------------------------------
    h = jnp.dot(x2.astype(jnp.bfloat16), wf1_ref[...],
                preferred_element_type=jnp.float32) + bf1_ref[...]
    h = jnp.maximum(h, 0.0)
    ff = jnp.dot(h.astype(jnp.bfloat16), wf2_ref[...],
                 preferred_element_type=jnp.float32) + vrow(8)
    x3 = _layer_norm(x2 + ff, vrow(9), vrow(10))

    o_ref[0] = x3.astype(o_ref.dtype)


def decoder_block_pallas(x, kv_self, kv_cross, weights, *, num_heads, tq):
    """One decoder block; grid = (batch, query tiles), both parallel."""
    b, s, d = x.shape
    skv = kv_cross.shape[1]
    assert s % tq == 0 and (tq % 8 == 0 or tq == s)
    n_qt = s // tq
    f = weights[4].shape[1]  # wf1: (D, F)

    in_specs = [
        pl.BlockSpec((1, tq, d), lambda i, t: (i, t, 0)),       # residual q tile
        pl.BlockSpec((1, s, 2 * d), lambda i, t: (i, 0, 0)),    # self  [K|V] bf16
        pl.BlockSpec((1, skv, 2 * d), lambda i, t: (i, 0, 0)),  # cross [K|V] bf16
    ] + [
        # Grid-invariant weights: whole-array resident in VMEM, single-buffered.
        pl.BlockSpec(memory_space=pltpu.MemorySpace.VMEM) for _ in weights
    ]
    out_specs = pl.BlockSpec((1, tq, d), lambda i, t: (i, t, 0))

    # --- generation-aware VMEM budget ---------------------------------------
    def nbytes(shape, dt):
        return math.prod(shape) * jnp.dtype(dt).itemsize

    data_blk = (nbytes((1, tq, d), jnp.float32)            # x tile
                + nbytes((1, s, 2 * d), jnp.bfloat16)      # self K|V
                + nbytes((1, skv, 2 * d), jnp.bfloat16)    # cross K|V
                + nbytes((1, tq, d), jnp.float32))         # out tile
    weight_bytes = sum(nbytes(w.shape, w.dtype) for w in weights)
    inter_bytes = (2 * nbytes((tq, max(s, skv)), jnp.float32)  # scores / probs
                   + 2 * nbytes((tq, f), jnp.float32)          # FFN hidden
                   + 8 * nbytes((tq, d), jnp.float32))         # q/ctx/residuals
    want = 2 * data_blk + weight_bytes + inter_bytes + (4 << 20)

    try:
        cap = int(getattr(pltpu.get_tpu_info(), "vmem_capacity_bytes", 128 << 20))
    except Exception:  # no TPU info available -> assume smallest (v7x-style) VMEM
        cap = 64 << 20
    vmem_limit = int(min(max(want, 16 << 20), int(0.75 * cap)))

    kernel = functools.partial(_decoder_block_kernel, num_heads=num_heads)
    return pl.pallas_call(
        kernel,
        out_shape=jax.ShapeDtypeStruct((b, s, d), jnp.float32),
        grid=(b, n_qt),
        in_specs=in_specs,
        out_specs=out_specs,
        compiler_params=pltpu.CompilerParams(
            dimension_semantics=("parallel", "parallel"),
            vmem_limit_bytes=vmem_limit),
    )(x, kv_self, kv_cross, *weights)


# ---------------------------------------------------------------------------
# Parameter packing (done ONCE at model-load time, outside the jitted forward).
# ---------------------------------------------------------------------------
def prepare_block_params(p, num_heads):
    """Canonical f32 params -> (kernel weight tuple, hoisted KV projection params).

    Folds 1/sqrt(d_head) into Wq/bq, casts matmul weights to bf16, stacks all
    (D,)-wide bias / LayerNorm vectors into one (11, D) f32 array, and packs the
    self / cross K,V projection weights (used OUTSIDE the grid) as (D, 2D).
    """
    d = p["self"]["wq"].shape[0]
    dh = d // num_heads
    scale = 1.0 / math.sqrt(dh)
    bf = jnp.bfloat16
    sa, ca, ff = p["self"], p["cross"], p["ffn"]

    vecs = jnp.stack([
        sa["bq"] * scale, sa["bo"], p["ln1"]["g"], p["ln1"]["b"],
        ca["bq"] * scale, ca["bo"], p["ln2"]["g"], p["ln2"]["b"],
        ff["b2"], p["ln3"]["g"], p["ln3"]["b"],
    ], axis=0).astype(jnp.float32)                      # (11, D)

    weights = (
        (sa["wq"] * scale).astype(bf),                  # wq1
        sa["wo"].astype(bf),                            # wo1
        (ca["wq"] * scale).astype(bf),                  # wq2
        ca["wo"].astype(bf),                            # wo2
        ff["w1"].astype(bf),                            # wf1
        ff["w2"].astype(bf),                            # wf2
        vecs,                                           # (11, D) f32
        ff["b1"].reshape(1, -1).astype(jnp.float32),    # (1, F)
    )
    kv_proj = (
        jnp.concatenate([sa["wk"], sa["wv"]], axis=1).astype(bf),
        jnp.concatenate([sa["bk"], sa["bv"]]).reshape(1, -1).astype(jnp.float32),
        jnp.concatenate([ca["wk"], ca["wv"]], axis=1).astype(bf),
        jnp.concatenate([ca["bk"], ca["bv"]]).reshape(1, -1).astype(jnp.float32),
    )
    return weights, kv_proj


def project_kv(src, wkv, bkv):
    """Hoisted K/V projection: (B, S, D) -> packed (B, S, 2D) bf16 = [K | V]."""
    out = jnp.einsum("bsd,de->bse", src.astype(jnp.bfloat16), wkv,
                     preferred_element_type=jnp.float32) + bkv
    return out.astype(jnp.bfloat16)


def choose_tq(s, target=256):
    """Largest q-tile <= target that divides S and is sublane (8) aligned."""
    if s <= target:
        return s
    t = (target // 8) * 8
    while t >= 8:
        if s % t == 0:
            return t
        t -= 8
    return s


@functools.partial(jax.jit, static_argnames=("num_heads", "tq"))
def transformer_decoder(x, cross_attention_kv, packed_layers, *, num_heads, tq):
    for weights, kv_proj in packed_layers:
        wkv_s, bkv_s, wkv_c, bkv_c = kv_proj
        # Both K/V projections hoisted out of the per-(batch, q-tile) grid.
        kv_self = project_kv(x, wkv_s, bkv_s)
        kv_cross = project_kv(cross_attention_kv, wkv_c, bkv_c)
        x = decoder_block_pallas(x, kv_self, kv_cross, weights,
                                 num_heads=num_heads, tq=tq)
    return x


# ---------------------------------------------------------------------------
# Pure-JAX reference (mirrors the same bf16-matmul / f32-stats math).
# ---------------------------------------------------------------------------
def _decoder_block_ref(x, kv_self, kv_cross, w, num_heads):
    wq1, wo1, wq2, wo2, wf1, wf2, vecs, bf1 = w
    b, s, d = x.shape

    def vrow(i):
        return vecs[i:i + 1, :]

    rows = lax.broadcasted_iota(jnp.int32, (s, s), 0)
    cols = lax.broadcasted_iota(jnp.int32, (s, s), 1)
    keep = cols <= rows

    out = []
    for i in range(b):
        xb = x[i]
        xb_bf = xb.astype(jnp.bfloat16)
        q1 = jnp.dot(xb_bf, wq1, preferred_element_type=jnp.float32) + vrow(0)
        kvs = kv_self[i]
        ctx1 = _attend(q1, kvs[:, :d], kvs[:, d:], num_heads, keep, _ref_recip)
        sa = jnp.dot(ctx1.astype(jnp.bfloat16), wo1,
                     preferred_element_type=jnp.float32) + vrow(1)
        x1 = _layer_norm(xb + sa, vrow(2), vrow(3))

        q2 = jnp.dot(x1.astype(jnp.bfloat16), wq2,
                     preferred_element_type=jnp.float32) + vrow(4)
        kvc = kv_cross[i]
        ctx2 = _attend(q2, kvc[:, :d], kvc[:, d:], num_heads, None, _ref_recip)
        ca = jnp.dot(ctx2.astype(jnp.bfloat16), wo2,
                     preferred_element_type=jnp.float32) + vrow(5)
        x2 = _layer_norm(x1 + ca, vrow(6), vrow(7))

        h = jnp.maximum(jnp.dot(x2.astype(jnp.bfloat16), wf1,
                                preferred_element_type=jnp.float32) + bf1, 0.0)
        ff = jnp.dot(h.astype(jnp.bfloat16), wf2,
                     preferred_element_type=jnp.float32) + vrow(8)
        out.append(_layer_norm(x2 + ff, vrow(9), vrow(10)))
    return jnp.stack(out)


def transformer_decoder_ref(x, cross_attention_kv, packed_layers, num_heads):
    for weights, kv_proj in packed_layers:
        wkv_s, bkv_s, wkv_c, bkv_c = kv_proj
        kv_self = project_kv(x, wkv_s, bkv_s)
        kv_cross = project_kv(cross_attention_kv, wkv_c, bkv_c)
        x = _decoder_block_ref(x, kv_self, kv_cross, weights, num_heads)
    return x


# ---------------------------------------------------------------------------
# Deterministic synthetic parameter init (shapes follow the module __init__).
# ---------------------------------------------------------------------------
def init_block_params(key, d, f):
    keys = iter(jax.random.split(key, 20))
    nk = lambda: next(keys)
    wsd = 1.0 / math.sqrt(d)
    wsf = 1.0 / math.sqrt(f)

    def attn():
        return {
            "wq": jax.random.normal(nk(), (d, d), jnp.float32) * wsd,
            "bq": jax.random.normal(nk(), (d,), jnp.float32) * 0.02,
            "wk": jax.random.normal(nk(), (d, d), jnp.float32) * wsd,
            "bk": jax.random.normal(nk(), (d,), jnp.float32) * 0.02,
            "wv": jax.random.normal(nk(), (d, d), jnp.float32) * wsd,
            "bv": jax.random.normal(nk(), (d,), jnp.float32) * 0.02,
            "wo": jax.random.normal(nk(), (d, d), jnp.float32) * wsd,
            "bo": jax.random.normal(nk(), (d,), jnp.float32) * 0.02,
        }

    def ln():
        return {"g": jnp.ones((d,), jnp.float32),
                "b": jnp.zeros((d,), jnp.float32)}

    ffn = {
        "w1": jax.random.normal(nk(), (d, f), jnp.float32) * wsd,
        "b1": jax.random.normal(nk(), (f,), jnp.float32) * 0.02,
        "w2": jax.random.normal(nk(), (f, d), jnp.float32) * wsf,
        "b2": jax.random.normal(nk(), (d,), jnp.float32) * 0.02,
    }
    return {"self": attn(), "ln1": ln(),
            "cross": attn(), "ln2": ln(),
            "ffn": ffn, "ln3": ln()}


if __name__ == "__main__":
    # Small but lane-dense shapes (D, F multiples of 128; S multiple of 8).
    B, S, S_KV = 2, 16, 16
    EMBED_DIM, NUM_HEADS, FF_DIM, NUM_LAYERS = 128, 4, 256, 2

    root = jax.random.PRNGKey(0)
    kx, kkv, kp = jax.random.split(root, 3)

    x = jax.random.normal(kx, (B, S, EMBED_DIM), jnp.float32)
    cross_attention_kv = jax.random.normal(kkv, (B, S_KV, EMBED_DIM), jnp.float32)

    layer_keys = jax.random.split(kp, NUM_LAYERS)
    layer_params = tuple(init_block_params(layer_keys[i], EMBED_DIM, FF_DIM)
                         for i in range(NUM_LAYERS))

    # Weight packing done once at "model load" time, outside the jitted forward.
    packed = tuple(prepare_block_params(p, NUM_HEADS) for p in layer_params)

    # Query tile targets 256 rows for real sequence lengths; at S=16 it is the
    # full sequence (single q tile per batch, grid = (B, 1)).
    TQ = choose_tq(S, target=256)

    out = transformer_decoder(x, cross_attention_kv, packed,
                              num_heads=NUM_HEADS, tq=TQ)
    out = jax.block_until_ready(out)

    ref = transformer_decoder_ref(x, cross_attention_kv, packed, NUM_HEADS)
    assert out.shape == (B, S, EMBED_DIM)
    err = float(jnp.max(jnp.abs(out - ref)))
    # Only divergence sources: approx reciprocal in softmax + accumulation order.
    assert err < 3e-2, f"max abs err {err}"

    print("KERNEL_OK")
</pallas_src>

<mosaic_0001>
module attributes {stable_mosaic.version = 11 : i64} {
  func.func @_decoder_block_kernel(%arg0: i32, %arg1: i32, %arg2: memref<1x16x128xf32, #tpu.memory_space<vmem>>, %arg3: memref<1x16x256xbf16, #tpu.memory_space<vmem>>, %arg4: memref<1x16x256xbf16, #tpu.memory_space<vmem>>, %arg5: memref<128x128xbf16, #tpu.memory_space<vmem>>, %arg6: memref<128x128xbf16, #tpu.memory_space<vmem>>, %arg7: memref<128x128xbf16, #tpu.memory_space<vmem>>, %arg8: memref<128x128xbf16, #tpu.memory_space<vmem>>, %arg9: memref<128x256xbf16, #tpu.memory_space<vmem>>, %arg10: memref<256x128xbf16, #tpu.memory_space<vmem>>, %arg11: memref<11x128xf32, #tpu.memory_space<vmem>>, %arg12: memref<1x256xf32, #tpu.memory_space<vmem>>, %arg13: memref<1x16x128xf32, #tpu.memory_space<vmem>>) attributes {dimension_semantics = [#tpu.dimension_semantics<parallel>, #tpu.dimension_semantics<parallel>], iteration_bounds = array<i64: 2, 1>, scalar_prefetch = 0 : i64, scratch_operands = 0 : i64, tpu.core_type = #tpu.core_type<tc>, window_params = [{transform_indices = @transform_0, window_bounds = array<i64: 1, 16, 128>}, {transform_indices = @transform_1, window_bounds = array<i64: 1, 16, 256>}, {transform_indices = @transform_2, window_bounds = array<i64: 1, 16, 256>}, {pipeline_mode = #tpu.pipeline_mode<synchronous>, transform_indices = @transform_3, window_bounds = array<i64: 128, 128>}, {pipeline_mode = #tpu.pipeline_mode<synchronous>, transform_indices = @transform_4, window_bounds = array<i64: 128, 128>}, {pipeline_mode = #tpu.pipeline_mode<synchronous>, transform_indices = @transform_5, window_bounds = array<i64: 128, 128>}, {pipeline_mode = #tpu.pipeline_mode<synchronous>, transform_indices = @transform_6, window_bounds = array<i64: 128, 128>}, {pipeline_mode = #tpu.pipeline_mode<synchronous>, transform_indices = @transform_7, window_bounds = array<i64: 128, 256>}, {pipeline_mode = #tpu.pipeline_mode<synchronous>, transform_indices = @transform_8, window_bounds = array<i64: 256, 128>}, {pipeline_mode = #tpu.pipeline_mode<synchronous>, transform_indices = @transform_9, window_bounds = array<i64: 11, 128>}, {pipeline_mode = #tpu.pipeline_mode<synchronous>, transform_indices = @transform_10, window_bounds = array<i64: 1, 256>}, {transform_indices = @transform_11, window_bounds = array<i64: 1, 16, 128>}]} {
    %c0 = arith.constant 0 : index
    %c0_0 = arith.constant 0 : index
    %0 = vector.load %arg11[%c0, %c0_0] : memref<11x128xf32, #tpu.memory_space<vmem>>, vector<11x128xf32>
    %c0_1 = arith.constant 0 : index
    %c0_2 = arith.constant 0 : index
    %c0_3 = arith.constant 0 : index
    %1 = vector.load %arg2[%c0_1, %c0_2, %c0_3] : memref<1x16x128xf32, #tpu.memory_space<vmem>>, vector<1x16x128xf32>
    %2 = vector.shape_cast %1 : vector<1x16x128xf32> to vector<16x128xf32>
    %3 = arith.truncf %2 : vector<16x128xf32> to vector<16x128xbf16>
    %c16_i32 = arith.constant 16 : i32
    %4 = arith.muli %arg1, %c16_i32 : i32
    %5 = tpu.iota {dimensions = array<i32: 0>} : vector<16x16xi32>
    %6 = vector.broadcast %4 : i32 to vector<16x16xi32>
    %7 = arith.addi %6, %5 : vector<16x16xi32>
    %8 = tpu.iota {dimensions = array<i32: 1>} : vector<16x16xi32>
    %9 = arith.cmpi sle, %8, %7 : vector<16x16xi32>
    %c0_4 = arith.constant 0 : index
    %c0_5 = arith.constant 0 : index
    %10 = vector.load %arg5[%c0_4, %c0_5] : memref<128x128xbf16, #tpu.memory_space<vmem>>, vector<128x128xbf16>
    %cst = arith.constant dense<0.000000e+00> : vector<16x128xf32>
    %11 = tpu.matmul %3, %10, %cst {dimension_numbers = #tpu.dot_dimension_numbers<[1], [0], [0], [1], [0, 0, 1, 1], [], []>} : vector<16x128xbf16>, vector<128x128xbf16>, vector<16x128xf32> -> vector<16x128xf32>
    %12 = vector.extract_strided_slice %0 {offsets = [0, 0], sizes = [1, 128], strides = [1, 1]} : vector<11x128xf32> to vector<1x128xf32>
    %13 = vector.broadcast %12 : vector<1x128xf32> to vector<16x128xf32>
    %14 = arith.addf %11, %13 : vector<16x128xf32>
    %c0_6 = arith.constant 0 : index
    %c0_7 = arith.constant 0 : index
    %c0_8 = arith.constant 0 : index
    %15 = vector.load %arg3[%c0_6, %c0_7, %c0_8] : memref<1x16x256xbf16, #tpu.memory_space<vmem>>, vector<1x16x256xbf16>
    %16 = vector.shape_cast %15 : vector<1x16x256xbf16> to vector<16x256xbf16>
    %17 = vector.extract_strided_slice %16 {offsets = [0, 0], sizes = [16, 128], strides = [1, 1]} : vector<16x256xbf16> to vector<16x128xbf16>
    %18 = vector.extract_strided_slice %16 {offsets = [0, 128], sizes = [16, 128], strides = [1, 1]} : vector<16x256xbf16> to vector<16x128xbf16>
    %19 = arith.truncf %14 : vector<16x128xf32> to vector<16x128xbf16>
    %20 = vector.extract_strided_slice %19 {offsets = [0, 0], sizes = [16, 32], strides = [1, 1]} : vector<16x128xbf16> to vector<16x32xbf16>
    %21 = vector.extract_strided_slice %17 {offsets = [0, 0], sizes = [16, 32], strides = [1, 1]} : vector<16x128xbf16> to vector<16x32xbf16>
    %cst_9 = arith.constant dense<0.000000e+00> : vector<16x16xf32>
    %22 = tpu.matmul %20, %21, %cst_9 {dimension_numbers = #tpu.dot_dimension_numbers<[1], [1], [0], [0], [0, 0, 1, 0], [], []>} : vector<16x32xbf16>, vector<16x32xbf16>, vector<16x16xf32> -> vector<16x16xf32>
    %cst_10 = arith.constant -1.000000e+30 : f32
    %23 = vector.broadcast %cst_10 : f32 to vector<16x16xf32>
    %24 = arith.select %9, %22, %23 : vector<16x16xi1>, vector<16x16xf32>
    %cst_11 = arith.constant dense<0xFF800000> : vector<16xf32>
    %25 = vector.multi_reduction <maximumf>, %24, %cst_11 [1] : vector<16x16xf32> to vector<16xf32>
    %26 = vector.shape_cast %25 : vector<16xf32> to vector<16x1xf32>
    %27 = vector.broadcast %26 : vector<16x1xf32> to vector<16x16xf32>
    %28 = arith.subf %24, %27 : vector<16x16xf32>
    %29 = math.exp %28 : vector<16x16xf32>
    %cst_12 = arith.constant dense<0.000000e+00> : vector<16xf32>
    %30 = vector.multi_reduction <add>, %29, %cst_12 [1] : vector<16x16xf32> to vector<16xf32>
    %31 = vector.shape_cast %30 : vector<16xf32> to vector<16x1xf32>
    %32 = tpu.reciprocal %31 {approx = true} : vector<16x1xf32> -> vector<16x1xf32>
    %33 = vector.broadcast %32 : vector<16x1xf32> to vector<16x16xf32>
    %34 = arith.mulf %29, %33 : vector<16x16xf32>
    %35 = arith.truncf %34 : vector<16x16xf32> to vector<16x16xbf16>
    %36 = vector.extract_strided_slice %18 {offsets = [0, 0], sizes = [16, 32], strides = [1, 1]} : vector<16x128xbf16> to vector<16x32xbf16>
    %cst_13 = arith.constant dense<0.000000e+00> : vector<16x32xf32>
    %37 = tpu.matmul %35, %36, %cst_13 {dimension_numbers = #tpu.dot_dimension_numbers<[1], [0], [0], [1], [0, 0, 1, 1], [], []>} : vector<16x16xbf16>, vector<16x32xbf16>, vector<16x32xf32> -> vector<16x32xf32>
    %38 = vector.extract_strided_slice %19 {offsets = [0, 32], sizes = [16, 32], strides = [1, 1]} : vector<16x128xbf16> to vector<16x32xbf16>
    %39 = vector.extract_strided_slice %17 {offsets = [0, 32], sizes = [16, 32], strides = [1, 1]} : vector<16x128xbf16> to vector<16x32xbf16>
    %cst_14 = arith.constant dense<0.000000e+00> : vector<16x16xf32>
    %40 = tpu.matmul %38, %39, %cst_14 {dimension_numbers = #tpu.dot_dimension_numbers<[1], [1], [0], [0], [0, 0, 1, 0], [], []>} : vector<16x32xbf16>, vector<16x32xbf16>, vector<16x16xf32> -> vector<16x16xf32>
    %cst_15 = arith.constant -1.000000e+30 : f32
    %41 = vector.broadcast %cst_15 : f32 to vector<16x16xf32>
    %42 = arith.select %9, %40, %41 : vector<16x16xi1>, vector<16x16xf32>
    %cst_16 = arith.constant dense<0xFF800000> : vector<16xf32>
    %43 = vector.multi_reduction <maximumf>, %42, %cst_16 [1] : vector<16x16xf32> to vector<16xf32>
    %44 = vector.shape_cast %43 : vector<16xf32> to vector<16x1xf32>
    %45 = vector.broadcast %44 : vector<16x1xf32> to vector<16x16xf32>
    %46 = arith.subf %42, %45 : vector<16x16xf32>
    %47 = math.exp %46 : vector<16x16xf32>
    %cst_17 = arith.constant dense<0.000000e+00> : vector<16xf32>
    %48 = vector.multi_reduction <add>, %47, %cst_17 [1] : vector<16x16xf32> to vector<16xf32>
    %49 = vector.shape_cast %48 : vector<16xf32> to vector<16x1xf32>
    %50 = tpu.reciprocal %49 {approx = true} : vector<16x1xf32> -> vector<16x1xf32>
    %51 = vector.broadcast %50 : vector<16x1xf32> to vector<16x16xf32>
    %52 = arith.mulf %47, %51 : vector<16x16xf32>
    %53 = arith.truncf %52 : vector<16x16xf32> to vector<16x16xbf16>
    %54 = vector.extract_strided_slice %18 {offsets = [0, 32], sizes = [16, 32], strides = [1, 1]} : vector<16x128xbf16> to vector<16x32xbf16>
    %cst_18 = arith.constant dense<0.000000e+00> : vector<16x32xf32>
    %55 = tpu.matmul %53, %54, %cst_18 {dimension_numbers = #tpu.dot_dimension_numbers<[1], [0], [0], [1], [0, 0, 1, 1], [], []>} : vector<16x16xbf16>, vector<16x32xbf16>, vector<16x32xf32> -> vector<16x32xf32>
    %56 = vector.extract_strided_slice %19 {offsets = [0, 64], sizes = [16, 32], strides = [1, 1]} : vector<16x128xbf16> to vector<16x32xbf16>
    %57 = vector.extract_strided_slice %17 {offsets = [0, 64], sizes = [16, 32], strides = [1, 1]} : vector<16x128xbf16> to vector<16x32xbf16>
    %cst_19 = arith.constant dense<0.000000e+00> : vector<16x16xf32>
    %58 = tpu.matmul %56, %57, %cst_19 {dimension_numbers = #tpu.dot_dimension_numbers<[1], [1], [0], [0], [0, 0, 1, 0], [], []>} : vector<16x32xbf16>, vector<16x32xbf16>, vector<16x16xf32> -> vector<16x16xf32>
    %cst_20 = arith.constant -1.000000e+30 : f32
    %59 = vector.broadcast %cst_20 : f32 to vector<16x16xf32>
    %60 = arith.select %9, %58, %59 : vector<16x16xi1>, vector<16x16xf32>
    %cst_21 = arith.constant dense<0xFF800000> : vector<16xf32>
    %61 = vector.multi_reduction <maximumf>, %60, %cst_21 [1] : vector<16x16xf32> to vector<16xf32>
    %62 = vector.shape_cast %61 : vector<16xf32> to vector<16x1xf32>
    %63 = vector.broadcast %62 : vector<16x1xf32> to vector<16x16xf32>
    %64 = arith.subf %60, %63 : vector<16x16xf32>
    %65 = math.exp %64 : vector<16x16xf32>
    %cst_22 = arith.constant dense<0.000000e+00> : vector<16xf32>
    %66 = vector.multi_reduction <add>, %65, %cst_22 [1] : vector<16x16xf32> to vector<16xf32>
    %67 = vector.shape_cast %66 : vector<16xf32> to vector<16x1xf32>
    %68 = tpu.reciprocal %67 {approx = true} : vector<16x1xf32> -> vector<16x1xf32>
    %69 = vector.broadcast %68 : vector<16x1xf32> to vector<16x16xf32>
    %70 = arith.mulf %65, %69 : vector<16x16xf32>
    %71 = arith.truncf %70 : vector<16x16xf32> to vector<16x16xbf16>
    %72 = vector.extract_strided_slice %18 {offsets = [0, 64], sizes = [16, 32], strides = [1, 1]} : vector<16x128xbf16> to vector<16x32xbf16>
    %cst_23 = arith.constant dense<0.000000e+00> : vector<16x32xf32>
    %73 = tpu.matmul %71, %72, %cst_23 {dimension_numbers = #tpu.dot_dimension_numbers<[1], [0], [0], [1], [0, 0, 1, 1], [], []>} : vector<16x16xbf16>, vector<16x32xbf16>, vector<16x32xf32> -> vector<16x32xf32>
    %74 = vector.extract_strided_slice %19 {offsets = [0, 96], sizes = [16, 32], strides = [1, 1]} : vector<16x128xbf16> to vector<16x32xbf16>
    %75 = vector.extract_strided_slice %17 {offsets = [0, 96], sizes = [16, 32], strides = [1, 1]} : vector<16x128xbf16> to vector<16x32xbf16>
    %cst_24 = arith.constant dense<0.000000e+00> : vector<16x16xf32>
    %76 = tpu.matmul %74, %75, %cst_24 {dimension_numbers = #tpu.dot_dimension_numbers<[1], [1], [0], [0], [0, 0, 1, 0], [], []>} : vector<16x32xbf16>, vector<16x32xbf16>, vector<16x16xf32> -> vector<16x16xf32>
    %cst_25 = arith.constant -1.000000e+30 : f32
    %77 = vector.broadcast %cst_25 : f32 to vector<16x16xf32>
    %78 = arith.select %9, %76, %77 : vector<16x16xi1>, vector<16x16xf32>
    %cst_26 = arith.constant dense<0xFF800000> : vector<16xf32>
    %79 = vector.multi_reduction <maximumf>, %78, %cst_26 [1] : vector<16x16xf32> to vector<16xf32>
    %80 = vector.shape_cast %79 : vector<16xf32> to vector<16x1xf32>
    %81 = vector.broadcast %80 : vector<16x1xf32> to vector<16x16xf32>
    %82 = arith.subf %78, %81 : vector<16x16xf32>
    %83 = math.exp %82 : vector<16x16xf32>
    %cst_27 = arith.constant dense<0.000000e+00> : vector<16xf32>
    %84 = vector.multi_reduction <add>, %83, %cst_27 [1] : vector<16x16xf32> to vector<16xf32>
    %85 = vector.shape_cast %84 : vector<16xf32> to vector<16x1xf32>
    %86 = tpu.reciprocal %85 {approx = true} : vector<16x1xf32> -> vector<16x1xf32>
    %87 = vector.broadcast %86 : vector<16x1xf32> to vector<16x16xf32>
    %88 = arith.mulf %83, %87 : vector<16x16xf32>
    %89 = arith.truncf %88 : vector<16x16xf32> to vector<16x16xbf16>
    %90 = vector.extract_strided_slice %18 {offsets = [0, 96], sizes = [16, 32], strides = [1, 1]} : vector<16x128xbf16> to vector<16x32xbf16>
    %cst_28 = arith.constant dense<0.000000e+00> : vector<16x32xf32>
    %91 = tpu.matmul %89, %90, %cst_28 {dimension_numbers = #tpu.dot_dimension_numbers<[1], [0], [0], [1], [0, 0, 1, 1], [], []>} : vector<16x16xbf16>, vector<16x32xbf16>, vector<16x32xf32> -> vector<16x32xf32>
    %92 = tpu.concatenate %37, %55, %73, %91 in 1 : vector<16x32xf32>, vector<16x32xf32>, vector<16x32xf32>, vector<16x32xf32> -> vector<16x128xf32>
    %93 = arith.truncf %92 : vector<16x128xf32> to vector<16x128xbf16>
    %c0_29 = arith.constant 0 : index
    %c0_30 = arith.constant 0 : index
    %94 = vector.load %arg6[%c0_29, %c0_30] : memref<128x128xbf16, #tpu.memory_space<vmem>>, vector<128x128xbf16>
    %cst_31 = arith.constant dense<0.000000e+00> : vector<16x128xf32>
    %95 = tpu.matmul %93, %94, %cst_31 {dimension_numbers = #tpu.dot_dimension_numbers<[1], [0], [0], [1], [0, 0, 1, 1], [], []>} : vector<16x128xbf16>, vector<128x128xbf16>, vector<16x128xf32> -> vector<16x128xf32>
    %96 = vector.extract_strided_slice %0 {offsets = [1, 0], sizes = [1, 128], strides = [1, 1]} : vector<11x128xf32> to vector<1x128xf32>
    %97 = vector.broadcast %96 : vector<1x128xf32> to vector<16x128xf32>
    %98 = arith.addf %95, %97 : vector<16x128xf32>
    %99 = arith.addf %2, %98 : vector<16x128xf32>
    %100 = vector.extract_strided_slice %0 {offsets = [2, 0], sizes = [1, 128], strides = [1, 1]} : vector<11x128xf32> to vector<1x128xf32>
    %101 = vector.extract_strided_slice %0 {offsets = [3, 0], sizes = [1, 128], strides = [1, 1]} : vector<11x128xf32> to vector<1x128xf32>
    %cst_32 = arith.constant dense<0.000000e+00> : vector<16xf32>
    %102 = vector.multi_reduction <add>, %99, %cst_32 [1] : vector<16x128xf32> to vector<16xf32>
    %103 = vector.shape_cast %102 : vector<16xf32> to vector<16x1xf32>
    %cst_33 = arith.constant 1.280000e+02 : f32
    %104 = vector.broadcast %cst_33 : f32 to vector<16x1xf32>
    %105 = arith.divf %103, %104 : vector<16x1xf32>
    %106 = vector.broadcast %105 : vector<16x1xf32> to vector<16x128xf32>
    %107 = arith.subf %99, %106 : vector<16x128xf32>
    %108 = arith.mulf %107, %107 : vector<16x128xf32>
    %cst_34 = arith.constant dense<0.000000e+00> : vector<16xf32>
    %109 = vector.multi_reduction <add>, %108, %cst_34 [1] : vector<16x128xf32> to vector<16xf32>
    %110 = vector.shape_cast %109 : vector<16xf32> to vector<16x1xf32>
    %cst_35 = arith.constant 1.280000e+02 : f32
    %111 = vector.broadcast %cst_35 : f32 to vector<16x1xf32>
    %112 = arith.divf %110, %111 : vector<16x1xf32>
    %113 = vector.broadcast %105 : vector<16x1xf32> to vector<16x128xf32>
    %114 = arith.subf %99, %113 : vector<16x128xf32>
    %cst_36 = arith.constant 9.99999974E-6 : f32
    %115 = vector.broadcast %cst_36 : f32 to vector<16x1xf32>
    %116 = arith.addf %112, %115 : vector<16x1xf32>
    %117 = math.rsqrt %116 : vector<16x1xf32>
    %118 = vector.broadcast %117 : vector<16x1xf32> to vector<16x128xf32>
    %119 = arith.mulf %114, %118 : vector<16x128xf32>
    %120 = vector.broadcast %100 : vector<1x128xf32> to vector<16x128xf32>
    %121 = arith.mulf %119, %120 : vector<16x128xf32>
    %122 = vector.broadcast %101 : vector<1x128xf32> to vector<16x128xf32>
    %123 = arith.addf %121, %122 : vector<16x128xf32>
    %124 = arith.truncf %123 : vector<16x128xf32> to vector<16x128xbf16>
    %c0_37 = arith.constant 0 : index
    %c0_38 = arith.constant 0 : index
    %125 = vector.load %arg7[%c0_37, %c0_38] : memref<128x128xbf16, #tpu.memory_space<vmem>>, vector<128x128xbf16>
    %cst_39 = arith.constant dense<0.000000e+00> : vector<16x128xf32>
    %126 = tpu.matmul %124, %125, %cst_39 {dimension_numbers = #tpu.dot_dimension_numbers<[1], [0], [0], [1], [0, 0, 1, 1], [], []>} : vector<16x128xbf16>, vector<128x128xbf16>, vector<16x128xf32> -> vector<16x128xf32>
    %127 = vector.extract_strided_slice %0 {offsets = [4, 0], sizes = [1, 128], strides = [1, 1]} : vector<11x128xf32> to vector<1x128xf32>
    %128 = vector.broadcast %127 : vector<1x128xf32> to vector<16x128xf32>
    %129 = arith.addf %126, %128 : vector<16x128xf32>
    %c0_40 = arith.constant 0 : index
    %c0_41 = arith.constant 0 : index
    %c0_42 = arith.constant 0 : index
    %130 = vector.load %arg4[%c0_40, %c0_41, %c0_42] : memref<1x16x256xbf16, #tpu.memory_space<vmem>>, vector<1x16x256xbf16>
    %131 = vector.shape_cast %130 : vector<1x16x256xbf16> to vector<16x256xbf16>
    %132 = vector.extract_strided_slice %131 {offsets = [0, 0], sizes = [16, 128], strides = [1, 1]} : vector<16x256xbf16> to vector<16x128xbf16>
    %133 = vector.extract_strided_slice %131 {offsets = [0, 128], sizes = [16, 128], strides = [1, 1]} : vector<16x256xbf16> to vector<16x128xbf16>
    %134 = arith.truncf %129 : vector<16x128xf32> to vector<16x128xbf16>
    %135 = vector.extract_strided_slice %134 {offsets = [0, 0], sizes = [16, 32], strides = [1, 1]} : vector<16x128xbf16> to vector<16x32xbf16>
    %136 = vector.extract_strided_slice %132 {offsets = [0, 0], sizes = [16, 32], strides = [1, 1]} : vector<16x128xbf16> to vector<16x32xbf16>
    %cst_43 = arith.constant dense<0.000000e+00> : vector<16x16xf32>
    %137 = tpu.matmul %135, %136, %cst_43 {dimension_numbers = #tpu.dot_dimension_numbers<[1], [1], [0], [0], [0, 0, 1, 0], [], []>} : vector<16x32xbf16>, vector<16x32xbf16>, vector<16x16xf32> -> vector<16x16xf32>
    %cst_44 = arith.constant dense<0xFF800000> : vector<16xf32>
    %138 = vector.multi_reduction <maximumf>, %137, %cst_44 [1] : vector<16x16xf32> to vector<16xf32>
    %139 = vector.shape_cast %138 : vector<16xf32> to vector<16x1xf32>
    %140 = vector.broadcast %139 : vector<16x1xf32> to vector<16x16xf32>
    %141 = arith.subf %137, %140 : vector<16x16xf32>
    %142 = math.exp %141 : vector<16x16xf32>
    %cst_45 = arith.constant dense<0.000000e+00> : vector<16xf32>
    %143 = vector.multi_reduction <add>, %142, %cst_45 [1] : vector<16x16xf32> to vector<16xf32>
    %144 = vector.shape_cast %143 : vector<16xf32> to vector<16x1xf32>
    %145 = tpu.reciprocal %144 {approx = true} : vector<16x1xf32> -> vector<16x1xf32>
    %146 = vector.broadcast %145 : vector<16x1xf32> to vector<16x16xf32>
    %147 = arith.mulf %142, %146 : vector<16x16xf32>
    %148 = arith.truncf %147 : vector<16x16xf32> to vector<16x16xbf16>
    %149 = vector.extract_strided_slice %133 {offsets = [0, 0], sizes = [16, 32], strides = [1, 1]} : vector<16x128xbf16> to vector<16x32xbf16>
    %cst_46 = arith.constant dense<0.000000e+00> : vector<16x32xf32>
    %150 = tpu.matmul %148, %149, %cst_46 {dimension_numbers = #tpu.dot_dimension_numbers<[1], [0], [0], [1], [0, 0, 1, 1], [], []>} : vector<16x16xbf16>, vector<16x32xbf16>, vector<16x32xf32> -> vector<16x32xf32>
    %151 = vector.extract_strided_slice %134 {offsets = [0, 32], sizes = [16, 32], strides = [1, 1]} : vector<16x128xbf16> to vector<16x32xbf16>
    %152 = vector.extract_strided_slice %132 {offsets = [0, 32], sizes = [16, 32], strides = [1, 1]} : vector<16x128xbf16> to vector<16x32xbf16>
    %cst_47 = arith.constant dense<0.000000e+00> : vector<16x16xf32>
    %153 = tpu.matmul %151, %152, %cst_47 {dimension_numbers = #tpu.dot_dimension_numbers<[1], [1], [0], [0], [0, 0, 1, 0], [], []>} : vector<16x32xbf16>, vector<16x32xbf16>, vector<16x16xf32> -> vector<16x16xf32>
    %cst_48 = arith.constant dense<0xFF800000> : vector<16xf32>
    %154 = vector.multi_reduction <maximumf>, %153, %cst_48 [1] : vector<16x16xf32> to vector<16xf32>
    %155 = vector.shape_cast %154 : vector<16xf32> to vector<16x1xf32>
    %156 = vector.broadcast %155 : vector<16x1xf32> to vector<16x16xf32>
    %157 = arith.subf %153, %156 : vector<16x16xf32>
    %158 = math.exp %157 : vector<16x16xf32>
    %cst_49 = arith.constant dense<0.000000e+00> : vector<16xf32>
    %159 = vector.multi_reduction <add>, %158, %cst_49 [1] : vector<16x16xf32> to vector<16xf32>
    %160 = vector.shape_cast %159 : vector<16xf32> to vector<16x1xf32>
    %161 = tpu.reciprocal %160 {approx = true} : vector<16x1xf32> -> vector<16x1xf32>
    %162 = vector.broadcast %161 : vector<16x1xf32> to vector<16x16xf32>
    %163 = arith.mulf %158, %162 : vector<16x16xf32>
    %164 = arith.truncf %163 : vector<16x16xf32> to vector<16x16xbf16>
    %165 = vector.extract_strided_slice %133 {offsets = [0, 32], sizes = [16, 32], strides = [1, 1]} : vector<16x128xbf16> to vector<16x32xbf16>
    %cst_50 = arith.constant dense<0.000000e+00> : vector<16x32xf32>
    %166 = tpu.matmul %164, %165, %cst_50 {dimension_numbers = #tpu.dot_dimension_numbers<[1], [0], [0], [1], [0, 0, 1, 1], [], []>} : vector<16x16xbf16>, vector<16x32xbf16>, vector<16x32xf32> -> vector<16x32xf32>
    %167 = vector.extract_strided_slice %134 {offsets = [0, 64], sizes = [16, 32], strides = [1, 1]} : vector<16x128xbf16> to vector<16x32xbf16>
    %168 = vector.extract_strided_slice %132 {offsets = [0, 64], sizes = [16, 32], strides = [1, 1]} : vector<16x128xbf16> to vector<16x32xbf16>
    %cst_51 = arith.constant dense<0.000000e+00> : vector<16x16xf32>
    %169 = tpu.matmul %167, %168, %cst_51 {dimension_numbers = #tpu.dot_dimension_numbers<[1], [1], [0], [0], [0, 0, 1, 0], [], []>} : vector<16x32xbf16>, vector<16x32xbf16>, vector<16x16xf32> -> vector<16x16xf32>
    %cst_52 = arith.constant dense<0xFF800000> : vector<16xf32>
    %170 = vector.multi_reduction <maximumf>, %169, %cst_52 [1] : vector<16x16xf32> to vector<16xf32>
    %171 = vector.shape_cast %170 : vector<16xf32> to vector<16x1xf32>
    %172 = vector.broadcast %171 : vector<16x1xf32> to vector<16x16xf32>
    %173 = arith.subf %169, %172 : vector<16x16xf32>
    %174 = math.exp %173 : vector<16x16xf32>
    %cst_53 = arith.constant dense<0.000000e+00> : vector<16xf32>
    %175 = vector.multi_reduction <add>, %174, %cst_53 [1] : vector<16x16xf32> to vector<16xf32>
    %176 = vector.shape_cast %175 : vector<16xf32> to vector<16x1xf32>
    %177 = tpu.reciprocal %176 {approx = true} : vector<16x1xf32> -> vector<16x1xf32>
    %178 = vector.broadcast %177 : vector<16x1xf32> to vector<16x16xf32>
    %179 = arith.mulf %174, %178 : vector<16x16xf32>
    %180 = arith.truncf %179 : vector<16x16xf32> to vector<16x16xbf16>
    %181 = vector.extract_strided_slice %133 {offsets = [0, 64], sizes = [16, 32], strides = [1, 1]} : vector<16x128xbf16> to vector<16x32xbf16>
    %cst_54 = arith.constant dense<0.000000e+00> : vector<16x32xf32>
    %182 = tpu.matmul %180, %181, %cst_54 {dimension_numbers = #tpu.dot_dimension_numbers<[1], [0], [0], [1], [0, 0, 1, 1], [], []>} : vector<16x16xbf16>, vector<16x32xbf16>, vector<16x32xf32> -> vector<16x32xf32>
    %183 = vector.extract_strided_slice %134 {offsets = [0, 96], sizes = [16, 32], strides = [1, 1]} : vector<16x128xbf16> to vector<16x32xbf16>
    %184 = vector.extract_strided_slice %132 {offsets = [0, 96], sizes = [16, 32], strides = [1, 1]} : vector<16x128xbf16> to vector<16x32xbf16>
    %cst_55 = arith.constant dense<0.000000e+00> : vector<16x16xf32>
    %185 = tpu.matmul %183, %184, %cst_55 {dimension_numbers = #tpu.dot_dimension_numbers<[1], [1], [0], [0], [0, 0, 1, 0], [], []>} : vector<16x32xbf16>, vector<16x32xbf16>, vector<16x16xf32> -> vector<16x16xf32>
    %cst_56 = arith.constant dense<0xFF800000> : vector<16xf32>
    %186 = vector.multi_reduction <maximumf>, %185, %cst_56 [1] : vector<16x16xf32> to vector<16xf32>
    %187 = vector.shape_cast %186 : vector<16xf32> to vector<16x1xf32>
    %188 = vector.broadcast %187 : vector<16x1xf32> to vector<16x16xf32>
    %189 = arith.subf %185, %188 : vector<16x16xf32>
    %190 = math.exp %189 : vector<16x16xf32>
    %cst_57 = arith.constant dense<0.000000e+00> : vector<16xf32>
    %191 = vector.multi_reduction <add>, %190, %cst_57 [1] : vector<16x16xf32> to vector<16xf32>
    %192 = vector.shape_cast %191 : vector<16xf32> to vector<16x1xf32>
    %193 = tpu.reciprocal %192 {approx = true} : vector<16x1xf32> -> vector<16x1xf32>
    %194 = vector.broadcast %193 : vector<16x1xf32> to vector<16x16xf32>
    %195 = arith.mulf %190, %194 : vector<16x16xf32>
    %196 = arith.truncf %195 : vector<16x16xf32> to vector<16x16xbf16>
    %197 = vector.extract_strided_slice %133 {offsets = [0, 96], sizes = [16, 32], strides = [1, 1]} : vector<16x128xbf16> to vector<16x32xbf16>
    %cst_58 = arith.constant dense<0.000000e+00> : vector<16x32xf32>
    %198 = tpu.matmul %196, %197, %cst_58 {dimension_numbers = #tpu.dot_dimension_numbers<[1], [0], [0], [1], [0, 0, 1, 1], [], []>} : vector<16x16xbf16>, vector<16x32xbf16>, vector<16x32xf32> -> vector<16x32xf32>
    %199 = tpu.concatenate %150, %166, %182, %198 in 1 : vector<16x32xf32>, vector<16x32xf32>, vector<16x32xf32>, vector<16x32xf32> -> vector<16x128xf32>
    %200 = arith.truncf %199 : vector<16x128xf32> to vector<16x128xbf16>
    %c0_59 = arith.constant 0 : index
    %c0_60 = arith.constant 0 : index
    %201 = vector.load %arg8[%c0_59, %c0_60] : memref<128x128xbf16, #tpu.memory_space<vmem>>, vector<128x128xbf16>
    %cst_61 = arith.constant dense<0.000000e+00> : vector<16x128xf32>
    %202 = tpu.matmul %200, %201, %cst_61 {dimension_numbers = #tpu.dot_dimension_numbers<[1], [0], [0], [1], [0, 0, 1, 1], [], []>} : vector<16x128xbf16>, vector<128x128xbf16>, vector<16x128xf32> -> vector<16x128xf32>
    %203 = vector.extract_strided_slice %0 {offsets = [5, 0], sizes = [1, 128], strides = [1, 1]} : vector<11x128xf32> to vector<1x128xf32>
    %204 = vector.broadcast %203 : vector<1x128xf32> to vector<16x128xf32>
    %205 = arith.addf %202, %204 : vector<16x128xf32>
    %206 = arith.addf %123, %205 : vector<16x128xf32>
    %207 = vector.extract_strided_slice %0 {offsets = [6, 0], sizes = [1, 128], strides = [1, 1]} : vector<11x128xf32> to vector<1x128xf32>
    %208 = vector.extract_strided_slice %0 {offsets = [7, 0], sizes = [1, 128], strides = [1, 1]} : vector<11x128xf32> to vector<1x128xf32>
    %cst_62 = arith.constant dense<0.000000e+00> : vector<16xf32>
    %209 = vector.multi_reduction <add>, %206, %cst_62 [1] : vector<16x128xf32> to vector<16xf32>
    %210 = vector.shape_cast %209 : vector<16xf32> to vector<16x1xf32>
    %cst_63 = arith.constant 1.280000e+02 : f32
    %211 = vector.broadcast %cst_63 : f32 to vector<16x1xf32>
    %212 = arith.divf %210, %211 : vector<16x1xf32>
    %213 = vector.broadcast %212 : vector<16x1xf32> to vector<16x128xf32>
    %214 = arith.subf %206, %213 : vector<16x128xf32>
    %215 = arith.mulf %214, %214 : vector<16x128xf32>
    %cst_64 = arith.constant dense<0.000000e+00> : vector<16xf32>
    %216 = vector.multi_reduction <add>, %215, %cst_64 [1] : vector<16x128xf32> to vector<16xf32>
    %217 = vector.shape_cast %216 : vector<16xf32> to vector<16x1xf32>
    %cst_65 = arith.constant 1.280000e+02 : f32
    %218 = vector.broadcast %cst_65 : f32 to vector<16x1xf32>
    %219 = arith.divf %217, %218 : vector<16x1xf32>
    %220 = vector.broadcast %212 : vector<16x1xf32> to vector<16x128xf32>
    %221 = arith.subf %206, %220 : vector<16x128xf32>
    %cst_66 = arith.constant 9.99999974E-6 : f32
    %222 = vector.broadcast %cst_66 : f32 to vector<16x1xf32>
    %223 = arith.addf %219, %222 : vector<16x1xf32>
    %224 = math.rsqrt %223 : vector<16x1xf32>
    %225 = vector.broadcast %224 : vector<16x1xf32> to vector<16x128xf32>
    %226 = arith.mulf %221, %225 : vector<16x128xf32>
    %227 = vector.broadcast %207 : vector<1x128xf32> to vector<16x128xf32>
    %228 = arith.mulf %226, %227 : vector<16x128xf32>
    %229 = vector.broadcast %208 : vector<1x128xf32> to vector<16x128xf32>
    %230 = arith.addf %228, %229 : vector<16x128xf32>
    %231 = arith.truncf %230 : vector<16x128xf32> to vector<16x128xbf16>
    %c0_67 = arith.constant 0 : index
    %c0_68 = arith.constant 0 : index
    %232 = vector.load %arg9[%c0_67, %c0_68] : memref<128x256xbf16, #tpu.memory_space<vmem>>, vector<128x256xbf16>
    %cst_69 = arith.constant dense<0.000000e+00> : vector<16x256xf32>
    %233 = tpu.matmul %231, %232, %cst_69 {dimension_numbers = #tpu.dot_dimension_numbers<[1], [0], [0], [1], [0, 0, 1, 1], [], []>} : vector<16x128xbf16>, vector<128x256xbf16>, vector<16x256xf32> -> vector<16x256xf32>
    %c0_70 = arith.constant 0 : index
    %c0_71 = arith.constant 0 : index
    %234 = vector.load %arg12[%c0_70, %c0_71] : memref<1x256xf32, #tpu.memory_space<vmem>>, vector<1x256xf32>
    %235 = vector.broadcast %234 : vector<1x256xf32> to vector<16x256xf32>
    %236 = arith.addf %233, %235 : vector<16x256xf32>
    %cst_72 = arith.constant 0.000000e+00 : f32
    %237 = vector.broadcast %cst_72 : f32 to vector<16x256xf32>
    %238 = arith.maximumf %236, %237 : vector<16x256xf32>
    %239 = arith.truncf %238 : vector<16x256xf32> to vector<16x256xbf16>
    %c0_73 = arith.constant 0 : index
    %c0_74 = arith.constant 0 : index
    %240 = vector.load %arg10[%c0_73, %c0_74] : memref<256x128xbf16, #tpu.memory_space<vmem>>, vector<256x128xbf16>
    %cst_75 = arith.constant dense<0.000000e+00> : vector<16x128xf32>
    %241 = tpu.matmul %239, %240, %cst_75 {dimension_numbers = #tpu.dot_dimension_numbers<[1], [0], [0], [1], [0, 0, 1, 1], [], []>} : vector<16x256xbf16>, vector<256x128xbf16>, vector<16x128xf32> -> vector<16x128xf32>
    %242 = vector.extract_strided_slice %0 {offsets = [8, 0], sizes = [1, 128], strides = [1, 1]} : vector<11x128xf32> to vector<1x128xf32>
    %243 = vector.broadcast %242 : vector<1x128xf32> to vector<16x128xf32>
    %244 = arith.addf %241, %243 : vector<16x128xf32>
    %245 = arith.addf %230, %244 : vector<16x128xf32>
    %246 = vector.extract_strided_slice %0 {offsets = [9, 0], sizes = [1, 128], strides = [1, 1]} : vector<11x128xf32> to vector<1x128xf32>
    %247 = vector.extract_strided_slice %0 {offsets = [10, 0], sizes = [1, 128], strides = [1, 1]} : vector<11x128xf32> to vector<1x128xf32>
    %cst_76 = arith.constant dense<0.000000e+00> : vector<16xf32>
    %248 = vector.multi_reduction <add>, %245, %cst_76 [1] : vector<16x128xf32> to vector<16xf32>
    %249 = vector.shape_cast %248 : vector<16xf32> to vector<16x1xf32>
    %cst_77 = arith.constant 1.280000e+02 : f32
    %250 = vector.broadcast %cst_77 : f32 to vector<16x1xf32>
    %251 = arith.divf %249, %250 : vector<16x1xf32>
    %252 = vector.broadcast %251 : vector<16x1xf32> to vector<16x128xf32>
    %253 = arith.subf %245, %252 : vector<16x128xf32>
    %254 = arith.mulf %253, %253 : vector<16x128xf32>
    %cst_78 = arith.constant dense<0.000000e+00> : vector<16xf32>
    %255 = vector.multi_reduction <add>, %254, %cst_78 [1] : vector<16x128xf32> to vector<16xf32>
    %256 = vector.shape_cast %255 : vector<16xf32> to vector<16x1xf32>
    %cst_79 = arith.constant 1.280000e+02 : f32
    %257 = vector.broadcast %cst_79 : f32 to vector<16x1xf32>
    %258 = arith.divf %256, %257 : vector<16x1xf32>
    %259 = vector.broadcast %251 : vector<16x1xf32> to vector<16x128xf32>
    %260 = arith.subf %245, %259 : vector<16x128xf32>
    %cst_80 = arith.constant 9.99999974E-6 : f32
    %261 = vector.broadcast %cst_80 : f32 to vector<16x1xf32>
    %262 = arith.addf %258, %261 : vector<16x1xf32>
    %263 = math.rsqrt %262 : vector<16x1xf32>
    %264 = vector.broadcast %263 : vector<16x1xf32> to vector<16x128xf32>
    %265 = arith.mulf %260, %264 : vector<16x128xf32>
    %266 = vector.broadcast %246 : vector<1x128xf32> to vector<16x128xf32>
    %267 = arith.mulf %265, %266 : vector<16x128xf32>
    %268 = vector.broadcast %247 : vector<1x128xf32> to vector<16x128xf32>
    %269 = arith.addf %267, %268 : vector<16x128xf32>
    %c0_81 = arith.constant 0 : index
    %c0_82 = arith.constant 0 : index
    %c0_83 = arith.constant 0 : index
    %270 = vector.load %arg13[%c0_81, %c0_82, %c0_83] : memref<1x16x128xf32, #tpu.memory_space<vmem>>, vector<1x16x128xf32>
    %271 = vector.shape_cast %270 : vector<1x16x128xf32> to vector<16x128xf32>
    %272 = vector.shape_cast %269 : vector<16x128xf32> to vector<1x16x128xf32>
    tpu.vector_store %arg13[%c0_81, %c0_82, %c0_83], %272 {strides = array<i32>} : memref<1x16x128xf32, #tpu.memory_space<vmem>>, vector<1x16x128xf32>,
    return
  }
  func.func @transform_0(%arg0: i32, %arg1: i32) -> (i32, i32, i32) {
    %c0_i32 = arith.constant 0 : i32
    %c0_i32_0 = arith.constant 0 : i32
    return %arg0, %arg1, %c0_i32 : i32, i32, i32
  }
  func.func @transform_1(%arg0: i32, %arg1: i32) -> (i32, i32, i32) {
    %c0_i32 = arith.constant 0 : i32
    %c0_i32_0 = arith.constant 0 : i32
    %c0_i32_1 = arith.constant 0 : i32
    return %arg0, %c0_i32, %c0_i32_0 : i32, i32, i32
  }
  func.func @transform_2(%arg0: i32, %arg1: i32) -> (i32, i32, i32) {
    %c0_i32 = arith.constant 0 : i32
    %c0_i32_0 = arith.constant 0 : i32
    %c0_i32_1 = arith.constant 0 : i32
    return %arg0, %c0_i32, %c0_i32_0 : i32, i32, i32
  }
  func.func @transform_3(%arg0: i32, %arg1: i32) -> (i32, i32) {
    %c0_i32 = arith.constant 0 : i32
    %c0_i32_0 = arith.constant 0 : i32
    %c0_i32_1 = arith.constant 0 : i32
    return %c0_i32, %c0_i32_0 : i32, i32
  }
  func.func @transform_4(%arg0: i32, %arg1: i32) -> (i32, i32) {
    %c0_i32 = arith.constant 0 : i32
    %c0_i32_0 = arith.constant 0 : i32
    %c0_i32_1 = arith.constant 0 : i32
    return %c0_i32, %c0_i32_0 : i32, i32
  }
  func.func @transform_5(%arg0: i32, %arg1: i32) -> (i32, i32) {
    %c0_i32 = arith.constant 0 : i32
    %c0_i32_0 = arith.constant 0 : i32
    %c0_i32_1 = arith.constant 0 : i32
    return %c0_i32, %c0_i32_0 : i32, i32
  }
  func.func @transform_6(%arg0: i32, %arg1: i32) -> (i32, i32) {
    %c0_i32 = arith.constant 0 : i32
    %c0_i32_0 = arith.constant 0 : i32
    %c0_i32_1 = arith.constant 0 : i32
    return %c0_i32, %c0_i32_0 : i32, i32
  }
  func.func @transform_7(%arg0: i32, %arg1: i32) -> (i32, i32) {
    %c0_i32 = arith.constant 0 : i32
    %c0_i32_0 = arith.constant 0 : i32
    %c0_i32_1 = arith.constant 0 : i32
    return %c0_i32, %c0_i32_0 : i32, i32
  }
  func.func @transform_8(%arg0: i32, %arg1: i32) -> (i32, i32) {
    %c0_i32 = arith.constant 0 : i32
    %c0_i32_0 = arith.constant 0 : i32
    %c0_i32_1 = arith.constant 0 : i32
    return %c0_i32, %c0_i32_0 : i32, i32
  }
  func.func @transform_9(%arg0: i32, %arg1: i32) -> (i32, i32) {
    %c0_i32 = arith.constant 0 : i32
    %c0_i32_0 = arith.constant 0 : i32
    %c0_i32_1 = arith.constant 0 : i32
    return %c0_i32, %c0_i32_0 : i32, i32
  }
  func.func @transform_10(%arg0: i32, %arg1: i32) -> (i32, i32) {
    %c0_i32 = arith.constant 0 : i32
    %c0_i32_0 = arith.constant 0 : i32
    %c0_i32_1 = arith.constant 0 : i32
    return %c0_i32, %c0_i32_0 : i32, i32
  }
  func.func @transform_11(%arg0: i32, %arg1: i32) -> (i32, i32, i32) {
    %c0_i32 = arith.constant 0 : i32
    %c0_i32_0 = arith.constant 0 : i32
    return %arg0, %arg1, %c0_i32 : i32, i32, i32
  }
}

module attributes {stable_mosaic.version = 11 : i64} {
  func.func @_decoder_block_kernel(%arg0: i32, %arg1: i32, %arg2: memref<1x16x128xf32, #tpu.memory_space<vmem>>, %arg3: memref<1x16x256xbf16, #tpu.memory_space<vmem>>, %arg4: memref<1x16x256xbf16, #tpu.memory_space<vmem>>, %arg5: memref<128x128xbf16, #tpu.memory_space<vmem>>, %arg6: memref<128x128xbf16, #tpu.memory_space<vmem>>, %arg7: memref<128x128xbf16, #tpu.memory_space<vmem>>, %arg8: memref<128x128xbf16, #tpu.memory_space<vmem>>, %arg9: memref<128x256xbf16, #tpu.memory_space<vmem>>, %arg10: memref<256x128xbf16, #tpu.memory_space<vmem>>, %arg11: memref<11x128xf32, #tpu.memory_space<vmem>>, %arg12: memref<1x256xf32, #tpu.memory_space<vmem>>, %arg13: memref<1x16x128xf32, #tpu.memory_space<vmem>>) attributes {dimension_semantics = [#tpu.dimension_semantics<parallel>, #tpu.dimension_semantics<parallel>], iteration_bounds = array<i64: 2, 1>, scalar_prefetch = 0 : i64, scratch_operands = 0 : i64, tpu.core_type = #tpu.core_type<tc>, window_params = [{transform_indices = @transform_0, window_bounds = array<i64: 1, 16, 128>}, {transform_indices = @transform_1, window_bounds = array<i64: 1, 16, 256>}, {transform_indices = @transform_2, window_bounds = array<i64: 1, 16, 256>}, {pipeline_mode = #tpu.pipeline_mode<synchronous>, transform_indices = @transform_3, window_bounds = array<i64: 128, 128>}, {pipeline_mode = #tpu.pipeline_mode<synchronous>, transform_indices = @transform_4, window_bounds = array<i64: 128, 128>}, {pipeline_mode = #tpu.pipeline_mode<synchronous>, transform_indices = @transform_5, window_bounds = array<i64: 128, 128>}, {pipeline_mode = #tpu.pipeline_mode<synchronous>, transform_indices = @transform_6, window_bounds = array<i64: 128, 128>}, {pipeline_mode = #tpu.pipeline_mode<synchronous>, transform_indices = @transform_7, window_bounds = array<i64: 128, 256>}, {pipeline_mode = #tpu.pipeline_mode<synchronous>, transform_indices = @transform_8, window_bounds = array<i64: 256, 128>}, {pipeline_mode = #tpu.pipeline_mode<synchronous>, transform_indices = @transform_9, window_bounds = array<i64: 11, 128>}, {pipeline_mode = #tpu.pipeline_mode<synchronous>, transform_indices = @transform_10, window_bounds = array<i64: 1, 256>}, {transform_indices = @transform_11, window_bounds = array<i64: 1, 16, 128>}]} {
    %c0 = arith.constant 0 : index
    %c0_0 = arith.constant 0 : index
    %0 = vector.load %arg11[%c0, %c0_0] : memref<11x128xf32, #tpu.memory_space<vmem>>, vector<11x128xf32>
    %c0_1 = arith.constant 0 : index
    %c0_2 = arith.constant 0 : index
    %c0_3 = arith.constant 0 : index
    %1 = vector.load %arg2[%c0_1, %c0_2, %c0_3] : memref<1x16x128xf32, #tpu.memory_space<vmem>>, vector<1x16x128xf32>
    %2 = vector.shape_cast %1 : vector<1x16x128xf32> to vector<16x128xf32>
    %3 = arith.truncf %2 : vector<16x128xf32> to vector<16x128xbf16>
    %c16_i32 = arith.constant 16 : i32
    %4 = arith.muli %arg1, %c16_i32 : i32
    %5 = tpu.iota {dimensions = array<i32: 0>} : vector<16x16xi32>
    %6 = vector.broadcast %4 : i32 to vector<16x16xi32>
    %7 = arith.addi %6, %5 : vector<16x16xi32>
    %8 = tpu.iota {dimensions = array<i32: 1>} : vector<16x16xi32>
    %9 = arith.cmpi sle, %8, %7 : vector<16x16xi32>
    %c0_4 = arith.constant 0 : index
    %c0_5 = arith.constant 0 : index
    %10 = vector.load %arg5[%c0_4, %c0_5] : memref<128x128xbf16, #tpu.memory_space<vmem>>, vector<128x128xbf16>
    %cst = arith.constant dense<0.000000e+00> : vector<16x128xf32>
    %11 = tpu.matmul %3, %10, %cst {dimension_numbers = #tpu.dot_dimension_numbers<[1], [0], [0], [1], [0, 0, 1, 1], [], []>} : vector<16x128xbf16>, vector<128x128xbf16>, vector<16x128xf32> -> vector<16x128xf32>
    %12 = vector.extract_strided_slice %0 {offsets = [0, 0], sizes = [1, 128], strides = [1, 1]} : vector<11x128xf32> to vector<1x128xf32>
    %13 = vector.broadcast %12 : vector<1x128xf32> to vector<16x128xf32>
    %14 = arith.addf %11, %13 : vector<16x128xf32>
    %c0_6 = arith.constant 0 : index
    %c0_7 = arith.constant 0 : index
    %c0_8 = arith.constant 0 : index
    %15 = vector.load %arg3[%c0_6, %c0_7, %c0_8] : memref<1x16x256xbf16, #tpu.memory_space<vmem>>, vector<1x16x256xbf16>
    %16 = vector.shape_cast %15 : vector<1x16x256xbf16> to vector<16x256xbf16>
    %17 = vector.extract_strided_slice %16 {offsets = [0, 0], sizes = [16, 128], strides = [1, 1]} : vector<16x256xbf16> to vector<16x128xbf16>
    %18 = vector.extract_strided_slice %16 {offsets = [0, 128], sizes = [16, 128], strides = [1, 1]} : vector<16x256xbf16> to vector<16x128xbf16>
    %19 = arith.truncf %14 : vector<16x128xf32> to vector<16x128xbf16>
    %20 = vector.extract_strided_slice %19 {offsets = [0, 0], sizes = [16, 32], strides = [1, 1]} : vector<16x128xbf16> to vector<16x32xbf16>
    %21 = vector.extract_strided_slice %17 {offsets = [0, 0], sizes = [16, 32], strides = [1, 1]} : vector<16x128xbf16> to vector<16x32xbf16>
    %cst_9 = arith.constant dense<0.000000e+00> : vector<16x16xf32>
    %22 = tpu.matmul %20, %21, %cst_9 {dimension_numbers = #tpu.dot_dimension_numbers<[1], [1], [0], [0], [0, 0, 1, 0], [], []>} : vector<16x32xbf16>, vector<16x32xbf16>, vector<16x16xf32> -> vector<16x16xf32>
    %cst_10 = arith.constant -1.000000e+30 : f32
    %23 = vector.broadcast %cst_10 : f32 to vector<16x16xf32>
    %24 = arith.select %9, %22, %23 : vector<16x16xi1>, vector<16x16xf32>
    %cst_11 = arith.constant dense<0xFF800000> : vector<16xf32>
    %25 = vector.multi_reduction <maximumf>, %24, %cst_11 [1] : vector<16x16xf32> to vector<16xf32>
    %26 = vector.shape_cast %25 : vector<16xf32> to vector<16x1xf32>
    %27 = vector.broadcast %26 : vector<16x1xf32> to vector<16x16xf32>
    %28 = arith.subf %24, %27 : vector<16x16xf32>
    %29 = math.exp %28 : vector<16x16xf32>
    %cst_12 = arith.constant dense<0.000000e+00> : vector<16xf32>
    %30 = vector.multi_reduction <add>, %29, %cst_12 [1] : vector<16x16xf32> to vector<16xf32>
    %31 = vector.shape_cast %30 : vector<16xf32> to vector<16x1xf32>
    %32 = tpu.reciprocal %31 {approx = true} : vector<16x1xf32> -> vector<16x1xf32>
    %33 = vector.broadcast %32 : vector<16x1xf32> to vector<16x16xf32>
    %34 = arith.mulf %29, %33 : vector<16x16xf32>
    %35 = arith.truncf %34 : vector<16x16xf32> to vector<16x16xbf16>
    %36 = vector.extract_strided_slice %18 {offsets = [0, 0], sizes = [16, 32], strides = [1, 1]} : vector<16x128xbf16> to vector<16x32xbf16>
    %cst_13 = arith.constant dense<0.000000e+00> : vector<16x32xf32>
    %37 = tpu.matmul %35, %36, %cst_13 {dimension_numbers = #tpu.dot_dimension_numbers<[1], [0], [0], [1], [0, 0, 1, 1], [], []>} : vector<16x16xbf16>, vector<16x32xbf16>, vector<16x32xf32> -> vector<16x32xf32>
    %38 = vector.extract_strided_slice %19 {offsets = [0, 32], sizes = [16, 32], strides = [1, 1]} : vector<16x128xbf16> to vector<16x32xbf16>
    %39 = vector.extract_strided_slice %17 {offsets = [0, 32], sizes = [16, 32], strides = [1, 1]} : vector<16x128xbf16> to vector<16x32xbf16>
    %cst_14 = arith.constant dense<0.000000e+00> : vector<16x16xf32>
    %40 = tpu.matmul %38, %39, %cst_14 {dimension_numbers = #tpu.dot_dimension_numbers<[1], [1], [0], [0], [0, 0, 1, 0], [], []>} : vector<16x32xbf16>, vector<16x32xbf16>, vector<16x16xf32> -> vector<16x16xf32>
    %cst_15 = arith.constant -1.000000e+30 : f32
    %41 = vector.broadcast %cst_15 : f32 to vector<16x16xf32>
    %42 = arith.select %9, %40, %41 : vector<16x16xi1>, vector<16x16xf32>
    %cst_16 = arith.constant dense<0xFF800000> : vector<16xf32>
    %43 = vector.multi_reduction <maximumf>, %42, %cst_16 [1] : vector<16x16xf32> to vector<16xf32>
    %44 = vector.shape_cast %43 : vector<16xf32> to vector<16x1xf32>
    %45 = vector.broadcast %44 : vector<16x1xf32> to vector<16x16xf32>
    %46 = arith.subf %42, %45 : vector<16x16xf32>
    %47 = math.exp %46 : vector<16x16xf32>
    %cst_17 = arith.constant dense<0.000000e+00> : vector<16xf32>
    %48 = vector.multi_reduction <add>, %47, %cst_17 [1] : vector<16x16xf32> to vector<16xf32>
    %49 = vector.shape_cast %48 : vector<16xf32> to vector<16x1xf32>
    %50 = tpu.reciprocal %49 {approx = true} : vector<16x1xf32> -> vector<16x1xf32>
    %51 = vector.broadcast %50 : vector<16x1xf32> to vector<16x16xf32>
    %52 = arith.mulf %47, %51 : vector<16x16xf32>
    %53 = arith.truncf %52 : vector<16x16xf32> to vector<16x16xbf16>
    %54 = vector.extract_strided_slice %18 {offsets = [0, 32], sizes = [16, 32], strides = [1, 1]} : vector<16x128xbf16> to vector<16x32xbf16>
    %cst_18 = arith.constant dense<0.000000e+00> : vector<16x32xf32>
    %55 = tpu.matmul %53, %54, %cst_18 {dimension_numbers = #tpu.dot_dimension_numbers<[1], [0], [0], [1], [0, 0, 1, 1], [], []>} : vector<16x16xbf16>, vector<16x32xbf16>, vector<16x32xf32> -> vector<16x32xf32>
    %56 = vector.extract_strided_slice %19 {offsets = [0, 64], sizes = [16, 32], strides = [1, 1]} : vector<16x128xbf16> to vector<16x32xbf16>
    %57 = vector.extract_strided_slice %17 {offsets = [0, 64], sizes = [16, 32], strides = [1, 1]} : vector<16x128xbf16> to vector<16x32xbf16>
    %cst_19 = arith.constant dense<0.000000e+00> : vector<16x16xf32>
    %58 = tpu.matmul %56, %57, %cst_19 {dimension_numbers = #tpu.dot_dimension_numbers<[1], [1], [0], [0], [0, 0, 1, 0], [], []>} : vector<16x32xbf16>, vector<16x32xbf16>, vector<16x16xf32> -> vector<16x16xf32>
    %cst_20 = arith.constant -1.000000e+30 : f32
    %59 = vector.broadcast %cst_20 : f32 to vector<16x16xf32>
    %60 = arith.select %9, %58, %59 : vector<16x16xi1>, vector<16x16xf32>
    %cst_21 = arith.constant dense<0xFF800000> : vector<16xf32>
    %61 = vector.multi_reduction <maximumf>, %60, %cst_21 [1] : vector<16x16xf32> to vector<16xf32>
    %62 = vector.shape_cast %61 : vector<16xf32> to vector<16x1xf32>
    %63 = vector.broadcast %62 : vector<16x1xf32> to vector<16x16xf32>
    %64 = arith.subf %60, %63 : vector<16x16xf32>
    %65 = math.exp %64 : vector<16x16xf32>
    %cst_22 = arith.constant dense<0.000000e+00> : vector<16xf32>
    %66 = vector.multi_reduction <add>, %65, %cst_22 [1] : vector<16x16xf32> to vector<16xf32>
    %67 = vector.shape_cast %66 : vector<16xf32> to vector<16x1xf32>
    %68 = tpu.reciprocal %67 {approx = true} : vector<16x1xf32> -> vector<16x1xf32>
    %69 = vector.broadcast %68 : vector<16x1xf32> to vector<16x16xf32>
    %70 = arith.mulf %65, %69 : vector<16x16xf32>
    %71 = arith.truncf %70 : vector<16x16xf32> to vector<16x16xbf16>
    %72 = vector.extract_strided_slice %18 {offsets = [0, 64], sizes = [16, 32], strides = [1, 1]} : vector<16x128xbf16> to vector<16x32xbf16>
    %cst_23 = arith.constant dense<0.000000e+00> : vector<16x32xf32>
    %73 = tpu.matmul %71, %72, %cst_23 {dimension_numbers = #tpu.dot_dimension_numbers<[1], [0], [0], [1], [0, 0, 1, 1], [], []>} : vector<16x16xbf16>, vector<16x32xbf16>, vector<16x32xf32> -> vector<16x32xf32>
    %74 = vector.extract_strided_slice %19 {offsets = [0, 96], sizes = [16, 32], strides = [1, 1]} : vector<16x128xbf16> to vector<16x32xbf16>
    %75 = vector.extract_strided_slice %17 {offsets = [0, 96], sizes = [16, 32], strides = [1, 1]} : vector<16x128xbf16> to vector<16x32xbf16>
    %cst_24 = arith.constant dense<0.000000e+00> : vector<16x16xf32>
    %76 = tpu.matmul %74, %75, %cst_24 {dimension_numbers = #tpu.dot_dimension_numbers<[1], [1], [0], [0], [0, 0, 1, 0], [], []>} : vector<16x32xbf16>, vector<16x32xbf16>, vector<16x16xf32> -> vector<16x16xf32>
    %cst_25 = arith.constant -1.000000e+30 : f32
    %77 = vector.broadcast %cst_25 : f32 to vector<16x16xf32>
    %78 = arith.select %9, %76, %77 : vector<16x16xi1>, vector<16x16xf32>
    %cst_26 = arith.constant dense<0xFF800000> : vector<16xf32>
    %79 = vector.multi_reduction <maximumf>, %78, %cst_26 [1] : vector<16x16xf32> to vector<16xf32>
    %80 = vector.shape_cast %79 : vector<16xf32> to vector<16x1xf32>
    %81 = vector.broadcast %80 : vector<16x1xf32> to vector<16x16xf32>
    %82 = arith.subf %78, %81 : vector<16x16xf32>
    %83 = math.exp %82 : vector<16x16xf32>
    %cst_27 = arith.constant dense<0.000000e+00> : vector<16xf32>
    %84 = vector.multi_reduction <add>, %83, %cst_27 [1] : vector<16x16xf32> to vector<16xf32>
    %85 = vector.shape_cast %84 : vector<16xf32> to vector<16x1xf32>
    %86 = tpu.reciprocal %85 {approx = true} : vector<16x1xf32> -> vector<16x1xf32>
    %87 = vector.broadcast %86 : vector<16x1xf32> to vector<16x16xf32>
    %88 = arith.mulf %83, %87 : vector<16x16xf32>
    %89 = arith.truncf %88 : vector<16x16xf32> to vector<16x16xbf16>
    %90 = vector.extract_strided_slice %18 {offsets = [0, 96], sizes = [16, 32], strides = [1, 1]} : vector<16x128xbf16> to vector<16x32xbf16>
    %cst_28 = arith.constant dense<0.000000e+00> : vector<16x32xf32>
    %91 = tpu.matmul %89, %90, %cst_28 {dimension_numbers = #tpu.dot_dimension_numbers<[1], [0], [0], [1], [0, 0, 1, 1], [], []>} : vector<16x16xbf16>, vector<16x32xbf16>, vector<16x32xf32> -> vector<16x32xf32>
    %92 = tpu.concatenate %37, %55, %73, %91 in 1 : vector<16x32xf32>, vector<16x32xf32>, vector<16x32xf32>, vector<16x32xf32> -> vector<16x128xf32>
    %93 = arith.truncf %92 : vector<16x128xf32> to vector<16x128xbf16>
    %c0_29 = arith.constant 0 : index
    %c0_30 = arith.constant 0 : index
    %94 = vector.load %arg6[%c0_29, %c0_30] : memref<128x128xbf16, #tpu.memory_space<vmem>>, vector<128x128xbf16>
    %cst_31 = arith.constant dense<0.000000e+00> : vector<16x128xf32>
    %95 = tpu.matmul %93, %94, %cst_31 {dimension_numbers = #tpu.dot_dimension_numbers<[1], [0], [0], [1], [0, 0, 1, 1], [], []>} : vector<16x128xbf16>, vector<128x128xbf16>, vector<16x128xf32> -> vector<16x128xf32>
    %96 = vector.extract_strided_slice %0 {offsets = [1, 0], sizes = [1, 128], strides = [1, 1]} : vector<11x128xf32> to vector<1x128xf32>
    %97 = vector.broadcast %96 : vector<1x128xf32> to vector<16x128xf32>
    %98 = arith.addf %95, %97 : vector<16x128xf32>
    %99 = arith.addf %2, %98 : vector<16x128xf32>
    %100 = vector.extract_strided_slice %0 {offsets = [2, 0], sizes = [1, 128], strides = [1, 1]} : vector<11x128xf32> to vector<1x128xf32>
    %101 = vector.extract_strided_slice %0 {offsets = [3, 0], sizes = [1, 128], strides = [1, 1]} : vector<11x128xf32> to vector<1x128xf32>
    %cst_32 = arith.constant dense<0.000000e+00> : vector<16xf32>
    %102 = vector.multi_reduction <add>, %99, %cst_32 [1] : vector<16x128xf32> to vector<16xf32>
    %103 = vector.shape_cast %102 : vector<16xf32> to vector<16x1xf32>
    %cst_33 = arith.constant 1.280000e+02 : f32
    %104 = vector.broadcast %cst_33 : f32 to vector<16x1xf32>
    %105 = arith.divf %103, %104 : vector<16x1xf32>
    %106 = vector.broadcast %105 : vector<16x1xf32> to vector<16x128xf32>
    %107 = arith.subf %99, %106 : vector<16x128xf32>
    %108 = arith.mulf %107, %107 : vector<16x128xf32>
    %cst_34 = arith.constant dense<0.000000e+00> : vector<16xf32>
    %109 = vector.multi_reduction <add>, %108, %cst_34 [1] : vector<16x128xf32> to vector<16xf32>
    %110 = vector.shape_cast %109 : vector<16xf32> to vector<16x1xf32>
    %cst_35 = arith.constant 1.280000e+02 : f32
    %111 = vector.broadcast %cst_35 : f32 to vector<16x1xf32>
    %112 = arith.divf %110, %111 : vector<16x1xf32>
    %113 = vector.broadcast %105 : vector<16x1xf32> to vector<16x128xf32>
    %114 = arith.subf %99, %113 : vector<16x128xf32>
    %cst_36 = arith.constant 9.99999974E-6 : f32
    %115 = vector.broadcast %cst_36 : f32 to vector<16x1xf32>
    %116 = arith.addf %112, %115 : vector<16x1xf32>
    %117 = math.rsqrt %116 : vector<16x1xf32>
    %118 = vector.broadcast %117 : vector<16x1xf32> to vector<16x128xf32>
    %119 = arith.mulf %114, %118 : vector<16x128xf32>
    %120 = vector.broadcast %100 : vector<1x128xf32> to vector<16x128xf32>
    %121 = arith.mulf %119, %120 : vector<16x128xf32>
    %122 = vector.broadcast %101 : vector<1x128xf32> to vector<16x128xf32>
    %123 = arith.addf %121, %122 : vector<16x128xf32>
    %124 = arith.truncf %123 : vector<16x128xf32> to vector<16x128xbf16>
    %c0_37 = arith.constant 0 : index
    %c0_38 = arith.constant 0 : index
    %125 = vector.load %arg7[%c0_37, %c0_38] : memref<128x128xbf16, #tpu.memory_space<vmem>>, vector<128x128xbf16>
    %cst_39 = arith.constant dense<0.000000e+00> : vector<16x128xf32>
    %126 = tpu.matmul %124, %125, %cst_39 {dimension_numbers = #tpu.dot_dimension_numbers<[1], [0], [0], [1], [0, 0, 1, 1], [], []>} : vector<16x128xbf16>, vector<128x128xbf16>, vector<16x128xf32> -> vector<16x128xf32>
    %127 = vector.extract_strided_slice %0 {offsets = [4, 0], sizes = [1, 128], strides = [1, 1]} : vector<11x128xf32> to vector<1x128xf32>
    %128 = vector.broadcast %127 : vector<1x128xf32> to vector<16x128xf32>
    %129 = arith.addf %126, %128 : vector<16x128xf32>
    %c0_40 = arith.constant 0 : index
    %c0_41 = arith.constant 0 : index
    %c0_42 = arith.constant 0 : index
    %130 = vector.load %arg4[%c0_40, %c0_41, %c0_42] : memref<1x16x256xbf16, #tpu.memory_space<vmem>>, vector<1x16x256xbf16>
    %131 = vector.shape_cast %130 : vector<1x16x256xbf16> to vector<16x256xbf16>
    %132 = vector.extract_strided_slice %131 {offsets = [0, 0], sizes = [16, 128], strides = [1, 1]} : vector<16x256xbf16> to vector<16x128xbf16>
    %133 = vector.extract_strided_slice %131 {offsets = [0, 128], sizes = [16, 128], strides = [1, 1]} : vector<16x256xbf16> to vector<16x128xbf16>
    %134 = arith.truncf %129 : vector<16x128xf32> to vector<16x128xbf16>
    %135 = vector.extract_strided_slice %134 {offsets = [0, 0], sizes = [16, 32], strides = [1, 1]} : vector<16x128xbf16> to vector<16x32xbf16>
    %136 = vector.extract_strided_slice %132 {offsets = [0, 0], sizes = [16, 32], strides = [1, 1]} : vector<16x128xbf16> to vector<16x32xbf16>
    %cst_43 = arith.constant dense<0.000000e+00> : vector<16x16xf32>
    %137 = tpu.matmul %135, %136, %cst_43 {dimension_numbers = #tpu.dot_dimension_numbers<[1], [1], [0], [0], [0, 0, 1, 0], [], []>} : vector<16x32xbf16>, vector<16x32xbf16>, vector<16x16xf32> -> vector<16x16xf32>
    %cst_44 = arith.constant dense<0xFF800000> : vector<16xf32>
    %138 = vector.multi_reduction <maximumf>, %137, %cst_44 [1] : vector<16x16xf32> to vector<16xf32>
    %139 = vector.shape_cast %138 : vector<16xf32> to vector<16x1xf32>
    %140 = vector.broadcast %139 : vector<16x1xf32> to vector<16x16xf32>
    %141 = arith.subf %137, %140 : vector<16x16xf32>
    %142 = math.exp %141 : vector<16x16xf32>
    %cst_45 = arith.constant dense<0.000000e+00> : vector<16xf32>
    %143 = vector.multi_reduction <add>, %142, %cst_45 [1] : vector<16x16xf32> to vector<16xf32>
    %144 = vector.shape_cast %143 : vector<16xf32> to vector<16x1xf32>
    %145 = tpu.reciprocal %144 {approx = true} : vector<16x1xf32> -> vector<16x1xf32>
    %146 = vector.broadcast %145 : vector<16x1xf32> to vector<16x16xf32>
    %147 = arith.mulf %142, %146 : vector<16x16xf32>
    %148 = arith.truncf %147 : vector<16x16xf32> to vector<16x16xbf16>
    %149 = vector.extract_strided_slice %133 {offsets = [0, 0], sizes = [16, 32], strides = [1, 1]} : vector<16x128xbf16> to vector<16x32xbf16>
    %cst_46 = arith.constant dense<0.000000e+00> : vector<16x32xf32>
    %150 = tpu.matmul %148, %149, %cst_46 {dimension_numbers = #tpu.dot_dimension_numbers<[1], [0], [0], [1], [0, 0, 1, 1], [], []>} : vector<16x16xbf16>, vector<16x32xbf16>, vector<16x32xf32> -> vector<16x32xf32>
    %151 = vector.extract_strided_slice %134 {offsets = [0, 32], sizes = [16, 32], strides = [1, 1]} : vector<16x128xbf16> to vector<16x32xbf16>
    %152 = vector.extract_strided_slice %132 {offsets = [0, 32], sizes = [16, 32], strides = [1, 1]} : vector<16x128xbf16> to vector<16x32xbf16>
    %cst_47 = arith.constant dense<0.000000e+00> : vector<16x16xf32>
    %153 = tpu.matmul %151, %152, %cst_47 {dimension_numbers = #tpu.dot_dimension_numbers<[1], [1], [0], [0], [0, 0, 1, 0], [], []>} : vector<16x32xbf16>, vector<16x32xbf16>, vector<16x16xf32> -> vector<16x16xf32>
    %cst_48 = arith.constant dense<0xFF800000> : vector<16xf32>
    %154 = vector.multi_reduction <maximumf>, %153, %cst_48 [1] : vector<16x16xf32> to vector<16xf32>
    %155 = vector.shape_cast %154 : vector<16xf32> to vector<16x1xf32>
    %156 = vector.broadcast %155 : vector<16x1xf32> to vector<16x16xf32>
    %157 = arith.subf %153, %156 : vector<16x16xf32>
    %158 = math.exp %157 : vector<16x16xf32>
    %cst_49 = arith.constant dense<0.000000e+00> : vector<16xf32>
    %159 = vector.multi_reduction <add>, %158, %cst_49 [1] : vector<16x16xf32> to vector<16xf32>
    %160 = vector.shape_cast %159 : vector<16xf32> to vector<16x1xf32>
    %161 = tpu.reciprocal %160 {approx = true} : vector<16x1xf32> -> vector<16x1xf32>
    %162 = vector.broadcast %161 : vector<16x1xf32> to vector<16x16xf32>
    %163 = arith.mulf %158, %162 : vector<16x16xf32>
    %164 = arith.truncf %163 : vector<16x16xf32> to vector<16x16xbf16>
    %165 = vector.extract_strided_slice %133 {offsets = [0, 32], sizes = [16, 32], strides = [1, 1]} : vector<16x128xbf16> to vector<16x32xbf16>
    %cst_50 = arith.constant dense<0.000000e+00> : vector<16x32xf32>
    %166 = tpu.matmul %164, %165, %cst_50 {dimension_numbers = #tpu.dot_dimension_numbers<[1], [0], [0], [1], [0, 0, 1, 1], [], []>} : vector<16x16xbf16>, vector<16x32xbf16>, vector<16x32xf32> -> vector<16x32xf32>
    %167 = vector.extract_strided_slice %134 {offsets = [0, 64], sizes = [16, 32], strides = [1, 1]} : vector<16x128xbf16> to vector<16x32xbf16>
    %168 = vector.extract_strided_slice %132 {offsets = [0, 64], sizes = [16, 32], strides = [1, 1]} : vector<16x128xbf16> to vector<16x32xbf16>
    %cst_51 = arith.constant dense<0.000000e+00> : vector<16x16xf32>
    %169 = tpu.matmul %167, %168, %cst_51 {dimension_numbers = #tpu.dot_dimension_numbers<[1], [1], [0], [0], [0, 0, 1, 0], [], []>} : vector<16x32xbf16>, vector<16x32xbf16>, vector<16x16xf32> -> vector<16x16xf32>
    %cst_52 = arith.constant dense<0xFF800000> : vector<16xf32>
    %170 = vector.multi_reduction <maximumf>, %169, %cst_52 [1] : vector<16x16xf32> to vector<16xf32>
    %171 = vector.shape_cast %170 : vector<16xf32> to vector<16x1xf32>
    %172 = vector.broadcast %171 : vector<16x1xf32> to vector<16x16xf32>
    %173 = arith.subf %169, %172 : vector<16x16xf32>
    %174 = math.exp %173 : vector<16x16xf32>
    %cst_53 = arith.constant dense<0.000000e+00> : vector<16xf32>
    %175 = vector.multi_reduction <add>, %174, %cst_53 [1] : vector<16x16xf32> to vector<16xf32>
    %176 = vector.shape_cast %175 : vector<16xf32> to vector<16x1xf32>
    %177 = tpu.reciprocal %176 {approx = true} : vector<16x1xf32> -> vector<16x1xf32>
    %178 = vector.broadcast %177 : vector<16x1xf32> to vector<16x16xf32>
    %179 = arith.mulf %174, %178 : vector<16x16xf32>
    %180 = arith.truncf %179 : vector<16x16xf32> to vector<16x16xbf16>
    %181 = vector.extract_strided_slice %133 {offsets = [0, 64], sizes = [16, 32], strides = [1, 1]} : vector<16x128xbf16> to vector<16x32xbf16>
    %cst_54 = arith.constant dense<0.000000e+00> : vector<16x32xf32>
    %182 = tpu.matmul %180, %181, %cst_54 {dimension_numbers = #tpu.dot_dimension_numbers<[1], [0], [0], [1], [0, 0, 1, 1], [], []>} : vector<16x16xbf16>, vector<16x32xbf16>, vector<16x32xf32> -> vector<16x32xf32>
    %183 = vector.extract_strided_slice %134 {offsets = [0, 96], sizes = [16, 32], strides = [1, 1]} : vector<16x128xbf16> to vector<16x32xbf16>
    %184 = vector.extract_strided_slice %132 {offsets = [0, 96], sizes = [16, 32], strides = [1, 1]} : vector<16x128xbf16> to vector<16x32xbf16>
    %cst_55 = arith.constant dense<0.000000e+00> : vector<16x16xf32>
    %185 = tpu.matmul %183, %184, %cst_55 {dimension_numbers = #tpu.dot_dimension_numbers<[1], [1], [0], [0], [0, 0, 1, 0], [], []>} : vector<16x32xbf16>, vector<16x32xbf16>, vector<16x16xf32> -> vector<16x16xf32>
    %cst_56 = arith.constant dense<0xFF800000> : vector<16xf32>
    %186 = vector.multi_reduction <maximumf>, %185, %cst_56 [1] : vector<16x16xf32> to vector<16xf32>
    %187 = vector.shape_cast %186 : vector<16xf32> to vector<16x1xf32>
    %188 = vector.broadcast %187 : vector<16x1xf32> to vector<16x16xf32>
    %189 = arith.subf %185, %188 : vector<16x16xf32>
    %190 = math.exp %189 : vector<16x16xf32>
    %cst_57 = arith.constant dense<0.000000e+00> : vector<16xf32>
    %191 = vector.multi_reduction <add>, %190, %cst_57 [1] : vector<16x16xf32> to vector<16xf32>
    %192 = vector.shape_cast %191 : vector<16xf32> to vector<16x1xf32>
    %193 = tpu.reciprocal %192 {approx = true} : vector<16x1xf32> -> vector<16x1xf32>
    %194 = vector.broadcast %193 : vector<16x1xf32> to vector<16x16xf32>
    %195 = arith.mulf %190, %194 : vector<16x16xf32>
    %196 = arith.truncf %195 : vector<16x16xf32> to vector<16x16xbf16>
    %197 = vector.extract_strided_slice %133 {offsets = [0, 96], sizes = [16, 32], strides = [1, 1]} : vector<16x128xbf16> to vector<16x32xbf16>
    %cst_58 = arith.constant dense<0.000000e+00> : vector<16x32xf32>
    %198 = tpu.matmul %196, %197, %cst_58 {dimension_numbers = #tpu.dot_dimension_numbers<[1], [0], [0], [1], [0, 0, 1, 1], [], []>} : vector<16x16xbf16>, vector<16x32xbf16>, vector<16x32xf32> -> vector<16x32xf32>
    %199 = tpu.concatenate %150, %166, %182, %198 in 1 : vector<16x32xf32>, vector<16x32xf32>, vector<16x32xf32>, vector<16x32xf32> -> vector<16x128xf32>
    %200 = arith.truncf %199 : vector<16x128xf32> to vector<16x128xbf16>
    %c0_59 = arith.constant 0 : index
    %c0_60 = arith.constant 0 : index
    %201 = vector.load %arg8[%c0_59, %c0_60] : memref<128x128xbf16, #tpu.memory_space<vmem>>, vector<128x128xbf16>
    %cst_61 = arith.constant dense<0.000000e+00> : vector<16x128xf32>
    %202 = tpu.matmul %200, %201, %cst_61 {dimension_numbers = #tpu.dot_dimension_numbers<[1], [0], [0], [1], [0, 0, 1, 1], [], []>} : vector<16x128xbf16>, vector<128x128xbf16>, vector<16x128xf32> -> vector<16x128xf32>
    %203 = vector.extract_strided_slice %0 {offsets = [5, 0], sizes = [1, 128], strides = [1, 1]} : vector<11x128xf32> to vector<1x128xf32>
    %204 = vector.broadcast %203 : vector<1x128xf32> to vector<16x128xf32>
    %205 = arith.addf %202, %204 : vector<16x128xf32>
    %206 = arith.addf %123, %205 : vector<16x128xf32>
    %207 = vector.extract_strided_slice %0 {offsets = [6, 0], sizes = [1, 128], strides = [1, 1]} : vector<11x128xf32> to vector<1x128xf32>
    %208 = vector.extract_strided_slice %0 {offsets = [7, 0], sizes = [1, 128], strides = [1, 1]} : vector<11x128xf32> to vector<1x128xf32>
    %cst_62 = arith.constant dense<0.000000e+00> : vector<16xf32>
    %209 = vector.multi_reduction <add>, %206, %cst_62 [1] : vector<16x128xf32> to vector<16xf32>
    %210 = vector.shape_cast %209 : vector<16xf32> to vector<16x1xf32>
    %cst_63 = arith.constant 1.280000e+02 : f32
    %211 = vector.broadcast %cst_63 : f32 to vector<16x1xf32>
    %212 = arith.divf %210, %211 : vector<16x1xf32>
    %213 = vector.broadcast %212 : vector<16x1xf32> to vector<16x128xf32>
    %214 = arith.subf %206, %213 : vector<16x128xf32>
    %215 = arith.mulf %214, %214 : vector<16x128xf32>
    %cst_64 = arith.constant dense<0.000000e+00> : vector<16xf32>
    %216 = vector.multi_reduction <add>, %215, %cst_64 [1] : vector<16x128xf32> to vector<16xf32>
    %217 = vector.shape_cast %216 : vector<16xf32> to vector<16x1xf32>
    %cst_65 = arith.constant 1.280000e+02 : f32
    %218 = vector.broadcast %cst_65 : f32 to vector<16x1xf32>
    %219 = arith.divf %217, %218 : vector<16x1xf32>
    %220 = vector.broadcast %212 : vector<16x1xf32> to vector<16x128xf32>
    %221 = arith.subf %206, %220 : vector<16x128xf32>
    %cst_66 = arith.constant 9.99999974E-6 : f32
    %222 = vector.broadcast %cst_66 : f32 to vector<16x1xf32>
    %223 = arith.addf %219, %222 : vector<16x1xf32>
    %224 = math.rsqrt %223 : vector<16x1xf32>
    %225 = vector.broadcast %224 : vector<16x1xf32> to vector<16x128xf32>
    %226 = arith.mulf %221, %225 : vector<16x128xf32>
    %227 = vector.broadcast %207 : vector<1x128xf32> to vector<16x128xf32>
    %228 = arith.mulf %226, %227 : vector<16x128xf32>
    %229 = vector.broadcast %208 : vector<1x128xf32> to vector<16x128xf32>
    %230 = arith.addf %228, %229 : vector<16x128xf32>
    %231 = arith.truncf %230 : vector<16x128xf32> to vector<16x128xbf16>
    %c0_67 = arith.constant 0 : index
    %c0_68 = arith.constant 0 : index
    %232 = vector.load %arg9[%c0_67, %c0_68] : memref<128x256xbf16, #tpu.memory_space<vmem>>, vector<128x256xbf16>
    %cst_69 = arith.constant dense<0.000000e+00> : vector<16x256xf32>
    %233 = tpu.matmul %231, %232, %cst_69 {dimension_numbers = #tpu.dot_dimension_numbers<[1], [0], [0], [1], [0, 0, 1, 1], [], []>} : vector<16x128xbf16>, vector<128x256xbf16>, vector<16x256xf32> -> vector<16x256xf32>
    %c0_70 = arith.constant 0 : index
    %c0_71 = arith.constant 0 : index
    %234 = vector.load %arg12[%c0_70, %c0_71] : memref<1x256xf32, #tpu.memory_space<vmem>>, vector<1x256xf32>
    %235 = vector.broadcast %234 : vector<1x256xf32> to vector<16x256xf32>
    %236 = arith.addf %233, %235 : vector<16x256xf32>
    %cst_72 = arith.constant 0.000000e+00 : f32
    %237 = vector.broadcast %cst_72 : f32 to vector<16x256xf32>
    %238 = arith.maximumf %236, %237 : vector<16x256xf32>
    %239 = arith.truncf %238 : vector<16x256xf32> to vector<16x256xbf16>
    %c0_73 = arith.constant 0 : index
    %c0_74 = arith.constant 0 : index
    %240 = vector.load %arg10[%c0_73, %c0_74] : memref<256x128xbf16, #tpu.memory_space<vmem>>, vector<256x128xbf16>
    %cst_75 = arith.constant dense<0.000000e+00> : vector<16x128xf32>
    %241 = tpu.matmul %239, %240, %cst_75 {dimension_numbers = #tpu.dot_dimension_numbers<[1], [0], [0], [1], [0, 0, 1, 1], [], []>} : vector<16x256xbf16>, vector<256x128xbf16>, vector<16x128xf32> -> vector<16x128xf32>
    %242 = vector.extract_strided_slice %0 {offsets = [8, 0], sizes = [1, 128], strides = [1, 1]} : vector<11x128xf32> to vector<1x128xf32>
    %243 = vector.broadcast %242 : vector<1x128xf32> to vector<16x128xf32>
    %244 = arith.addf %241, %243 : vector<16x128xf32>
    %245 = arith.addf %230, %244 : vector<16x128xf32>
    %246 = vector.extract_strided_slice %0 {offsets = [9, 0], sizes = [1, 128], strides = [1, 1]} : vector<11x128xf32> to vector<1x128xf32>
    %247 = vector.extract_strided_slice %0 {offsets = [10, 0], sizes = [1, 128], strides = [1, 1]} : vector<11x128xf32> to vector<1x128xf32>
    %cst_76 = arith.constant dense<0.000000e+00> : vector<16xf32>
    %248 = vector.multi_reduction <add>, %245, %cst_76 [1] : vector<16x128xf32> to vector<16xf32>
    %249 = vector.shape_cast %248 : vector<16xf32> to vector<16x1xf32>
    %cst_77 = arith.constant 1.280000e+02 : f32
    %250 = vector.broadcast %cst_77 : f32 to vector<16x1xf32>
    %251 = arith.divf %249, %250 : vector<16x1xf32>
    %252 = vector.broadcast %251 : vector<16x1xf32> to vector<16x128xf32>
    %253 = arith.subf %245, %252 : vector<16x128xf32>
    %254 = arith.mulf %253, %253 : vector<16x128xf32>
    %cst_78 = arith.constant dense<0.000000e+00> : vector<16xf32>
    %255 = vector.multi_reduction <add>, %254, %cst_78 [1] : vector<16x128xf32> to vector<16xf32>
    %256 = vector.shape_cast %255 : vector<16xf32> to vector<16x1xf32>
    %cst_79 = arith.constant 1.280000e+02 : f32
    %257 = vector.broadcast %cst_79 : f32 to vector<16x1xf32>
    %258 = arith.divf %256, %257 : vector<16x1xf32>
    %259 = vector.broadcast %251 : vector<16x1xf32> to vector<16x128xf32>
    %260 = arith.subf %245, %259 : vector<16x128xf32>
    %cst_80 = arith.constant 9.99999974E-6 : f32
    %261 = vector.broadcast %cst_80 : f32 to vector<16x1xf32>
    %262 = arith.addf %258, %261 : vector<16x1xf32>
    %263 = math.rsqrt %262 : vector<16x1xf32>
    %264 = vector.broadcast %263 : vector<16x1xf32> to vector<16x128xf32>
    %265 = arith.mulf %260, %264 : vector<16x128xf32>
    %266 = vector.broadcast %246 : vector<1x128xf32> to vector<16x128xf32>
    %267 = arith.mulf %265, %266 : vector<16x128xf32>
    %268 = vector.broadcast %247 : vector<1x128xf32> to vector<16x128xf32>
    %269 = arith.addf %267, %268 : vector<16x128xf32>
    %c0_81 = arith.constant 0 : index
    %c0_82 = arith.constant 0 : index
    %c0_83 = arith.constant 0 : index
    %270 = vector.load %arg13[%c0_81, %c0_82, %c0_83] : memref<1x16x128xf32, #tpu.memory_space<vmem>>, vector<1x16x128xf32>
    %271 = vector.shape_cast %270 : vector<1x16x128xf32> to vector<16x128xf32>
    %272 = vector.shape_cast %269 : vector<16x128xf32> to vector<1x16x128xf32>
    tpu.vector_store %arg13[%c0_81, %c0_82, %c0_83], %272 {strides = array<i32>} : memref<1x16x128xf32, #tpu.memory_space<vmem>>, vector<1x16x128xf32>,
    return
  }
  func.func @transform_0(%arg0: i32, %arg1: i32) -> (i32, i32, i32) {
    %c0_i32 = arith.constant 0 : i32
    %c0_i32_0 = arith.constant 0 : i32
    return %arg0, %arg1, %c0_i32 : i32, i32, i32
  }
  func.func @transform_1(%arg0: i32, %arg1: i32) -> (i32, i32, i32) {
    %c0_i32 = arith.constant 0 : i32
    %c0_i32_0 = arith.constant 0 : i32
    %c0_i32_1 = arith.constant 0 : i32
    return %arg0, %c0_i32, %c0_i32_0 : i32, i32, i32
  }
  func.func @transform_2(%arg0: i32, %arg1: i32) -> (i32, i32, i32) {
    %c0_i32 = arith.constant 0 : i32
    %c0_i32_0 = arith.constant 0 : i32
    %c0_i32_1 = arith.constant 0 : i32
    return %arg0, %c0_i32, %c0_i32_0 : i32, i32, i32
  }
  func.func @transform_3(%arg0: i32, %arg1: i32) -> (i32, i32) {
    %c0_i32 = arith.constant 0 : i32
    %c0_i32_0 = arith.constant 0 : i32
    %c0_i32_1 = arith.constant 0 : i32
    return %c0_i32, %c0_i32_0 : i32, i32
  }
  func.func @transform_4(%arg0: i32, %arg1: i32) -> (i32, i32) {
    %c0_i32 = arith.constant 0 : i32
    %c0_i32_0 = arith.constant 0 : i32
    %c0_i32_1 = arith.constant 0 : i32
    return %c0_i32, %c0_i32_0 : i32, i32
  }
  func.func @transform_5(%arg0: i32, %arg1: i32) -> (i32, i32) {
    %c0_i32 = arith.constant 0 : i32
    %c0_i32_0 = arith.constant 0 : i32
    %c0_i32_1 = arith.constant 0 : i32
    return %c0_i32, %c0_i32_0 : i32, i32
  }
  func.func @transform_6(%arg0: i32, %arg1: i32) -> (i32, i32) {
    %c0_i32 = arith.constant 0 : i32
    %c0_i32_0 = arith.constant 0 : i32
    %c0_i32_1 = arith.constant 0 : i32
    return %c0_i32, %c0_i32_0 : i32, i32
  }
  func.func @transform_7(%arg0: i32, %arg1: i32) -> (i32, i32) {
    %c0_i32 = arith.constant 0 : i32
    %c0_i32_0 = arith.constant 0 : i32
    %c0_i32_1 = arith.constant 0 : i32
    return %c0_i32, %c0_i32_0 : i32, i32
  }
  func.func @transform_8(%arg0: i32, %arg1: i32) -> (i32, i32) {
    %c0_i32 = arith.constant 0 : i32
    %c0_i32_0 = arith.constant 0 : i32
    %c0_i32_1 = arith.constant 0 : i32
    return %c0_i32, %c0_i32_0 : i32, i32
  }
  func.func @transform_9(%arg0: i32, %arg1: i32) -> (i32, i32) {
    %c0_i32 = arith.constant 0 : i32
    %c0_i32_0 = arith.constant 0 : i32
    %c0_i32_1 = arith.constant 0 : i32
    return %c0_i32, %c0_i32_0 : i32, i32
  }
  func.func @transform_10(%arg0: i32, %arg1: i32) -> (i32, i32) {
    %c0_i32 = arith.constant 0 : i32
    %c0_i32_0 = arith.constant 0 : i32
    %c0_i32_1 = arith.constant 0 : i32
    return %c0_i32, %c0_i32_0 : i32, i32
  }
  func.func @transform_11(%arg0: i32, %arg1: i32) -> (i32, i32, i32) {
    %c0_i32 = arith.constant 0 : i32
    %c0_i32_0 = arith.constant 0 : i32
    return %arg0, %arg1, %c0_i32 : i32, i32, i32
  }
}

</mosaic_0001>

<bundles_post_ra>
// kernel: transformer_decoder.3
= control target key start
LH: loop header
LB: loop body
LE: loop exit
PB: predicated region body
PF: predicated region fallthrough
CT: control target
= control target key end

     0   :  { %16 = vsyncpa [#allocation3], 0  ;;  %s3943_s0 = inlined_call_operand.vmem [shape: f32[2,16,128], index: 0, kind: input, shape index: {}]   ;;  %s3944_s1 = inlined_call_operand.vmem [shape: bf16[2,16,256], index: 1, kind: input, shape index: {}]   ;;  %s3945_s2 = inlined_call_operand.vmem [shape: bf16[2,16,256], index: 2, kind: input, shape index: {}]   ;;  %s3946_s3 = inlined_call_operand.vmem [shape: bf16[128,128], index: 3, kind: input, shape index: {}]   ;;  %s3947_s4 = inlined_call_operand.vmem [shape: bf16[128,128], index: 4, kind: input, shape index: {}]   ;;  %s3948_s5 = inlined_call_operand.vmem [shape: bf16[128,128], index: 5, kind: input, shape index: {}]   ;;  %s3949_s6 = inlined_call_operand.vmem [shape: bf16[128,128], index: 6, kind: input, shape index: {}]   ;;  %s3950_s7 = inlined_call_operand.vmem [shape: bf16[128,256], index: 7, kind: input, shape index: {}]   ;;  %s3951_s8 = inlined_call_operand.vmem [shape: bf16[256,128], index: 8, kind: input, shape index: {}]   ;;  %s3952_s9 = inlined_call_operand.vmem [shape: f32[11,128], index: 9, kind: input, shape index: {}]   ;;  %s3953_s10 = inlined_call_operand.vmem [shape: f32[1,256], index: 10, kind: input, shape index: {}]   ;;  %s3954_s11 = inlined_call_operand.hbm [shape: f32[2,16,128], index: 11, kind: output, shape index: {}]  }
   0x1   :  { %18 = vsyncpa [#allocation3 + $0x1], 0  ;;  %s3293_s17 = smov 0   ;;  %s3295_s18 = smov 0  }
   0x2   :  { %s3297_s19 = smov 0   ;;  %s3299_s20 = smov 0  }
   0x3   :  { %s3301_s21 = smov 0   ;;  %s3303_s22 = smov 0  }
   0x4 LB: > { %s2525_s23 = sadd.s32 4294967295, %s3222_s22   ;;  %s2526_s24 = sadd.s32 4294967294, %s3222_s22   ;;  %s3222_s22 = sphi %s3303_s22, %s24_s22   ;;  %s3218_s21 = sphi %s3301_s21, %s3970_s21   ;;  %s3214_s20 = sphi %s3299_s20, %s3969_s20   ;;  %s3210_s19 = sphi %s3297_s19, %s3968_s19   ;;  %s3206_s18 = sphi %s3295_s18, %s3967_s18   ;;  %s3202_s17 = sphi %s3293_s17, %s3966_s17  }
   0x5   : > { %s36_s25 = sadd.s32 1, %s3218_s21  ;;  %s293_s26 = sadd.s32 1, %s3210_s19 }
   0x6   : > { %p38_p0 = scmp.ge.s32.totalorder %s36_s25, 2  ;;  %p303_p1 = scmp.ne.s32.totalorder %s3210_s19, %s3206_s18 }
   0x7   : > { %p304_p2 = scmp.eq.s32.totalorder %s2525_s23, 1  ;;  %p309_p3 = scmp.ne.s32.totalorder %s3206_s18, %s3202_s17 }
   0x8   : > { %s3972_s25 = smov (%p38_p0, %s36_s25), 0  ;;  %p310_p5 = scmp.eq.s32.totalorder %s2526_s24, 1 }
   0x9   : > { %3960 = sst [smem:[#allocation5_spill]] %s3972_s25  ;;  %p3333_p4 = por %p304_p2, %p303_p1 }
   0xa   : > { %s288_s28 = ssub.s32 %s3218_s21, %s3972_s25  ;;  %p2529_p6 = scmp.ge.s32.totalorder %s3222_s22, 1 }
   0xb   : > { %p291_p7 = scmp.eq.s32.totalorder %s288_s28, 0  ;;  %p3340_p8 = por %p310_p5, %p309_p3 }
   0xc   : > { %p381_p9 = scmp.lt.s32.totalorder %s3222_s22, 3 }
   0xd   : > { %s3346_s30 = scalar_select %p291_p7, %s3210_s19, %s293_s26  }
   0xe   : > { %p382_p10 = pnand %p2529_p6, %p381_p9 }
   0xf   : > { %v2989_v0 = vld [vmem:[%s3946_s3] sm:$0xff] (!%p382_p10)   ;;  %v3224_v1 = vmov (!%p382_p10), 0.0   ;;  %v2990_v2 = vld [vmem:[%s3946_s3 + $0x8] sm:$0xff] (!%p382_p10)   ;;  %vm3225_vm0 = vmmov (!%p382_p10), 0   ;;  %p436_p11 = scmp.lt.s32.totalorder (!%p382_p10), %s3214_s20, 1  ;;  %v2991_v3 = vld [vmem:[%s3946_s3 + $0x10] sm:$0xff] (!%p382_p10)   ;;  %v463_v14 = vlaneseq (!%p382_p10) }
  0x10   : > { %385 = sbr.rel (%p382_p10) target bundleno = 5853 (0x16dd), region = 64  ;;  %2720 = vmatprep.subr.bf16.mxu0 (!%p382_p10), %v3224_v1  ;;  %2740 = vmatprep.subr.bf16.mxu1 (!%p382_p10), %v3224_v1  ;;  %v2992_v4 = vld [vmem:[%s3946_s3 + $0x18] sm:$0xff] (!%p382_p10)   ;;  %v2993_v5 = vld [vmem:[%s3946_s3 + $0x20] sm:$0xff] (!%p382_p10)   ;;  %v2994_v6 = vld [vmem:[%s3946_s3 + $0x28] sm:$0xff] (!%p382_p10)   ;;  %vm590_vm1 = vcmask (!%p382_p10), 261120   ;;  %vm640_vm3 = vcmask (!%p382_p10), 130048  }
  0x11   : > { %2721 = vmatpush3.bf16.msra.mxu0 (!%p382_p10), %v2989_v0  ;;  %2736 = vmatprep.mubr.msk.bf16.mxu0 (!%p382_p10), %vm3225_vm0, %v3224_v1  ;;  %v2995_v7 = vld [vmem:[%s3946_s3 + $0x30] sm:$0xff] (!%p382_p10)   ;;  %v2996_v8 = vld [vmem:[%s3946_s3 + $0x38] sm:$0xff] (!%p382_p10)   ;;  %v3414_v15 = vshrl.u32 (!%p382_p10), %v463_v14, 7  ;;  %v3422_v17 = vld [vmem:[%s3952_s9] sm:$0xff] (!%p382_p10)  ;;  %v3432_v26 = vand.u32 (!%p382_p10), 127, %v463_v14  ;;  %s3226_s26 = smov (!%p382_p10), 96  }
  0x12   : > { %2722 = vmatprep.subr.bf16.mxu0 (!%p382_p10), %v3224_v1  ;;  %2742 = vmatprep.mubr.msk.bf16.mxu1 (!%p382_p10), %vm3225_vm0, %v3224_v1  ;;  %s3956_s28 = smov (!%p382_p10), 64   ;;  %vm1108_vm5 = vcmask (!%p382_p10), 523264   ;;  %vm1111_vm6 = vcmask (!%p382_p10), 785408  }
  0x13   : > { %v3417_v16 = vsub.s32 (!%p382_p10), 0, %v3414_v15  ;;  %v3435_v27 = vadd.s32 (!%p382_p10), 8, %v3414_v15  ;;  %vm471_vm2 = vcmp.le.s32.totalorder (!%p382_p10), %v3432_v26, %v3414_v15 }
  0x15   : > { %2723 = vmatpush3.bf16.msra.mxu0 (!%p382_p10), %v2990_v2  ;;  %v492_v18 = vrot.slane (!%p382_p10), %v3422_v17, %v3417_v16  ;;  %vm472_vm4 = vcmp.le.s32.totalorder (!%p382_p10), %v3432_v26, %v3435_v27 }
  0x16   : > { %2724 = vmatprep.subr.bf16.mxu0 (!%p382_p10), %v3224_v1 }
  0x17   : > { %s437_s16 = scalar_select %p436_p11, %s3214_s20, 1 }
  0x19   : > { %s3370_s12 = sshll.u32 %s437_s16, 4  ;;  %2725 = vmatpush3.bf16.msra.mxu0 %v2991_v3 }
  0x1a   : > { %2726 = vmatprep.subr.bf16.mxu0 %v3224_v1  ;;  %s443_s13 = scalar_lea.vmem %s3943_s0, %s3370_s12  ;;  %s3406_s23 = scalar_lea.vmem %s3944_s1, %s3370_s12 }
  0x1b   : > { %v3392_v9 = vld [vmem:[%s443_s13] sm:$0xff]  ;;  %v3394_v10 = vld [vmem:[%s443_s13 + $0x8] sm:$0xff]  ;;  %s3958_s13 = smov 32   ;;  %s3635_s25 = scalar_lea.vmem %s3945_s2, %s3370_s12 }
  0x1c   : > { %v461_v11 = vpack.c.bf16 %v3394_v10, %v3392_v9  ;;  %v3409_v12 = vld [vmem:[%s3406_s23] ss:$8 sps:$4 sm:$0xff]   ;;  %v3456_v46 = vld [vmem:[%s3406_s23 + $0x4] ss:$8 sps:$4 sm:$0xff]   ;;  %s3963_s23 = smov 32   ;;  %s3964_s12 = smov 64  }
  0x1d   : > { %2727 = vmatpush3.bf16.msra.mxu0 %v2992_v4  ;;  %v595_v13 = vsel %vm590_vm1, %v3409_v12, 0 }
  0x1e   : > { %2728 = vmatprep.subr.bf16.mxu0 %v3224_v1  ;;  %2741 = vmatpush3.bf16.xpose.msra.mxu1 %v595_v13 }
  0x1f   : > { %2746 = vmatprep.subr.bf16.mxu1 %v3224_v1 }
  0x21   : > { %2729 = vmatpush3.bf16.msra.mxu0 %v2993_v5 }
  0x22   : > { %2730 = vmatprep.subr.bf16.mxu0 %v3224_v1 }
  0x25   : > { %2731 = vmatpush3.bf16.msra.mxu0 %v2994_v6 }
  0x26   : > { %2732 = vmatprep.subr.bf16.mxu0 %v3224_v1 }
  0x29   : > { %2733 = vmatpush3.bf16.msra.mxu0 %v2995_v7 }
  0x2a   : > { %2734 = vmatprep.subr.bf16.mxu0 %v3224_v1 }
  0x2d   : > { %2735 = vmatpush3.bf16.msra.mxu0 %v2996_v8 }
  0x2e   : > { %2788 = vmatprep.subr.bf16.mxu0 %v3224_v1 }
  0x30   : > { %2737 = vmatmul.mubr.bf16.vlgmr.msra.gmra.mrb[0].mxu0 %v461_v11 }
  0x31   : > { %2804 = vmatprep.mubr.msk.bf16.mxu0 %vm3225_vm0, %v3224_v1 }
 0x103   : > { %v575_v19 = vpop.f32.mrb[0].mxu0 }
 0x104   : > { %v2738_v20 = vpop.f32.mrb[1].mxu0  ;;  %v576_v22 = vadd.f32 %v575_v19, %v492_v18 }
 0x105   : > { %v578_v21 = vpop.f32.mrb[2].mxu0 }
 0x106   : > { %v579_v23 = vadd.f32 %v578_v21, %v492_v18  ;;  %v2739_v24 = vpop.f32.mrb[3].mxu0 }
 0x108   : > { %v3426_v25 = vpack.c.bf16 %v579_v23, %v576_v22 }
 0x10a   : > { %2743 = vmatmul.mubr.msk.bf16.vlgmr.msra.gmra.mrb[0].mxu1 %vm590_vm1, %v3426_v25 }
 0x10b   : > { %2748 = vmatprep.mubr.msk.bf16.mxu1 %vm3225_vm0, %v3224_v1  ;;  %2747 = vmatpush3.bf16.msra.mxu1 %v3456_v46 }
 0x10c   : > { %2752 = vmatprep.subr.bf16.mxu1 %v3224_v1 }
 0x1dd   : > { %v631_v28 = vpop.f32.mrb[0].mxu1 }
 0x1de   : > { %v638_v29 = vsel %vm471_vm2, %v631_v28, -1e+30  ;;  %v2744_v30 = vpop.f32.mrb[1].mxu1 }
 0x1df   : > { %v634_v31 = vpop.f32.mrb[2].mxu1  ;;  %v641_v32 = vsel %vm640_vm3, %v638_v29, -inf }
 0x1e0   : > { %v639_v33 = vsel %vm472_vm4, %v634_v31, -1e+30  ;;  %642 = vmax.xlane.f32.xlu0 %v641_v32  ;;  %v2745_v34 = vpop.f32.mrb[3].mxu1 }
 0x1e1   : > { %v644_v35 = vsel %vm640_vm3, %v639_v33, -inf }
 0x1e4   : > { %645 = vmax.xlane.f32.xlu0 %v644_v35 }
 0x1fa   : > { %715 = vrot.lane.b32.xlu0 %v3409_v12, %s3226_s26 }
 0x26d   : > { %v643_v36 = vpop.xlane.xlu0 %642 }
 0x26e   : > { %v647_v37 = vsub.f32 %v638_v29, %v643_v36 }
 0x270   : > { %v649_v38 = vmul.f32 1.442695, %v647_v37 }
 0x271   : > { %v646_v39 = vpop.xlane.xlu0 %645 }
 0x272   : > { %3067 = vpow2.f32 %v649_v38  ;;  %v648_v40 = vsub.f32 %v639_v33, %v646_v39 }
 0x274   : > { %v651_v41 = vmul.f32 1.442695, %v648_v40 }
 0x275   : > { %v716_v51 = vpop.permute.xlu0 %715 }
 0x276   : > { %3069 = vpow2.f32 %v651_v41  ;;  %v721_v54 = vsel %vm590_vm1, %v716_v51, 0 }
 0x27c   : > { %v3068_v42 = vpop.eup %3067 }
 0x27d   : > { %v653_v43 = vsel %vm640_vm3, %v3068_v42, 0.0 }
 0x27e   : > { %654 = vadd.xlane.f32.xlu1 %v653_v43 }
 0x280   : > { %v3070_v44 = vpop.eup %3069 }
 0x281   : > { %v656_v45 = vsel %vm640_vm3, %v3070_v44, 0.0 }
 0x282   : > { %657 = vadd.xlane.f32.xlu1 %v656_v45 }
 0x293   : > { %713 = vrot.lane.b32.xlu1 %v3426_v25, %s3226_s26 }
 0x30b   : > { %v655_v47 = vpop.xlane.xlu1 %654 }
 0x30c   : > { %3071 = vrcp.f32 %v655_v47 }
 0x30f   : > { %v658_v48 = vpop.xlane.xlu1 %657 }
 0x310   : > { %3073 = vrcp.f32 %v658_v48 }
 0x313   : > { %v714_v56 = vpop.permute.xlu1 %713 }
 0x316   : > { %v3072_v49 = vpop.eup %3071 }
 0x317   : > { %v661_v52 = vmul.f32 %v3072_v49, %v3068_v42 }
 0x31a   : > { %v3074_v50 = vpop.eup %3073 }
 0x31b   : > { %v662_v53 = vmul.f32 %v3074_v50, %v3070_v44 }
 0x31d   : > { %v663_v55 = vpack.c.bf16 %v662_v53, %v661_v52 }
 0x31f   : > { %2749 = vmatmul.mubr.msk.bf16.vlgmr.msra.gmra.mrb[4].mxu1 %vm640_vm3, %v663_v55 }
 0x320   : > { %2753 = vmatpush3.bf16.xpose.msra.mxu1 %v721_v54  ;;  %2754 = vmatprep.mubr.msk.bf16.mxu1 %vm3225_vm0, %v3224_v1 }
 0x321   : > { %2758 = vmatprep.subr.bf16.mxu1 %v3224_v1 }
 0x327   : > { %2755 = vmatmul.mubr.msk.bf16.vlgmr.msra.gmra.mrb[8].mxu1 %vm590_vm1, %v714_v56 }
 0x328   : > { %2760 = vmatprep.mubr.msk.bf16.mxu1 %vm3225_vm0, %v3224_v1 }
 0x3f2   : > { %v3468_v57 = vpop.f32.mrb[4].mxu1 }
 0x3f3   : > { %v2750_v58 = vpop.f32.mrb[5].mxu1 }
 0x3f4   : > { %v3470_v59 = vpop.f32.mrb[6].mxu1 }
 0x3f5   : > { %v2751_v60 = vpop.f32.mrb[7].mxu1 }
 0x3fa   : > { %v757_v61 = vpop.f32.mrb[8].mxu1 }
 0x3fb   : > { %v764_v62 = vsel %vm471_vm2, %v757_v61, -1e+30  ;;  %v2756_v63 = vpop.f32.mrb[9].mxu1 }
 0x3fc   : > { %v760_v0 = vpop.f32.mrb[10].mxu1  ;;  %v766_v2 = vsel %vm640_vm3, %v764_v62, -inf }
 0x3fd   : > { %v765_v3 = vsel %vm472_vm4, %v760_v0, -1e+30  ;;  %767 = vmax.xlane.f32.xlu1 %v766_v2  ;;  %v2757_v4 = vpop.f32.mrb[11].mxu1 }
 0x3fe   : > { %v769_v5 = vsel %vm640_vm3, %v765_v3, -inf }
 0x3ff   : > { %770 = vmax.xlane.f32.xlu0 %v769_v5 }
 0x48a   : > { %v768_v6 = vpop.xlane.xlu1 %767 }
 0x48b   : > { %v772_v7 = vsub.f32 %v764_v62, %v768_v6 }
 0x48c   : > { %v771_v8 = vpop.xlane.xlu0 %770 }
 0x48d   : > { %v774_v11 = vmul.f32 1.442695, %v772_v7  ;;  %v773_v13 = vsub.f32 %v765_v3, %v771_v8 }
 0x48f   : > { %3075 = vpow2.f32 %v774_v11  ;;  %v776_v14 = vmul.f32 1.442695, %v773_v13 }
 0x491   : > { %3077 = vpow2.f32 %v776_v14 }
 0x499   : > { %v3076_v18 = vpop.eup %3075 }
 0x49a   : > { %v778_v19 = vsel %vm640_vm3, %v3076_v18, 0.0 }
 0x49b   : > { %v3078_v20 = vpop.eup %3077  ;;  %779 = vadd.xlane.f32.xlu0 %v778_v19 }
 0x49c   : > { %v781_v21 = vsel %vm640_vm3, %v3078_v20, 0.0 }
 0x49d   : > { %782 = vadd.xlane.f32.xlu1 %v781_v21 }
 0x4ae   : > { %838 = vrot.lane.b32.xlu1 %v3409_v12, %s3956_s28 }
 0x4b1   : > { %789 = vrot.lane.b32.xlu0 %v3456_v46, %s3226_s26 }
 0x4b2   : > { %836 = vrot.lane.b32.xlu1 %v3426_v25, %s3956_s28 }
 0x528   : > { %v780_v22 = vpop.xlane.xlu0 %779 }
 0x529   : > { %3079 = vrcp.f32 %v780_v22 }
 0x52a   : > { %v783_v23 = vpop.xlane.xlu1 %782 }
 0x52b   : > { %3081 = vrcp.f32 %v783_v23 }
 0x52c   : > { %v790_v24 = vpop.permute.xlu0 %789 }
 0x52d   : > { %2759 = vmatpush3.bf16.msra.mxu1 %v790_v24 }
 0x52e   : > { %2764 = vmatprep.subr.bf16.mxu1 %v3224_v1  ;;  %v839_v32 = vpop.permute.xlu1 %838 }
 0x52f   : > { %v844_v33 = vsel %vm590_vm1, %v839_v32, 0 }
 0x532   : > { %v837_v35 = vpop.permute.xlu1 %836 }
 0x533   : > { %v3080_v28 = vpop.eup %3079 }
 0x534   : > { %v786_v30 = vmul.f32 %v3080_v28, %v3076_v18 }
 0x535   : > { %v3082_v29 = vpop.eup %3081 }
 0x536   : > { %v787_v31 = vmul.f32 %v3082_v29, %v3078_v20 }
 0x538   : > { %v788_v34 = vpack.c.bf16 %v787_v31, %v786_v30 }
 0x53a   : > { %2761 = vmatmul.mubr.msk.bf16.vlgmr.msra.gmra.mrb[12].mxu1 %vm640_vm3, %v788_v34 }
 0x53b   : > { %2765 = vmatpush3.bf16.xpose.msra.mxu1 %v844_v33  ;;  %2766 = vmatprep.mubr.msk.bf16.mxu1 %vm3225_vm0, %v3224_v1 }
 0x53c   : > { %2770 = vmatprep.subr.bf16.mxu1 %v3224_v1 }
 0x542   : > { %2767 = vmatmul.mubr.msk.bf16.vlgmr.msra.gmra.mrb[16].mxu1 %vm590_vm1, %v837_v35 }
 0x543   : > { %2772 = vmatprep.mubr.msk.bf16.mxu1 %vm3225_vm0, %v3224_v1 }
 0x60d   : > { %v3497_v36 = vpop.f32.mrb[12].mxu1 }
 0x60e   : > { %v2762_v37 = vpop.f32.mrb[13].mxu1 }
 0x60f   : > { %v3499_v38 = vpop.f32.mrb[14].mxu1 }
 0x610   : > { %v2959_v39 = vpack.i.bf16 %v3499_v38, %v3497_v36  ;;  %v2763_v40 = vpop.f32.mrb[15].mxu1  ;;  %v3001_v36 = vld [vmem:[%s3947_s4 + $0x8] sm:$0xff]   ;;  %v3002_v38 = vld [vmem:[%s3947_s4 + $0x10] sm:$0xff]  }
 0x615   : > { %v880_v41 = vpop.f32.mrb[16].mxu1 }
 0x616   : > { %v887_v42 = vsel %vm471_vm2, %v880_v41, -1e+30  ;;  %v2768_v43 = vpop.f32.mrb[17].mxu1 }
 0x617   : > { %v883_v44 = vpop.f32.mrb[18].mxu1  ;;  %v889_v45 = vsel %vm640_vm3, %v887_v42, -inf }
 0x618   : > { %v888_v47 = vsel %vm472_vm4, %v883_v44, -1e+30  ;;  %890 = vmax.xlane.f32.xlu1 %v889_v45  ;;  %v2769_v48 = vpop.f32.mrb[19].mxu1 }
 0x619   : > { %v892_v49 = vsel %vm640_vm3, %v888_v47, -inf }
 0x61a   : > { %893 = vmax.xlane.f32.xlu0 %v892_v49 }
 0x629   : > { %912 = vrot.lane.b32.xlu1 %v3456_v46, %s3956_s28 }
 0x62d   : > { %959 = vrot.lane.b32.xlu1 %v3426_v25, %s3958_s13 }
 0x6a5   : > { %v891_v50 = vpop.xlane.xlu1 %890 }
 0x6a6   : > { %v895_v51 = vsub.f32 %v887_v42, %v891_v50  ;;  %v3004_v50 = vld [vmem:[%s3947_s4 + $0x20] sm:$0xff]  }
 0x6a7   : > { %v894_v52 = vpop.xlane.xlu0 %893 }
 0x6a8   : > { %v897_v53 = vmul.f32 1.442695, %v895_v51  ;;  %v896_v54 = vsub.f32 %v888_v47, %v894_v52  ;;  %v3005_v51 = vld [vmem:[%s3947_s4 + $0x28] sm:$0xff]   ;;  %v3006_v52 = vld [vmem:[%s3947_s4 + $0x30] sm:$0xff]  }
 0x6a9   : > { %v913_v55 = vpop.permute.xlu1 %912 }
 0x6aa   : > { %3083 = vpow2.f32 %v897_v53  ;;  %v899_v56 = vmul.f32 1.442695, %v896_v54  ;;  %2771 = vmatpush3.bf16.msra.mxu1 %v913_v55  ;;  %v3007_v53 = vld [vmem:[%s3947_s4 + $0x38] sm:$0xff]  }
 0x6ab   : > { %2776 = vmatprep.subr.bf16.mxu1 %v3224_v1 }
 0x6ac   : > { %3085 = vpow2.f32 %v899_v56 }
 0x6b4   : > { %v3084_v58 = vpop.eup %3083 }
 0x6b5   : > { %v901_v60 = vsel %vm640_vm3, %v3084_v58, 0.0 }
 0x6b6   : > { %v3086_v61 = vpop.eup %3085  ;;  %902 = vadd.xlane.f32.xlu0 %v901_v60 }
 0x6b7   : > { %v904_v62 = vsel %vm640_vm3, %v3086_v61, 0.0 }
 0x6ba   : > { %905 = vadd.xlane.f32.xlu0 %v904_v62 }
 0x6d0   : > { %961 = vrot.lane.b32.xlu0 %v3409_v12, %s3958_s13  ;;  %v960_v12 = vpop.permute.xlu1 %959 }
 0x743   : > { %v903_v25 = vpop.xlane.xlu0 %902 }
 0x744   : > { %3087 = vrcp.f32 %v903_v25 }
 0x747   : > { %v906_v63 = vpop.xlane.xlu0 %905 }
 0x748   : > { %3089 = vrcp.f32 %v906_v63 }
 0x74b   : > { %v962_v3 = vpop.permute.xlu0 %961 }
 0x74c   : > { %v967_v6 = vsel %vm590_vm1, %v962_v3, 0 }
 0x74e   : > { %v3088_v0 = vpop.eup %3087 }
 0x74f   : > { %v909_v4 = vmul.f32 %v3088_v0, %v3084_v58 }
 0x752   : > { %v3090_v2 = vpop.eup %3089 }
 0x753   : > { %v910_v5 = vmul.f32 %v3090_v2, %v3086_v61 }
 0x755   : > { %v911_v7 = vpack.c.bf16 %v910_v5, %v909_v4 }
 0x757   : > { %2773 = vmatmul.mubr.msk.bf16.vlgmr.msra.gmra.mrb[20].mxu1 %vm640_vm3, %v911_v7 }
 0x758   : > { %2777 = vmatpush3.bf16.xpose.msra.mxu1 %v967_v6  ;;  %2778 = vmatprep.mubr.msk.bf16.mxu1 %vm3225_vm0, %v3224_v1 }
 0x759   : > { %2782 = vmatprep.subr.bf16.mxu1 %v3224_v1 }
 0x75f   : > { %2779 = vmatmul.mubr.msk.bf16.vlgmr.msra.gmra.mrb[24].mxu1 %vm590_vm1, %v960_v12 }
 0x760   : > { %2784 = vmatprep.mubr.msk.bf16.mxu1 %vm3225_vm0, %v3224_v1 }
 0x82a   : > { %v952_v8 = vpop.f32.mrb[20].mxu1 }
 0x82b   : > { %v2774_v11 = vpop.f32.mrb[21].mxu1 }
 0x82c   : > { %v955_v13 = vpop.f32.mrb[22].mxu1 }
 0x82d   : > { %v2964_v14 = vpack.i.bf16 %v955_v13, %v952_v8  ;;  %v2775_v18 = vpop.f32.mrb[23].mxu1 }
 0x832   : > { %v1003_v19 = vpop.f32.mrb[24].mxu1 }
 0x833   : > { %v1010_v20 = vsel %vm471_vm2, %v1003_v19, -1e+30  ;;  %v2780_v21 = vpop.f32.mrb[25].mxu1 }
 0x834   : > { %v1006_v22 = vpop.f32.mrb[26].mxu1  ;;  %v1012_v23 = vsel %vm640_vm3, %v1010_v20, -inf }
 0x835   : > { %v1011_v24 = vsel %vm472_vm4, %v1006_v22, -1e+30  ;;  %1013 = vmax.xlane.f32.xlu1 %v1012_v23  ;;  %v2781_v28 = vpop.f32.mrb[27].mxu1 }
 0x836   : > { %v1015_v29 = vsel %vm640_vm3, %v1011_v24, -inf }
 0x837   : > { %1016 = vmax.xlane.f32.xlu0 %v1015_v29  ;;  %v3008_v29 = vld [vmem:[%s3948_s5] sm:$0xff]  }
 0x8c2   : > { %v1014_v30 = vpop.xlane.xlu1 %1013 }
 0x8c3   : > { %v1018_v31 = vsub.f32 %v1010_v20, %v1014_v30 }
 0x8c4   : > { %v1017_v32 = vpop.xlane.xlu0 %1016 }
 0x8c5   : > { %v1020_v33 = vmul.f32 1.442695, %v1018_v31  ;;  %v1019_v34 = vsub.f32 %v1011_v24, %v1017_v32 }
 0x8c7   : > { %3091 = vpow2.f32 %v1020_v33  ;;  %v1022_v35 = vmul.f32 1.442695, %v1019_v34 }
 0x8c9   : > { %3093 = vpow2.f32 %v1022_v35 }
 0x8d1   : > { %v3092_v37 = vpop.eup %3091 }
 0x8d2   : > { %v1024_v40 = vsel %vm640_vm3, %v3092_v37, 0.0 }
 0x8d3   : > { %v3094_v41 = vpop.eup %3093  ;;  %1025 = vadd.xlane.f32.xlu0 %v1024_v40  ;;  %v3010_v40 = vld [vmem:[%s3948_s5 + $0x10] sm:$0xff]  }
 0x8d4   : > { %v1027_v26 = vsel %vm640_vm3, %v3094_v41, 0.0 }
 0x8d5   : > { %1028 = vadd.xlane.f32.xlu1 %v1027_v26  ;;  %v3012_v26 = vld [vmem:[%s3948_s5 + $0x20] sm:$0xff]  }
 0x8e6   : > { %2960 = vrot.lane.b32.xlu1 %v2959_v39, %s3958_s13  ;;  %v3003_v39 = vld [vmem:[%s3947_s4 + $0x18] sm:$0xff]  }
 0x8e9   : > { %1035 = vrot.lane.b32.xlu0 %v3456_v46, %s3958_s13  ;;  %v3000_v46 = vld [vmem:[%s3947_s4] sm:$0xff]  }
 0x8ea   : > { %2965 = vrot.lane.b32.xlu1 %v2964_v14, %s3956_s28  ;;  %2789 = vmatpush3.bf16.msra.mxu0 %v3000_v46 }
 0x8eb   : > { %2790 = vmatprep.subr.bf16.mxu0 %v3224_v1 }
 0x8ee   : > { %2791 = vmatpush3.bf16.msra.mxu0 %v3001_v36 }
 0x8ef   : > { %2792 = vmatprep.subr.bf16.mxu0 %v3224_v1 }
 0x8f2   : > { %2793 = vmatpush3.bf16.msra.mxu0 %v3002_v38  ;;  %v1251_v38 = vsub.s32 2, %v3414_v15 }
 0x8f3   : > { %2794 = vmatprep.subr.bf16.mxu0 %v3224_v1 }
 0x8f6   : > { %2795 = vmatpush3.bf16.msra.mxu0 %v3003_v39 }
 0x8f7   : > { %2796 = vmatprep.subr.bf16.mxu0 %v3224_v1 }
 0x8fa   : > { %2797 = vmatpush3.bf16.msra.mxu0 %v3004_v50 }
 0x8fb   : > { %2798 = vmatprep.subr.bf16.mxu0 %v3224_v1 }
 0x8fe   : > { %2799 = vmatpush3.bf16.msra.mxu0 %v3005_v51  ;;  %v1252_v51 = vrot.slane %v3422_v17, %v1251_v38 }
 0x8ff   : > { %2800 = vmatprep.subr.bf16.mxu0 %v3224_v1 }
 0x902   : > { %2801 = vmatpush3.bf16.msra.mxu0 %v3006_v52  ;;  %v1257_v52 = vsub.s32 3, %v3414_v15 }
 0x903   : > { %2802 = vmatprep.subr.bf16.mxu0 %v3224_v1 }
 0x906   : > { %2803 = vmatpush3.bf16.msra.mxu0 %v3007_v53 }
 0x907   : > { %2828 = vmatprep.subr.bf16.mxu0 %v3224_v1 }
 0x960   : > { %v1026_v27 = vpop.xlane.xlu0 %1025 }
 0x961   : > { %3095 = vrcp.f32 %v1026_v27  ;;  %v3013_v27 = vld [vmem:[%s3948_s5 + $0x28] sm:$0xff]  }
 0x962   : > { %v1029_v42 = vpop.xlane.xlu1 %1028 }
 0x963   : > { %3097 = vrcp.f32 %v1029_v42  ;;  %v3014_v42 = vld [vmem:[%s3948_s5 + $0x30] sm:$0xff]  }
 0x964   : > { %v1036_v43 = vpop.permute.xlu0 %1035 }
 0x965   : > { %2783 = vmatpush3.bf16.msra.mxu1 %v1036_v43  ;;  %v3015_v43 = vld [vmem:[%s3948_s5 + $0x38] sm:$0xff]  }
 0x966   : > { %2808 = vmatprep.subr.bf16.mxu1 %v3224_v1  ;;  %v2961_v61 = vpop.permute.xlu1 %2960 }
 0x967   : > { %v2963_v25 = vunpack.i.h.bf16 %v2961_v61  ;;  %v2962_v63 = vunpack.i.l.bf16 %v2961_v61 }
 0x969   : > { %v1107_v4 = vsel %vm590_vm1, %v3470_v59, %v2963_v25  ;;  %v1106_v5 = vsel %vm590_vm1, %v3468_v57, %v2962_v63  ;;  %v3593_v59 = vsub.s32 1, %v3414_v15  ;;  %v1280_v63 = vsub.s32 4, %v3414_v15 }
 0x96a   : > { %v2966_v62 = vpop.permute.xlu1 %2965 }
 0x96b   : > { %v3096_v44 = vpop.eup %3095  ;;  %v2968_v0 = vunpack.i.h.bf16 %v2966_v62  ;;  %v2967_v2 = vunpack.i.l.bf16 %v2966_v62  ;;  %v1134_v57 = vrot.slane %v3422_v17, %v3593_v59 }
 0x96c   : > { %v1032_v47 = vmul.f32 %v3096_v44, %v3092_v37  ;;  %v3016_v44 = vld [vmem:[%s3635_s25] ss:$8 sps:$4 sm:$0xff]  }
 0x96d   : > { %v3098_v45 = vpop.eup %3097  ;;  %v1109_v12 = vsel %vm1108_vm5, %v1106_v5, %v2967_v2  ;;  %v1110_v8 = vsel %vm1108_vm5, %v1107_v4, %v2968_v0  ;;  %v1383_v25 = vsel %vm590_vm1, %v3016_v44, 0  ;;  %v1281_v0 = vrot.slane %v3422_v17, %v1280_v63 }
 0x96e   : > { %v1033_v48 = vmul.f32 %v3098_v45, %v3094_v41  ;;  %v3011_v41 = vld [vmem:[%s3948_s5 + $0x18] sm:$0xff]  }
 0x970   : > { %v1034_v49 = vpack.c.bf16 %v1033_v48, %v1032_v47 }
 0x972   : > { %2785 = vmatmul.mubr.msk.bf16.vlgmr.msra.gmra.mrb[28].mxu1 %vm640_vm3, %v1034_v49 }
 0x973   : > { %2824 = vmatprep.mubr.msk.bf16.mxu1 %vm3225_vm0, %v3224_v1  ;;  %2809 = vmatpush3.bf16.msra.mxu1 %v3008_v29 }
 0x974   : > { %2810 = vmatprep.subr.bf16.mxu1 %v3224_v1 }
 0xa45   : > { %v1075_v54 = vpop.f32.mrb[28].mxu1 }
 0xa46   : > { %v2786_v55 = vpop.f32.mrb[29].mxu1 }
 0xa47   : > { %v1078_v56 = vpop.f32.mrb[30].mxu1 }
 0xa48   : > { %v2969_v58 = vpack.i.bf16 %v1078_v56, %v1075_v54  ;;  %v2787_v60 = vpop.f32.mrb[31].mxu1  ;;  %v1258_v56 = vrot.slane %v3422_v17, %v1257_v52 }
 0xa4a   : > { %2970 = vrot.lane.b32.xlu1 %v2969_v58, %s3226_s26 }
 0xabc   : > { %v2971_v3 = vpop.permute.xlu1 %2970 }
 0xabd   : > { %v2973_v6 = vunpack.i.h.bf16 %v2971_v3  ;;  %v2972_v7 = vunpack.i.l.bf16 %v2971_v3 }
 0xabf   : > { %v1113_v11 = vsel %vm1111_vm6, %v1110_v8, %v2973_v6  ;;  %v1112_v13 = vsel %vm1111_vm6, %v1109_v12, %v2972_v7 }
 0xac0   : > { %v1114_v14 = vpack.c.bf16 %v1113_v11, %v1112_v13 }
 0xac2   : > { %2805 = vmatmul.mubr.bf16.vlgmr.msra.gmra.mrb[4].mxu0 %v1114_v14 }
 0xac3   : > { %2830 = vmatprep.mubr.msk.bf16.mxu0 %vm3225_vm0, %v3224_v1  ;;  %2829 = vmatpush3.bf16.xpose.msra.mxu0 %v1383_v25 }
 0xac4   : > { %2840 = vmatprep.subr.bf16.mxu0 %v3224_v1 }
 0xb95   : > { %v1217_v18 = vpop.f32.mrb[4].mxu0 }
 0xb96   : > { %v1218_v19 = vadd.f32 %v1217_v18, %v1134_v57  ;;  %v2806_v20 = vpop.f32.mrb[5].mxu0 }
 0xb97   : > { %v1220_v21 = vpop.f32.mrb[6].mxu0 }
 0xb98   : > { %v1221_v22 = vadd.f32 %v1220_v21, %v1134_v57  ;;  %v2807_v23 = vpop.f32.mrb[7].mxu0  ;;  %v1224_v24 = vadd.f32 %v1218_v19, %v3392_v9 }
 0xb9a   : > { %1226 = vadd.xlane.f32.xlu0 %v1224_v24  ;;  %v1225_v28 = vadd.f32 %v1221_v22, %v3394_v10  ;;  %v3009_v10 = vld [vmem:[%s3948_s5 + $0x8] sm:$0xff]  }
 0xb9b   : > { %2811 = vmatpush3.bf16.msra.mxu1 %v3009_v10 }
 0xb9c   : > { %1228 = vadd.xlane.f32.xlu1 %v1225_v28  ;;  %2812 = vmatprep.subr.bf16.mxu1 %v3224_v1 }
 0xb9f   : > { %2813 = vmatpush3.bf16.msra.mxu1 %v3010_v40 }
 0xba0   : > { %2814 = vmatprep.subr.bf16.mxu1 %v3224_v1 }
 0xba3   : > { %2815 = vmatpush3.bf16.msra.mxu1 %v3011_v41 }
 0xba4   : > { %2816 = vmatprep.subr.bf16.mxu1 %v3224_v1 }
 0xba7   : > { %2817 = vmatpush3.bf16.msra.mxu1 %v3012_v26 }
 0xba8   : > { %2818 = vmatprep.subr.bf16.mxu1 %v3224_v1 }
 0xbab   : > { %2819 = vmatpush3.bf16.msra.mxu1 %v3013_v27 }
 0xbac   : > { %2820 = vmatprep.subr.bf16.mxu1 %v3224_v1 }
 0xbaf   : > { %2821 = vmatpush3.bf16.msra.mxu1 %v3014_v42 }
 0xbb0   : > { %2822 = vmatprep.subr.bf16.mxu1 %v3224_v1 }
 0xbb3   : > { %2823 = vmatpush3.bf16.msra.mxu1 %v3015_v43 }
 0xbb4   : > { %2834 = vmatprep.subr.bf16.mxu1 %v3224_v1 }
 0xc27   : > { %v1227_v30 = vpop.xlane.xlu0 %1226 }
 0xc28   : > { %v1231_v31 = vmul.f32 0.0078125, %v1227_v30 }
 0xc29   : > { %v1229_v32 = vpop.xlane.xlu1 %1228 }
 0xc2a   : > { %v1233_v33 = vsub.f32 %v1224_v24, %v1231_v31  ;;  %v1232_v34 = vmul.f32 0.0078125, %v1229_v32 }
 0xc2c   : > { %v1234_v35 = vsub.f32 %v1225_v28, %v1232_v34  ;;  %v1235_v37 = vmul.f32 %v1233_v33, %v1233_v33 }
 0xc2e   : > { %1237 = vadd.xlane.f32.xlu0 %v1235_v37  ;;  %v1236_v9 = vmul.f32 %v1234_v35, %v1234_v35 }
 0xc32   : > { %1239 = vadd.xlane.f32.xlu0 %v1236_v9 }
 0xc48   : > { %1500 = vrot.lane.b32.xlu0 %v3016_v44, %s3226_s26 }
 0xc4c   : > { %1742 = vrot.lane.b32.xlu0 %v3016_v44, %s3963_s23 }
 0xcbb   : > { %v1238_v45 = vpop.xlane.xlu0 %1237 }
 0xcbc   : > { %v1241_v47 = vmul.f32 0.0078125, %v1238_v45 }
 0xcbe   : > { %v1243_v48 = vadd.f32 1e-05, %v1241_v47 }
 0xcbf   : > { %v1240_v49 = vpop.xlane.xlu0 %1239 }
 0xcc0   : > { %3099 = vrsqrt.f32 %v1243_v48  ;;  %v1242_v46 = vmul.f32 0.0078125, %v1240_v49 }
 0xcc2   : > { %v1244_v36 = vadd.f32 1e-05, %v1242_v46 }
 0xcc3   : > { %v1501_v5 = vpop.permute.xlu0 %1500 }
 0xcc4   : > { %3101 = vrsqrt.f32 %v1244_v36  ;;  %v1506_v11 = vsel %vm590_vm1, %v1501_v5, 0 }
 0xcc7   : > { %v1743_v57 = vpop.permute.xlu0 %1742 }
 0xcc8   : > { %v1748_v18 = vsel %vm590_vm1, %v1743_v57, 0 }
 0xcca   : > { %v3100_v39 = vpop.eup %3099 }
 0xccb   : > { %v1247_v50 = vmul.f32 %v3100_v39, %v1233_v33 }
 0xccd   : > { %v1253_v55 = vmul.f32 %v1252_v51, %v1247_v50 }
 0xcce   : > { %v3102_v53 = vpop.eup %3101 }
 0xccf   : > { %v1248_v54 = vmul.f32 %v3102_v53, %v1234_v35  ;;  %v3646_v60 = vadd.f32 %v1258_v56, %v1253_v55  ;;  %v3018_v55 = vld [vmem:[%s3635_s25 + $0x4] ss:$8 sps:$4 sm:$0xff]   ;;  %s3230_s25 = smov [#allocation2]  }
 0xcd1   : > { %v1254_v58 = vmul.f32 %v1252_v51, %v1248_v54 }
 0xcd3   : > { %v3648_v61 = vadd.f32 %v1258_v56, %v1254_v58 }
 0xcd5   : > { %v1261_v62 = vpack.c.bf16 %v3648_v61, %v3646_v60 }
 0xcd7   : > { %2825 = vmatmul.mubr.bf16.vlgmr.msra.gmra.mrb[32].mxu1 %v1261_v62 }
 0xcd8   : > { %2836 = vmatprep.mubr.msk.bf16.mxu1 %vm3225_vm0, %v3224_v1  ;;  %2835 = vmatpush3.bf16.msra.mxu1 %v3018_v55 }
 0xcd9   : > { %2846 = vmatprep.subr.bf16.mxu1 %v3224_v1 }
 0xdaa   : > { %v1364_v2 = vpop.f32.mrb[32].mxu1 }
 0xdab   : > { %v2826_v3 = vpop.f32.mrb[33].mxu1  ;;  %v1365_v6 = vadd.f32 %v1364_v2, %v1281_v0 }
 0xdac   : > { %v1367_v4 = vpop.f32.mrb[34].mxu1 }
 0xdad   : > { %v1368_v7 = vadd.f32 %v1367_v4, %v1281_v0  ;;  %v2827_v12 = vpop.f32.mrb[35].mxu1 }
 0xdaf   : > { %v1373_v8 = vpack.c.bf16 %v1368_v7, %v1365_v6 }
 0xdb1   : > { %1498 = vrot.lane.b32.xlu1 %v1373_v8, %s3226_s26  ;;  %2831 = vmatmul.mubr.msk.bf16.vlgmr.msra.gmra.mrb[8].mxu0 %vm590_vm1, %v1373_v8 }
 0xdb2   : > { %2841 = vmatpush3.bf16.xpose.msra.mxu0 %v1506_v11  ;;  %2842 = vmatprep.mubr.msk.bf16.mxu0 %vm3225_vm0, %v3224_v1 }
 0xdb3   : > { %2852 = vmatprep.subr.bf16.mxu0 %v3224_v1 }
 0xdb5   : > { %1621 = vrot.lane.b32.xlu1 %v3016_v44, %s3964_s12 }
 0xdb9   : > { %1619 = vrot.lane.b32.xlu1 %v1373_v8, %s3964_s12 }
 0xdbd   : > { %1740 = vrot.lane.b32.xlu1 %v1373_v8, %s3963_s23 }
 0xe23   : > { %v1499_v17 = vpop.permute.xlu1 %1498 }
 0xe24   : > { %2843 = vmatmul.mubr.msk.bf16.vlgmr.msra.gmra.mrb[12].mxu0 %vm590_vm1, %v1499_v17 }
 0xe25   : > { %2854 = vmatprep.mubr.msk.bf16.mxu0 %vm3225_vm0, %v3224_v1 }
 0xe27   : > { %v1622_v13 = vpop.permute.xlu1 %1621 }
 0xe28   : > { %v1627_v14 = vsel %vm590_vm1, %v1622_v13, 0 }
 0xe29   : > { %2853 = vmatpush3.bf16.xpose.msra.mxu0 %v1627_v14 }
 0xe2a   : > { %2864 = vmatprep.subr.bf16.mxu0 %v3224_v1 }
 0xe2b   : > { %v1620_v19 = vpop.permute.xlu1 %1619 }
 0xe2f   : > { %v1741_v20 = vpop.permute.xlu1 %1740 }
 0xe30   : > { %2855 = vmatmul.mubr.msk.bf16.vlgmr.msra.gmra.mrb[16].mxu0 %vm590_vm1, %v1620_v19 }
 0xe31   : > { %2865 = vmatpush3.bf16.xpose.msra.mxu0 %v1748_v18  ;;  %2866 = vmatprep.mubr.msk.bf16.mxu0 %vm3225_vm0, %v3224_v1 }
 0xe32   : > { %2876 = vmatprep.subr.bf16.mxu0 %v3224_v1 }
 0xe38   : > { %2867 = vmatmul.mubr.msk.bf16.vlgmr.msra.gmra.mrb[20].mxu0 %vm590_vm1, %v1741_v20 }
 0xe39   : > { %2892 = vmatprep.mubr.msk.bf16.mxu0 %vm3225_vm0, %v3224_v1 }
 0xe84   : > { %v1419_v21 = vpop.f32.mrb[8].mxu0 }
 0xe85   : > { %v2832_v22 = vpop.f32.mrb[9].mxu0  ;;  %v1426_v23 = vsel %vm640_vm3, %v1419_v21, -inf }
 0xe86   : > { %1427 = vmax.xlane.f32.xlu0 %v1426_v23  ;;  %v1422_v24 = vpop.f32.mrb[10].mxu0 }
 0xe87   : > { %v2833_v28 = vpop.f32.mrb[11].mxu0  ;;  %v1429_v29 = vsel %vm640_vm3, %v1422_v24, -inf }
 0xe88   : > { %1430 = vmax.xlane.f32.xlu1 %v1429_v29 }
 0xef7   : > { %v1542_v30 = vpop.f32.mrb[12].mxu0 }
 0xef8   : > { %v2844_v31 = vpop.f32.mrb[13].mxu0  ;;  %v1549_v32 = vsel %vm640_vm3, %v1542_v30, -inf }
 0xef9   : > { %1550 = vmax.xlane.f32.xlu0 %v1549_v32  ;;  %v1545_v33 = vpop.f32.mrb[14].mxu0 }
 0xefa   : > { %v2845_v34 = vpop.f32.mrb[15].mxu0  ;;  %v1552_v35 = vsel %vm640_vm3, %v1545_v33, -inf }
 0xefd   : > { %1553 = vmax.xlane.f32.xlu0 %v1552_v35 }
 0xf03   : > { %v1663_v37 = vpop.f32.mrb[16].mxu0 }
 0xf04   : > { %v2856_v9 = vpop.f32.mrb[17].mxu0  ;;  %v1670_v10 = vsel %vm640_vm3, %v1663_v37, -inf }
 0xf05   : > { %1671 = vmax.xlane.f32.xlu0 %v1670_v10  ;;  %v1666_v40 = vpop.f32.mrb[18].mxu0 }
 0xf06   : > { %v2857_v41 = vpop.f32.mrb[19].mxu0  ;;  %v1673_v26 = vsel %vm640_vm3, %v1666_v40, -inf }
 0xf07   : > { %1674 = vmax.xlane.f32.xlu1 %v1673_v26 }
 0xf0b   : > { %v1784_v27 = vpop.f32.mrb[20].mxu0 }
 0xf0c   : > { %v2868_v42 = vpop.f32.mrb[21].mxu0  ;;  %v1791_v43 = vsel %vm640_vm3, %v1784_v27, -inf }
 0xf0d   : > { %1792 = vmax.xlane.f32.xlu0 %v1791_v43  ;;  %v3687_v44 = vpop.f32.mrb[22].mxu0 }
 0xf0e   : > { %v2869_v45 = vpop.f32.mrb[23].mxu0  ;;  %v1794_v47 = vsel %vm640_vm3, %v3687_v44, -inf }
 0xf0f   : > { %1795 = vmax.xlane.f32.xlu1 %v1794_v47 }
 0xf13   : > { %v1428_v48 = vpop.xlane.xlu0 %1427 }
 0xf14   : > { %v1432_v49 = vsub.f32 %v1419_v21, %v1428_v48 }
 0xf15   : > { %v1431_v46 = vpop.xlane.xlu1 %1430 }
 0xf16   : > { %v1434_v36 = vmul.f32 1.442695, %v1432_v49  ;;  %v1433_v39 = vsub.f32 %v1422_v24, %v1431_v46 }
 0xf18   : > { %3103 = vpow2.f32 %v1434_v36  ;;  %v1436_v50 = vmul.f32 1.442695, %v1433_v39 }
 0xf1a   : > { %3105 = vpow2.f32 %v1436_v50 }
 0xf22   : > { %v3104_v51 = vpop.eup %3103 }
 0xf23   : > { %v1438_v52 = vsel %vm640_vm3, %v3104_v51, 0.0 }
 0xf24   : > { %v3106_v53 = vpop.eup %3105  ;;  %1439 = vadd.xlane.f32.xlu0 %v1438_v52 }
 0xf25   : > { %v1441_v54 = vsel %vm640_vm3, %v3106_v53, 0.0 }
 0xf26   : > { %1442 = vadd.xlane.f32.xlu1 %v1441_v54 }
 0xf86   : > { %v1551_v56 = vpop.xlane.xlu0 %1550 }
 0xf87   : > { %v1555_v58 = vsub.f32 %v1542_v30, %v1551_v56 }
 0xf89   : > { %v1557_v62 = vmul.f32 1.442695, %v1555_v58 }
 0xf8a   : > { %v1554_v25 = vpop.xlane.xlu0 %1553 }
 0xf8b   : > { %3107 = vpow2.f32 %v1557_v62  ;;  %v1556_v63 = vsub.f32 %v1545_v33, %v1554_v25 }
 0xf8d   : > { %v1559_v0 = vmul.f32 1.442695, %v1556_v63 }
 0xf8f   : > { %3109 = vpow2.f32 %v1559_v0 }
 0xf92   : > { %v1672_v2 = vpop.xlane.xlu0 %1671 }
 0xf93   : > { %v1676_v3 = vsub.f32 %v1663_v37, %v1672_v2 }
 0xf94   : > { %v1675_v4 = vpop.xlane.xlu1 %1674 }
 0xf95   : > { %v3108_v5 = vpop.eup %3107  ;;  %v1678_v6 = vmul.f32 1.442695, %v1676_v3  ;;  %v1677_v7 = vsub.f32 %v1666_v40, %v1675_v4 }
 0xf96   : > { %v1561_v12 = vsel %vm640_vm3, %v3108_v5, 0.0 }
 0xf97   : > { %3111 = vpow2.f32 %v1678_v6  ;;  %v1680_v8 = vmul.f32 1.442695, %v1677_v7  ;;  %1562 = vadd.xlane.f32.xlu0 %v1561_v12  ;;  %v3019_v7 = vld [vmem:[%s3949_s6] sm:$0xff]  }
 0xf98   : > { %2877 = vmatpush3.bf16.msra.mxu0 %v3019_v7  ;;  %v3033_v7 = vld [vmem:[%s3950_s7 + $0x20] ss:$8 sps:$4 sm:$0xff]  }
 0xf99   : > { %v3110_v11 = vpop.eup %3109  ;;  %3113 = vpow2.f32 %v1680_v8  ;;  %2878 = vmatprep.subr.bf16.mxu0 %v3224_v1 }
 0xf9a   : > { %v1793_v17 = vpop.xlane.xlu0 %1792  ;;  %v1564_v13 = vsel %vm640_vm3, %v3110_v11, 0.0 }
 0xf9b   : > { %v1797_v14 = vsub.f32 %v1784_v27, %v1793_v17  ;;  %1565 = vadd.xlane.f32.xlu1 %v1564_v13  ;;  %v3021_v13 = vld [vmem:[%s3949_s6 + $0x10] sm:$0xff]  }
 0xf9c   : > { %v1796_v24 = vpop.xlane.xlu1 %1795 }
 0xf9d   : > { %v1799_v57 = vmul.f32 1.442695, %v1797_v14  ;;  %v1798_v35 = vsub.f32 %v3687_v44, %v1796_v24  ;;  %v3026_v24 = vld [vmem:[%s3949_s6 + $0x38] sm:$0xff]  }
 0xf9f   : > { %3115 = vpow2.f32 %v1799_v57  ;;  %v1801_v37 = vmul.f32 1.442695, %v1798_v35 }
 0xfa1   : > { %v3112_v18 = vpop.eup %3111 }
 0xfa2   : > { %v1682_v19 = vsel %vm640_vm3, %v3112_v18, 0.0 }
 0xfa3   : > { %v3114_v20 = vpop.eup %3113  ;;  %1683 = vadd.xlane.f32.xlu0 %v1682_v19 }
 0xfa4   : > { %v1685_v21 = vsel %vm640_vm3, %v3114_v20, 0.0 }
 0xfa5   : > { %1686 = vadd.xlane.f32.xlu1 %v1685_v21  ;;  %v3023_v21 = vld [vmem:[%s3949_s6 + $0x20] sm:$0xff]  }
 0xfa9   : > { %v3116_v22 = vpop.eup %3115 }
 0xfaa   : > { %v1803_v23 = vsel %vm640_vm3, %v3116_v22, 0.0 }
 0xfab   : > { %1804 = vadd.xlane.f32.xlu0 %v1803_v23  ;;  %v3025_v23 = vld [vmem:[%s3949_s6 + $0x30] sm:$0xff]  }
 0xfb1   : > { %v1440_v28 = vpop.xlane.xlu0 %1439 }
 0xfb2   : > { %3117 = vrcp.f32 %v1440_v28 }
 0xfb3   : > { %v1443_v29 = vpop.xlane.xlu1 %1442 }
 0xfb4   : > { %3119 = vrcp.f32 %v1443_v29 }
 0xfb5   : > { %3121 = vpow2.f32 %v1801_v37 }
 0xfb6   : > { %1693 = vrot.lane.b32.xlu1 %v3018_v55, %s3964_s12 }
 0xfbc   : > { %v3118_v30 = vpop.eup %3117 }
 0xfbd   : > { %v1446_v32 = vmul.f32 %v3118_v30, %v3104_v51 }
 0xfbe   : > { %v3120_v31 = vpop.eup %3119 }
 0xfbf   : > { %v1447_v33 = vmul.f32 %v3120_v31, %v3106_v53  ;;  %v3122_v9 = vpop.eup %3121 }
 0xfc0   : > { %v1806_v10 = vsel %vm640_vm3, %v3122_v9, 0.0 }
 0xfc1   : > { %v1448_v34 = vpack.c.bf16 %v1447_v33, %v1446_v32  ;;  %1572 = vrot.lane.b32.xlu0 %v3018_v55, %s3226_s26 }
 0xfc3   : > { %2837 = vmatmul.mubr.msk.bf16.vlgmr.msra.gmra.mrb[36].mxu1 %vm640_vm3, %v1448_v34 }
 0xfc4   : > { %2848 = vmatprep.mubr.msk.bf16.mxu1 %vm3225_vm0, %v3224_v1 }
 0xfda   : > { %1807 = vadd.xlane.f32.xlu1 %v1806_v10 }
 0xfeb   : > { %1814 = vrot.lane.b32.xlu1 %v3018_v55, %s3963_s23 }
0x1024   : > { %v1563_v41 = vpop.xlane.xlu0 %1562 }
0x1028   : > { %v1566_v40 = vpop.xlane.xlu1 %1565 }
0x1029   : > { %3123 = vrcp.f32 %v1566_v40 }
0x102a   : > { %3125 = vrcp.f32 %v1563_v41 }
0x1030   : > { %v1684_v27 = vpop.xlane.xlu0 %1683 }
0x1032   : > { %v1687_v26 = vpop.xlane.xlu1 %1686 }
0x1033   : > { %3127 = vrcp.f32 %v1687_v26  ;;  %v3124_v42 = vpop.eup %3123 }
0x1034   : > { %3129 = vrcp.f32 %v1684_v27  ;;  %v3126_v44 = vpop.eup %3125  ;;  %v1570_v45 = vmul.f32 %v3124_v42, %v3110_v11  ;;  %v3020_v11 = vld [vmem:[%s3949_s6 + $0x8] sm:$0xff]  }
0x1035   : > { %v1569_v47 = vmul.f32 %v3126_v44, %v3108_v5  ;;  %2879 = vmatpush3.bf16.msra.mxu0 %v3020_v11  ;;  %v3041_v11 = vld [vmem:[%s3950_s7 + $0x44] ss:$8 sps:$4 sm:$0xff]  }
0x1036   : > { %v1694_v36 = vpop.permute.xlu1 %1693  ;;  %2880 = vmatprep.subr.bf16.mxu0 %v3224_v1 }
0x1037   : > { %v1571_v49 = vpack.c.bf16 %v1570_v45, %v1569_v47 }
0x1038   : > { %v1805_v43 = vpop.xlane.xlu0 %1804 }
0x1039   : > { %3131 = vrcp.f32 %v1805_v43  ;;  %2881 = vmatpush3.bf16.msra.mxu0 %v3021_v13  ;;  %v3044_v13 = vld [vmem:[%s3950_s7 + $0x54] ss:$8 sps:$4 sm:$0xff]  }
0x103a   : > { %2882 = vmatprep.subr.bf16.mxu0 %v3224_v1 }
0x103c   : > { %v1573_v48 = vpop.permute.xlu0 %1572 }
0x103d   : > { %2847 = vmatpush3.bf16.msra.mxu1 %v1573_v48  ;;  %v3128_v46 = vpop.eup %3127  ;;  %v1910_v48 = vsub.s32 5, %v3414_v15 }
0x103e   : > { %2858 = vmatprep.subr.bf16.mxu1 %v3224_v1  ;;  %v3130_v39 = vpop.eup %3129  ;;  %v1691_v50 = vmul.f32 %v3128_v46, %v3114_v20  ;;  %v3022_v20 = vld [vmem:[%s3949_s6 + $0x18] sm:$0xff]  }
0x103f   : > { %v1690_v51 = vmul.f32 %v3130_v39, %v3112_v18  ;;  %2883 = vmatpush3.bf16.msra.mxu0 %v3022_v20  ;;  %v3048_v20 = vld [vmem:[%s3950_s7 + $0x70] ss:$8 sps:$4 sm:$0xff]  }
0x1040   : > { %2849 = vmatmul.mubr.msk.bf16.vlgmr.msra.gmra.mrb[40].mxu1 %vm640_vm3, %v1571_v49  ;;  %2884 = vmatprep.subr.bf16.mxu0 %v3224_v1  ;;  %v3761_v49 = vld [vmem:[%s3952_s9] sm:$0xff] }
0x1041   : > { %2859 = vmatpush3.bf16.msra.mxu1 %v1694_v36  ;;  %2860 = vmatprep.mubr.msk.bf16.mxu1 %vm3225_vm0, %v3224_v1  ;;  %v1692_v52 = vpack.c.bf16 %v1691_v50, %v1690_v51  ;;  %v1911_v46 = vrot.slane %v3761_v49, %v1910_v48 }
0x1042   : > { %2870 = vmatprep.subr.bf16.mxu1 %v3224_v1 }
0x1043   : > { %v3132_v55 = vpop.eup %3131  ;;  %2885 = vmatpush3.bf16.msra.mxu0 %v3023_v21  ;;  %v3229_v21 = vmov 0  }
0x1044   : > { %v1811_v58 = vmul.f32 %v3132_v55, %v3116_v22  ;;  %v3024_v22 = vld [vmem:[%s3949_s6 + $0x28] sm:$0xff]   ;;  %2886 = vmatprep.subr.bf16.mxu0 %v3224_v1 }
0x1047   : > { %2887 = vmatpush3.bf16.msra.mxu0 %v3024_v22  ;;  %v3051_v22 = vld [vmem:[%s3951_s8 + $0x40] sm:$0xff]  }
0x1048   : > { %2861 = vmatmul.mubr.msk.bf16.vlgmr.msra.gmra.mrb[44].mxu1 %vm640_vm3, %v1692_v52  ;;  %2888 = vmatprep.subr.bf16.mxu0 %v3224_v1 }
0x1049   : > { %2872 = vmatprep.mubr.msk.bf16.mxu1 %vm3225_vm0, %v3224_v1 }
0x104b   : > { %2889 = vmatpush3.bf16.msra.mxu0 %v3025_v23  ;;  %v3052_v23 = vld [vmem:[%s3951_s8] sm:$0xff]  }
0x104c   : > { %2890 = vmatprep.subr.bf16.mxu0 %v3224_v1 }
0x104f   : > { %2891 = vmatpush3.bf16.msra.mxu0 %v3026_v24  ;;  %v3053_v24 = vld [vmem:[%s3951_s8 + $0x48] sm:$0xff]  }
0x1050   : > { %2698 = vmatprep.subr.bf16.mxu0 %v3051_v22 }
0x1067   : > { %v1808_v53 = vpop.xlane.xlu1 %1807 }
0x1068   : > { %3133 = vrcp.f32 %v1808_v53 }
0x106b   : > { %v1815_v54 = vpop.permute.xlu1 %1814 }
0x106c   : > { %2871 = vmatpush3.bf16.msra.mxu1 %v1815_v54 }
0x1072   : > { %v3134_v56 = vpop.eup %3133 }
0x1073   : > { %v1812_v62 = vmul.f32 %v3134_v56, %v3122_v9  ;;  %v3027_v56 = vld [vmem:[%s3950_s7] ss:$8 sps:$4 sm:$0xff]  }
0x1075   : > { %v1813_v25 = vpack.c.bf16 %v1812_v62, %v1811_v58  ;;  %v3029_v58 = vld [vmem:[%s3950_s7 + $0x4] ss:$8 sps:$4 sm:$0xff]   ;;  %v3032_v62 = vld [vmem:[%s3950_s7 + $0x14] ss:$8 sps:$4 sm:$0xff]  }
0x1076   : > { %2146 = vmatprep.subr.bf16.mxu1 %v3029_v58 }
0x1077   : > { %2873 = vmatmul.mubr.msk.bf16.vlgmr.msra.gmra.mrb[48].mxu1 %vm640_vm3, %v1813_v25 }
0x1078   : > { %2147 = vmatpush1.bf16.msra.mxu1 %v3027_v56  ;;  %2178 = vmatprep.mubr.bf16.mxu1 %v3229_v21  ;;  %v2054_v56 = vld [vmem:[%s3953_s10] sm:$0x3] }
0x1079   : > { %2148 = vmatprep.subr.bf16.mxu1 %v3032_v62  ;;  %v2059_v58 = vrot.slane %v2054_v56, %v3417_v16  ;;  %v2063_v62 = vrot.slane %v2054_v56, %v3593_v59 }
0x1096   : > { %v1490_v63 = vpop.f32.mrb[36].mxu1 }
0x1097   : > { %v2838_v0 = vpop.f32.mrb[37].mxu1 }
0x1098   : > { %v1493_v2 = vpop.f32.mrb[38].mxu1 }
0x1099   : > { %v2839_v3 = vpop.f32.mrb[39].mxu1 }
0x1113   : > { %v1612_v4 = vpop.f32.mrb[40].mxu1 }
0x1114   : > { %v2850_v5 = vpop.f32.mrb[41].mxu1 }
0x1115   : > { %v1615_v6 = vpop.f32.mrb[42].mxu1 }
0x1116   : > { %v2974_v12 = vpack.i.bf16 %v1615_v6, %v1612_v4  ;;  %v2851_v8 = vpop.f32.mrb[43].mxu1  ;;  %v3035_v6 = vld [vmem:[%s3950_s7 + $0x24] ss:$8 sps:$4 sm:$0xff]  }
0x1117   : > { %v3036_v8 = vld [vmem:[%s3950_s7 + $0x30] ss:$8 sps:$4 sm:$0xff]  }
0x1118   : > { %2975 = vrot.lane.b32.xlu1 %v2974_v12, %s3963_s23  ;;  %v3038_v12 = vld [vmem:[%s3950_s7 + $0x34] ss:$8 sps:$4 sm:$0xff]   ;;  %s2629_s23 = sshll.u32 %s3214_s20, 8 }
0x1119   : > { %s3893_s15 = scalar_lea.hbm %s3954_s11, %s2629_s23 }
0x111b   : > { %v1733_v17 = vpop.f32.mrb[44].mxu1 }
0x111c   : > { %v2862_v14 = vpop.f32.mrb[45].mxu1 }
0x111d   : > { %v1736_v57 = vpop.f32.mrb[46].mxu1  ;;  %v3042_v14 = vld [vmem:[%s3950_s7 + $0x50] ss:$8 sps:$4 sm:$0xff]  }
0x111e   : > { %v2979_v18 = vpack.i.bf16 %v1736_v57, %v1733_v17  ;;  %v2863_v19 = vpop.f32.mrb[47].mxu1  ;;  %v3039_v17 = vld [vmem:[%s3950_s7 + $0x40] ss:$8 sps:$4 sm:$0xff]   ;;  %v3047_v57 = vld [vmem:[%s3950_s7 + $0x64] ss:$8 sps:$4 sm:$0xff]  }
0x111f   : > { %v3050_v19 = vld [vmem:[%s3950_s7 + $0x74] ss:$8 sps:$4 sm:$0xff]  }
0x1120   : > { %2980 = vrot.lane.b32.xlu0 %v2979_v18, %s3964_s12  ;;  %v3045_v18 = vld [vmem:[%s3950_s7 + $0x60] ss:$8 sps:$4 sm:$0xff]  }
0x114a   : > { %v1854_v28 = vpop.f32.mrb[48].mxu1 }
0x114b   : > { %v2874_v29 = vpop.f32.mrb[49].mxu1 }
0x114c   : > { %v1857_v30 = vpop.f32.mrb[50].mxu1  ;;  %v3055_v29 = vld [vmem:[%s3951_s8 + $0x50] sm:$0xff]  }
0x114d   : > { %v2984_v31 = vpack.i.bf16 %v1857_v30, %v1854_v28  ;;  %v2875_v32 = vpop.f32.mrb[51].mxu1  ;;  %v3054_v28 = vld [vmem:[%s3951_s8 + $0x8] sm:$0xff]   ;;  %v3056_v30 = vld [vmem:[%s3951_s8 + $0x10] sm:$0xff]  }
0x114e   : > { %v3058_v32 = vld [vmem:[%s3951_s8 + $0x18] sm:$0xff]  }
0x114f   : > { %2985 = vrot.lane.b32.xlu1 %v2984_v31, %s3226_s26  ;;  %v3057_v31 = vld [vmem:[%s3951_s8 + $0x58] sm:$0xff]   ;;  %s432_s26 = sand.u32 1, %s3206_s18  }
0x1150   : > { %s2530_s16 = sshll.u32 %s432_s26, 4  ;;  %s3897_s12 = scalar_lea.sflag [#allocation3], %s432_s26 }
0x1151   : > { %s434_s28 = scalar_lea.vmem [#allocation2], %s2530_s16  ;;  %s3148_s16 = sshll.u32 %s3230_s25, 4  ;;  %s3149_s16 = int_to_ptr.vmem [resolvable:$false] %s3148_s16 }
0x1152   : > { %s2422_s13 = sshll.u32 %s434_s28, 4  ;;  %s3150_s23 = scalar_lea.vmem %s3149_s16, 512  ;;  %s3895_s13 = int_to_ptr.vmem [resolvable:$true] %s2422_s13 }
0x1153   : > { %s3144_s20 = scalar_lea.vmem %s3895_s13, 256  ;;  %p3151_p1 = scmp.lt.s32.totalorder %s3895_s13, %s3149_s16 }
0x1154   : > { %p3145_p12 = scmp.ne.s32.totalorder %s3895_s13, %s3144_s20  ;;  %p3152_p2 = scmp.lt.s32.totalorder %s3150_s23, %s3144_s20 }
0x1156   : > { %p3146_p13 = pnand %p3145_p12, %p3333_p4  ;;  %p3153_p3 = por %p3152_p2, %p3151_p1 }
0x1158   : > { %p3147_p0 = pneg %p3146_p13 }
0x115a   : > { %p3154_p5 = pnand %p3153_p3, %p3147_p0 }
0x118a   : > { %v2976_v33 = vpop.permute.xlu1 %2975 }
0x118b   : > { %v2978_v35 = vunpack.i.h.bf16 %v2976_v33  ;;  %v2977_v37 = vunpack.i.l.bf16 %v2976_v33  ;;  %v3059_v33 = vld [vmem:[%s3951_s8 + $0x60] sm:$0xff]  }
0x118d   : > { %v1886_v1 = vsel %vm590_vm1, %v1493_v2, %v2978_v35  ;;  %v1885_v41 = vsel %vm590_vm1, %v1490_v63, %v2977_v37  ;;  %v3061_v35 = vld [vmem:[%s3951_s8 + $0x68] sm:$0xff]  }
0x1192   : > { %v2981_v34 = vpop.permute.xlu0 %2980 }
0x1193   : > { %v2983_v9 = vunpack.i.h.bf16 %v2981_v34  ;;  %v2982_v10 = vunpack.i.l.bf16 %v2981_v34  ;;  %v3060_v34 = vld [vmem:[%s3951_s8 + $0x20] sm:$0xff]  }
0x1195   : > { %v1887_v42 = vsel %vm1108_vm5, %v1885_v41, %v2982_v10  ;;  %v1888_v43 = vsel %vm1108_vm5, %v1886_v1, %v2983_v9 }
0x11c1   : > { %v2986_v40 = vpop.permute.xlu1 %2985 }
0x11c2   : > { %v2988_v26 = vunpack.i.h.bf16 %v2986_v40  ;;  %v2987_v27 = vunpack.i.l.bf16 %v2986_v40 }
0x11c4   : > { %v1889_v44 = vsel %vm1111_vm6, %v1887_v42, %v2987_v27  ;;  %v1890_v45 = vsel %vm1111_vm6, %v1888_v43, %v2988_v26  ;;  %v2027_v26 = vsub.s32 6, %v3414_v15 }
0x11c5   : > { %v1891_v47 = vpack.c.bf16 %v1890_v45, %v1889_v44  ;;  %v2033_v44 = vsub.s32 7, %v3414_v15 }
0x11c6   : > { %v2028_v43 = vrot.slane %v3761_v49, %v2027_v26 }
0x11c7   : > { %2893 = vmatmul.mubr.bf16.vlgmr.msra.gmra.mrb[24].mxu0 %v1891_v47 }
0x11c8   : > { %2699 = vmatpush3.bf16.msra.mxu0 %v3052_v23 }
0x11c9   : > { %2700 = vmatprep.subr.bf16.mxu0 %v3053_v24 }
0x11cc   : > { %2701 = vmatpush3.bf16.msra.mxu0 %v3054_v28 }
0x11cd   : > { %2702 = vmatprep.subr.bf16.mxu0 %v3055_v29 }
0x11d0   : > { %2703 = vmatpush3.bf16.msra.mxu0 %v3056_v30 }
0x11d1   : > { %2704 = vmatprep.subr.bf16.mxu0 %v3057_v31 }
0x11d4   : > { %2705 = vmatpush3.bf16.msra.mxu0 %v3058_v32 }
0x11d5   : > { %2706 = vmatprep.subr.bf16.mxu0 %v3059_v33 }
0x11d8   : > { %2707 = vmatpush3.bf16.msra.mxu0 %v3060_v34 }
0x11d9   : > { %2708 = vmatprep.subr.bf16.mxu0 %v3061_v35 }
0x129a   : > { %v1994_v36 = vpop.f32.mrb[24].mxu0 }
0x129b   : > { %v1995_v39 = vadd.f32 %v1994_v36, %v1911_v46  ;;  %v2894_v50 = vpop.f32.mrb[25].mxu0 }
0x129c   : > { %v1997_v51 = vpop.f32.mrb[26].mxu0 }
0x129d   : > { %v1998_v52 = vadd.f32 %v1997_v51, %v1911_v46  ;;  %v2895_v53 = vpop.f32.mrb[27].mxu0  ;;  %v2001_v54 = vadd.f32 %v1995_v39, %v3646_v60  ;;  %v3030_v60 = vld [vmem:[%s3950_s7 + $0x10] ss:$8 sps:$4 sm:$0xff]   ;;  %v2034_v46 = vrot.slane %v3761_v49, %v2033_v44 }
0x129e   : > { %2149 = vmatpush1.bf16.msra.mxu1 %v3030_v60  ;;  %v3063_v53 = vld [vmem:[%s3951_s8 + $0x70] sm:$0xff]   ;;  %v3065_v49 = vld [vmem:[%s3951_s8 + $0x78] sm:$0xff]  }
0x129f   : > { %2003 = vadd.xlane.f32.xlu0 %v2001_v54  ;;  %v2002_v55 = vadd.f32 %v1998_v52, %v3648_v61  ;;  %2150 = vmatprep.subr.bf16.mxu1 %v3035_v6  ;;  %v3062_v52 = vld [vmem:[%s3951_s8 + $0x28] sm:$0xff]  }
0x12a0   : > { %2709 = vmatpush3.bf16.msra.mxu0 %v3062_v52 }
0x12a1   : > { %2005 = vadd.xlane.f32.xlu1 %v2002_v55  ;;  %2710 = vmatprep.subr.bf16.mxu0 %v3063_v53 }
0x12a2   : > { %2151 = vmatpush1.bf16.msra.mxu1 %v3033_v7 }
0x12a3   : > { %2152 = vmatprep.subr.bf16.mxu1 %v3038_v12 }
0x12a6   : > { %2153 = vmatpush1.bf16.msra.mxu1 %v3036_v8 }
0x12a7   : > { %2154 = vmatprep.subr.bf16.mxu1 %v3041_v11 }
0x12aa   : > { %2155 = vmatpush1.bf16.msra.mxu1 %v3039_v17  ;;  %v458_v17 = vld [vmem:[%s3952_s9 + $0x8] sm:$0x7] }
0x12ab   : > { %2156 = vmatprep.subr.bf16.mxu1 %v3044_v13  ;;  %v2395_v26 = vrot.slane %v458_v17, %v3593_v59 }
0x12ae   : > { %2157 = vmatpush1.bf16.msra.mxu1 %v3042_v14  ;;  %v2230_v14 = vrot.slane %v458_v17, %v3417_v16 }
0x12af   : > { %2158 = vmatprep.subr.bf16.mxu1 %v3047_v57 }
0x12b2   : > { %2159 = vmatpush1.bf16.msra.mxu1 %v3045_v18 }
0x12b3   : > { %2160 = vmatprep.subr.bf16.mxu1 %v3050_v19 }
0x12b6   : > { %2161 = vmatpush1.bf16.msra.mxu1 %v3048_v20 }
0x132c   : > { %v2004_v61 = vpop.xlane.xlu0 %2003 }
0x132d   : > { %v2007_v25 = vmul.f32 0.0078125, %v2004_v61 }
0x132e   : > { %v2006_v63 = vpop.xlane.xlu1 %2005 }
0x132f   : > { %v3778_v0 = vsub.f32 %v2001_v54, %v2007_v25  ;;  %v2008_v2 = vmul.f32 0.0078125, %v2006_v63  ;;  %v3064_v54 = vld [vmem:[%s3951_s8 + $0x30] sm:$0xff]  }
0x1330   : > { %2711 = vmatpush3.bf16.msra.mxu0 %v3064_v54 }
0x1331   : > { %v3780_v3 = vsub.f32 %v2002_v55, %v2008_v2  ;;  %v2011_v4 = vmul.f32 %v3778_v0, %v3778_v0  ;;  %v3066_v55 = vld [vmem:[%s3951_s8 + $0x38] sm:$0xff]   ;;  %2712 = vmatprep.subr.bf16.mxu0 %v3065_v49 }
0x1333   : > { %2013 = vadd.xlane.f32.xlu0 %v2011_v4  ;;  %v2012_v5 = vmul.f32 %v3780_v3, %v3780_v3 }
0x1334   : > { %2713 = vmatpush3.bf16.msra.mxu0 %v3066_v55 }
0x1337   : > { %2015 = vadd.xlane.f32.xlu0 %v2012_v5 }
0x13c0   : > { %v2014_v37 = vpop.xlane.xlu0 %2013 }
0x13c1   : > { %v2017_v9 = vmul.f32 0.0078125, %v2014_v37 }
0x13c3   : > { %v2019_v10 = vadd.f32 1e-05, %v2017_v9 }
0x13c4   : > { %v2016_v40 = vpop.xlane.xlu0 %2015 }
0x13c5   : > { %3135 = vrsqrt.f32 %v2019_v10  ;;  %v2018_v1 = vmul.f32 0.0078125, %v2016_v40 }
0x13c7   : > { %v2020_v41 = vadd.f32 1e-05, %v2018_v1 }
0x13c9   : > { %3137 = vrsqrt.f32 %v2020_v41 }
0x13cf   : > { %v3136_v27 = vpop.eup %3135 }
0x13d0   : > { %v2023_v42 = vmul.f32 %v3136_v27, %v3778_v0 }
0x13d2   : > { %v2029_v48 = vmul.f32 %v2028_v43, %v2023_v42  ;;  %v2401_v42 = vrot.slane %v458_v17, %v1251_v38 }
0x13d3   : > { %v3138_v45 = vpop.eup %3137 }
0x13d4   : > { %v2024_v47 = vmul.f32 %v3138_v45, %v3780_v3  ;;  %v2035_v39 = vadd.f32 %v2034_v46, %v2029_v48 }
0x13d6   : > { %v2030_v36 = vmul.f32 %v2028_v43, %v2024_v47 }
0x13d8   : > { %v2036_v50 = vadd.f32 %v2034_v46, %v2030_v36 }
0x13da   : > { %v2037_v51 = vpack.c.bf16 %v2036_v50, %v2035_v39 }
0x13dc   : > { %2179 = vmatmul.mubr.bf16.vlgmr.msra.gmra.mrb[52].mxu1 %v2037_v51 }
0x14af   : > { %v2180_v60 = vpop.f32.mrb[52].mxu1 }
0x14b0   : > { %v2181_v61 = vadd.f32 %v2180_v60, %v2059_v58  ;;  %v2182_v25 = vpop.f32.mrb[53].mxu1 }
0x14b1   : > { %v2183_v63 = vadd.f32 %v2182_v25, %v2063_v62  ;;  %v2184_v0 = vpop.f32.mrb[54].mxu1 }
0x14b2   : > { %v2185_v2 = vadd.f32 %v2184_v0, %v2059_v58  ;;  %v2186_v3 = vpop.f32.mrb[55].mxu1  ;;  %v2189_v5 = vmax.f32 %v2181_v61, 0.0 }
0x14b3   : > { %v2187_v4 = vadd.f32 %v2186_v3, %v2063_v62  ;;  %v2190_v7 = vmax.f32 %v2183_v63, 0.0 }
0x14b4   : > { %v2191_v6 = vmax.f32 %v2185_v2, 0.0 }
0x14b5   : > { %v2192_v12 = vmax.f32 %v2187_v4, 0.0 }
0x14b6   : > { %v2193_v8 = vpack.c.bf16 %v2191_v6, %v2189_v5 }
0x14b7   : > { %v2194_v11 = vpack.c.bf16 %v2192_v12, %v2190_v7 }
0x14b9   : > { %2359 = vmatprep.mubr.bf16.mxu0 %v2194_v11 }
0x14ba   : > { %2360 = vmatmul.mubr.bf16.vlgmr.msra.gmra.mrb[28].mxu0 %v2193_v8 }
0x158d   : > { %v2714_v13 = vpop.f32.mrb[28].mxu0 }
0x158e   : > { %v2715_v57 = vpop.f32.mrb[29].mxu0 }
0x158f   : > { %v2716_v18 = vadd.f32 %v2715_v57, %v2714_v13  ;;  %v2717_v19 = vpop.f32.mrb[30].mxu0 }
0x1590   : > { %v2718_v20 = vpop.f32.mrb[31].mxu0 }
0x1591   : > { %v2362_v21 = vadd.f32 %v2716_v18, %v2230_v14  ;;  %v2719_v22 = vadd.f32 %v2718_v20, %v2717_v19 }
0x1593   : > { %v2365_v23 = vadd.f32 %v2719_v22, %v2230_v14  ;;  %v2368_v24 = vadd.f32 %v2362_v21, %v2035_v39 }
0x1595   : > { %2370 = vadd.xlane.f32.xlu0 %v2368_v24  ;;  %v2369_v28 = vadd.f32 %v2365_v23, %v2036_v50 }
0x1597   : > { %2372 = vadd.xlane.f32.xlu1 %v2369_v28 }
0x1622   : > { %v2371_v29 = vpop.xlane.xlu0 %2370 }
0x1623   : > { %v2374_v30 = vmul.f32 0.0078125, %v2371_v29 }
0x1624   : > { %v2373_v31 = vpop.xlane.xlu1 %2372 }
0x1625   : > { %v2376_v32 = vsub.f32 %v2368_v24, %v2374_v30  ;;  %v2375_v33 = vmul.f32 0.0078125, %v2373_v31 }
0x1627   : > { %v2377_v34 = vsub.f32 %v2369_v28, %v2375_v33  ;;  %v2378_v35 = vmul.f32 %v2376_v32, %v2376_v32 }
0x1629   : > { %2380 = vadd.xlane.f32.xlu0 %v2378_v35  ;;  %v2379_v16 = vmul.f32 %v2377_v34, %v2377_v34 }
0x162b   : > { %2382 = vadd.xlane.f32.xlu1 %v2379_v16 }
0x16b6   : > { %v2381_v37 = vpop.xlane.xlu0 %2380 }
0x16b7   : > { %v2384_v9 = vmul.f32 0.0078125, %v2381_v37 }
0x16b8   : > { %v2383_v10 = vpop.xlane.xlu1 %2382 }
0x16b9   : > { %v2386_v40 = vadd.f32 1e-05, %v2384_v9  ;;  %v2385_v1 = vmul.f32 0.0078125, %v2383_v10 }
0x16bb   : > { %3139 = vrsqrt.f32 %v2386_v40  ;;  %v2387_v41 = vadd.f32 1e-05, %v2385_v1 }
0x16bd   : > { %3141 = vrsqrt.f32 %v2387_v41 }
0x16c5   : > { %v3140_v27 = vpop.eup %3139 }
0x16c6   : > { %v2390_v43 = vmul.f32 %v3140_v27, %v2376_v32 }
0x16c7   : > { %v3142_v44 = vpop.eup %3141 }
0x16c8   : > { %v2396_v45 = vmul.f32 %v2395_v26, %v2390_v43  ;;  %v2391_v47 = vmul.f32 %v3142_v44, %v2377_v34 }
0x16ca   : > { %v2397_v48 = vmul.f32 %v2395_v26, %v2391_v47  ;;  %v2402_v46 = vadd.f32 %v2401_v42, %v2396_v45 }
0x16cc   : > { %v2403_v15 = vadd.f32 %v2401_v42, %v2397_v48  ;;  %2404 = vst [vmem:[%s434_s28] sm:$0xff] %v2402_v46 }
0x16ce   : > { %2405 = vst [vmem:[%s434_s28 + $0x8] sm:$0xff] %v2403_v15 }
0x16cf   : > { %3157 = shalt.err (!%p3154_p5)
}
0x16d0   : > { %s3158_s26 = scalar_lea.hbm %s3893_s15, 256  ;;  %s3162_s14 = scalar_lea.hbm %s3954_s11, 512 }
0x16d1   : > { %p3159_p6 = scmp.ne.s32.totalorder %s3893_s15, %s3158_s26  ;;  %p3163_p10 = scmp.lt.u32.totalorder %s3893_s15, %s3954_s11 }
0x16d2   : > { %p3164_p11 = scmp.lt.u32.totalorder %s3162_s14, %s3158_s26  ;;  %p3166_p13 = scmp.lt.u32.totalorder %s3158_s26, %s3893_s15 }
0x16d3   : > { %p3160_p7 = pnand %p3159_p6, %p3333_p4 }
0x16d4   : > { %p3165_p12 = por %p3164_p11, %p3163_p10 }
0x16d5   : > { %p3161_p9 = pneg %p3160_p7 }
0x16d6   : > { %p3167_p0 = por %p3166_p13, %p3165_p12 }
0x16d8   : > { %p3168_p1 = pnand %p3167_p0, %p3161_p9 }
0x16da   : > { %3171 = shalt.err (!%p3168_p1)
}
0x16db   : > { %s3231_s20 = smov 128   ;;  %s3232_s23 = smov 8  }
0x16dc   : > { %2896 = dma.vmem_to_hbm [thread:$0]  (%p3333_p4), %s3895_s13, 256, %s3893_s15, %s3897_s12, %s3231_s20, %s3231_s20, %s3232_s23  }
0x16dd PF: > { %p2902_p2 = scmp.ge.s32.totalorder %s3222_s22, 2  ;;  %s2437_s28 = sand.u32 1, %s3202_s17  }
0x16de   : > { %s2438_s26 = scalar_lea.sflag [#allocation3], %s2437_s28 }
0x16df   : > { %p2899_p3 = pnand %p2902_p2, %p3340_p8 }
0x16e1   : > { %3197 = dma.done.wait (!%p2899_p3), %s2438_s26, 256  }
0x16e2   : > { %3199 = vsyncadd (!%p2899_p3), %s2438_s26, 4294967040  ;;  %s24_s22 = sadd.s32 1, %s3222_s22   ;;  %s3965_s27 = sld [smem:[#allocation5_spill]] }
0x16e3   : > { %p21_p5 = scmp.ge.s32.totalorder %s24_s22, 4   ;;  %s3966_s17 = smov %s3206_s18 }
0x16e4   : > { %s3967_s18 = smov %s3210_s19  ;;  %s3968_s19 = smov %s3346_s30 }
0x16e5   : > { %s3969_s20 = smov %s3218_s21  ;;  %23 = sbr.rel (!%p21_p5) target bundleno = 4 (0x4), region = 105 }
0x16e8   : > { %s3970_s21 = smov %s3965_s27 }
0x16ec   :  { %2443 = vsyncpa [#allocation3], 1 }
0x16ed   :  { %2445 = vsyncpa [#allocation3 + $0x1], 1 }

// kernel: transformer_decoder.2
= control target key start
LH: loop header
LB: loop body
LE: loop exit
PB: predicated region body
PF: predicated region fallthrough
CT: control target
= control target key end

     0   :  { %s4175_s0 = inlined_call_operand.vmem [shape: f32[2,16,128], index: 0, kind: input, shape index: {}]   ;;  %s4176_s1 = inlined_call_operand.vmem [shape: bf16[2,16,256], index: 1, kind: input, shape index: {}]   ;;  %s4177_s2 = inlined_call_operand.vmem [shape: bf16[2,16,256], index: 2, kind: input, shape index: {}]   ;;  %s4178_s3 = inlined_call_operand.hbm [shape: bf16[128,128], index: 3, kind: input, shape index: {}]   ;;  %s4179_s4 = inlined_call_operand.hbm [shape: bf16[128,128], index: 4, kind: input, shape index: {}]   ;;  %s4180_s5 = inlined_call_operand.hbm [shape: bf16[128,128], index: 5, kind: input, shape index: {}]   ;;  %s4181_s6 = inlined_call_operand.hbm [shape: bf16[128,128], index: 6, kind: input, shape index: {}]   ;;  %s4182_s7 = inlined_call_operand.vmem [shape: bf16[128,256], index: 7, kind: input, shape index: {}]   ;;  %s4183_s8 = inlined_call_operand.vmem [shape: bf16[256,128], index: 8, kind: input, shape index: {}]   ;;  %s4184_s9 = inlined_call_operand.hbm [shape: f32[11,128], index: 9, kind: input, shape index: {}]   ;;  %s4185_s10 = inlined_call_operand.vmem [shape: f32[1,256], index: 10, kind: input, shape index: {}]   ;;  %s4186_s11 = inlined_call_operand.vmem [shape: f32[2,16,128], index: 11, kind: output, shape index: {}]  }
   0x1   :  { %4191 = sst [smem:[#allocation14_spill]] %s4179_s4 }
   0x2   :  { %4192 = sst [smem:[#allocation15_spill]] %s4186_s11 }
   0x3   :  { %16 = vsyncpa [#allocation3], 0 }
   0x4   :  { %17 = vsyncpa [#allocation5], 0 }
   0x5   :  { %18 = vsyncpa [#allocation8], 0  ;;  %s3550_s17 = smov 0   ;;  %s3552_s18 = smov 0  }
   0x6   :  { %s3554_s19 = smov 0  }
   0x7 LB: > { %4193 = sst [smem:[#allocation13_spill]] %s3473_s19  ;;  %s2650_s20 = sadd.s32 4294967295, %s3473_s19   ;;  %s3473_s19 = sphi %s3554_s19, %s24_s19   ;;  %s3469_s18 = sphi %s3552_s18, %s4206_s18   ;;  %s3465_s17 = sphi %s3550_s17, %s4205_s17  }
   0x8   : > { %p2652_p0 = scmp.ge.s32.totalorder %s3473_s19, 1  ;;  %p317_p1 = scmp.lt.s32.totalorder %s3473_s19, 3 }
   0x9   : > { %p3568_p2 = scmp.eq.s32.totalorder %s2650_s20, 0  ;;  %s3475_s23 = smov [#allocation4]  }
   0xa   : > { %p3572_p3 = pnand %p2652_p0, %p317_p1  ;;  %s342_s24 = sshll.u32 %s3475_s23, 4  ;;  %s3576_s24 = int_to_ptr.vmem [resolvable:$true] %s342_s24 }
   0xb   : > { %s4194_s21 = scalar_select %p3568_p2, 1, 0 }
   0xc   : > { %s4195_s22 = scalar_select %p3572_p3, 1, 0 }
   0xd   : > { %p3049_p4 = pneg %p3572_p3  ;;  %s3476_s25 = smov [#allocation7]  }
   0xe   : > { %s368_s26 = sshll.u32 %s3476_s25, 4  ;;  %s4197_s4 = sld [smem:[#allocation14_spill]]  ;;  %s3580_s26 = int_to_ptr.vmem [resolvable:$true] %s368_s26 }
   0xf   : > { %p3584_p5 = pnand %p3568_p2, %p3049_p4 }
  0x11   : > { %p3597_p7 = pneg %p3584_p5 }
  0x14   : > { %s3299_s12 = scalar_lea.hbm %s4197_s4, 1024 }
  0x15   : > { %p3300_p6 = scmp.ne.s32.totalorder %s4197_s4, %s3299_s12  ;;  %p3306_p10 = scmp.lt.u32.totalorder %s3299_s12, %s4197_s4 }
  0x17   : > { %p3302_p8 = pnand %p3597_p7, %p3300_p6 }
  0x19   : > { %p3303_p9 = pneg %p3302_p8 }
  0x1b   : > { %p3308_p11 = pnand %p3306_p10, %p3303_p9 }
  0x1d   : > { %3311 = shalt.err (!%p3308_p11)
}
  0x1e   : > { %s3312_s23 = scalar_lea.vmem %s3576_s24, 1024  ;;  %p3320_p1 = scmp.lt.s32.totalorder %s3576_s24, %s3576_s24 }
  0x1f   : > { %p3313_p12 = scmp.ne.s32.totalorder %s3576_s24, %s3312_s23  ;;  %p3321_p4 = scmp.lt.s32.totalorder %s3312_s23, %s3312_s23 }
  0x21   : > { %p3315_p13 = pnand %p3313_p12, %p3597_p7  ;;  %p3322_p6 = por %p3321_p4, %p3320_p1 }
  0x23   : > { %p3316_p0 = pneg %p3315_p13 }
  0x25   : > { %p3323_p8 = pnand %p3322_p6, %p3316_p0 }
  0x27   : > { %3326 = shalt.err (!%p3323_p8)
}
  0x28   : > { %s3477_s25 = smov 64   ;;  %s3478_s29 = smov 4  }
  0x29   : > { %3055 = dma.hbm_to_vmem [thread:$0]  (!%p3584_p5), %s4197_s4, 1024, %s3576_s24, [#allocation5], %s3477_s25, %s3477_s25, %s3478_s29  }
  0x2a   : > { %s3327_s16 = scalar_lea.hbm %s4181_s6, 1024 }
  0x2b   : > { %p3328_p9 = scmp.ne.s32.totalorder %s4181_s6, %s3327_s16  ;;  %p3334_p12 = scmp.lt.u32.totalorder %s3327_s16, %s4181_s6 }
  0x2d   : > { %p3330_p10 = pnand %p3328_p9, %p3597_p7 }
  0x2f   : > { %p3331_p11 = pneg %p3330_p10 }
  0x31   : > { %p3336_p13 = pnand %p3334_p12, %p3331_p11 }
  0x33   : > { %3339 = shalt.err (!%p3336_p13)
}
  0x34   : > { %s3340_s24 = scalar_lea.vmem %s3580_s26, 1024  ;;  %p3348_p6 = scmp.lt.s32.totalorder %s3580_s26, %s3580_s26 }
  0x35   : > { %p3341_p0 = scmp.ne.s32.totalorder %s3580_s26, %s3340_s24  ;;  %p3349_p8 = scmp.lt.s32.totalorder %s3340_s24, %s3340_s24 }
  0x37   : > { %p3343_p1 = pnand %p3341_p0, %p3597_p7  ;;  %p3350_p9 = por %p3349_p8, %p3348_p6 }
  0x39   : > { %p3344_p4 = pneg %p3343_p1 }
  0x3b   : > { %p3351_p10 = pnand %p3350_p9, %p3344_p4 }
  0x3d   : > { %3354 = shalt.err (!%p3351_p10)
}
  0x3e   : > { %3061 = dma.hbm_to_vmem [thread:$0]  (!%p3584_p5), %s4181_s6, 1024, %s3580_s26, [#allocation8], %s3477_s25, %s3477_s25, %s3478_s29  }
  0x3f   : > { %s4199_s30 = sadd.s32 1, %s3469_s18  ;;  %s3479_s12 = smov [#allocation2]  }
  0x40   : > { %p38_p11 = scmp.ge.s32.totalorder %s4199_s30, 2  ;;  %s329_s13 = sshll.u32 %s3479_s12, 4  ;;  %s330_s13 = int_to_ptr.vmem [resolvable:$true] %s329_s13 }
  0x41   : > { %s4200_s14 = smov %s4199_s30  ;;  %s3480_s16 = smov [#allocation6]  }
  0x42   : > { %s4208_s14 = smov (%p38_p11, %s4200_s14), 0  ;;  %s355_s20 = sshll.u32 %s3480_s16, 4  ;;  %s356_s20 = int_to_ptr.vmem [resolvable:$true] %s355_s20 }
  0x43   : > { %s3355_s4 = scalar_lea.hbm %s4178_s3, 1024 }
  0x44   : > { %p3356_p12 = scmp.ne.s32.totalorder %s4178_s3, %s3355_s4  ;;  %p3362_p1 = scmp.lt.u32.totalorder %s3355_s4, %s4178_s3 }
  0x46   : > { %p3358_p13 = pnand %p3356_p12, %p3597_p7 }
  0x48   : > { %p3359_p0 = pneg %p3358_p13 }
  0x4a   : > { %p3364_p4 = pnand %p3362_p1, %p3359_p0 }
  0x4c   : > { %3367 = shalt.err (!%p3364_p4)
}
  0x4d   : > { %s3368_s30 = scalar_lea.vmem %s330_s13, 1024  ;;  %p3376_p10 = scmp.lt.s32.totalorder %s330_s13, %s330_s13 }
  0x4e   : > { %p3369_p6 = scmp.ne.s32.totalorder %s330_s13, %s3368_s30  ;;  %p3377_p11 = scmp.lt.s32.totalorder %s3368_s30, %s3368_s30 }
  0x50   : > { %p3371_p8 = pnand %p3369_p6, %p3597_p7  ;;  %p3378_p2 = por %p3377_p11, %p3376_p10 }
  0x52   : > { %p3372_p9 = pneg %p3371_p8 }
  0x54   : > { %p3379_p3 = pnand %p3378_p2, %p3372_p9 }
  0x56   : > { %3382 = shalt.err (!%p3379_p3)
}
  0x57   : > { %3052 = dma.hbm_to_vmem [thread:$0]  (!%p3584_p5), %s4178_s3, 1024, %s330_s13, [#allocation3], %s3477_s25, %s3477_s25, %s3478_s29  }
  0x58   : > { %s3383_s23 = scalar_lea.hbm %s4180_s5, 1024 }
  0x59   : > { %p3384_p2 = scmp.ne.s32.totalorder %s4180_s5, %s3383_s23  ;;  %p3390_p13 = scmp.lt.u32.totalorder %s3383_s23, %s4180_s5 }
  0x5b   : > { %p3386_p3 = pnand %p3384_p2, %p3597_p7 }
  0x5d   : > { %p3387_p12 = pneg %p3386_p3 }
  0x5f   : > { %p3392_p0 = pnand %p3390_p13, %p3387_p12 }
  0x61   : > { %3395 = shalt.err (!%p3392_p0)
}
  0x62   : > { %s3396_s30 = scalar_lea.vmem %s356_s20, 1024  ;;  %p3404_p8 = scmp.lt.s32.totalorder %s356_s20, %s356_s20 }
  0x63   : > { %p3397_p1 = scmp.ne.s32.totalorder %s356_s20, %s3396_s30  ;;  %p3405_p9 = scmp.lt.s32.totalorder %s3396_s30, %s3396_s30 }
  0x65   : > { %p3399_p4 = pnand %p3397_p1, %p3597_p7  ;;  %p3406_p10 = por %p3405_p9, %p3404_p8 }
  0x67   : > { %p3400_p6 = pneg %p3399_p4 }
  0x69   : > { %p3407_p11 = pnand %p3406_p10, %p3400_p6 }
  0x6b   : > { %3410 = shalt.err (!%p3407_p11)
}
  0x6c   : > { %3058 = dma.hbm_to_vmem [thread:$0]  (!%p3584_p5), %s4180_s5, 1024, %s356_s20, [#allocation5], %s3477_s25, %s3477_s25, %s3478_s29  }
  0x6d   : > { %s3481_s4 = smov [#allocation9]   ;;  %s3411_s24 = scalar_lea.hbm %s4184_s9, 256 }
  0x6e   : > { %s387_s12 = sshll.u32 %s3481_s4, 4  ;;  %p3412_p2 = scmp.ne.s32.totalorder %s4184_s9, %s3411_s24  ;;  %s388_s12 = int_to_ptr.vmem [resolvable:$true] %s387_s12 }
  0x6f   : > { %p3418_p13 = scmp.lt.u32.totalorder %s3411_s24, %s4184_s9 }
  0x70   : > { %p3414_p3 = pnand %p3412_p2, %p3597_p7 }
  0x72   : > { %p3415_p12 = pneg %p3414_p3 }
  0x74   : > { %p3420_p0 = pnand %p3418_p13, %p3415_p12 }
  0x76   : > { %3423 = shalt.err (!%p3420_p0)
}
  0x77   : > { %s3424_s25 = scalar_lea.vmem %s388_s12, 256  ;;  %p3432_p8 = scmp.lt.s32.totalorder %s388_s12, %s388_s12 }
  0x78   : > { %p3425_p1 = scmp.ne.s32.totalorder %s388_s12, %s3424_s25  ;;  %p3433_p9 = scmp.lt.s32.totalorder %s3424_s25, %s3424_s25 }
  0x7a   : > { %p3427_p4 = pnand %p3425_p1, %p3597_p7  ;;  %p3434_p10 = por %p3433_p9, %p3432_p8 }
  0x7c   : > { %p3428_p6 = pneg %p3427_p4 }
  0x7e   : > { %p3435_p11 = pnand %p3434_p10, %p3428_p6 }
  0x80   : > { %3438 = shalt.err (!%p3435_p11)
}
  0x81   : > { %s3482_s29 = smov 128   ;;  %s3483_s20 = smov 8  }
  0x82   : > { %3064 = dma.hbm_to_vmem [thread:$0]  (!%p3584_p5), %s4184_s9, 256, %s388_s12, [#allocation8], %s3482_s29, %s3482_s29, %s3483_s20  }
  0x83   : > { %p4201_p2 = scmp.ne.s32.totalorder %s4195_s22, 0 }
  0x84   : > { %p4202_p3 = scmp.ne.s32.totalorder (!%p4201_p2), %s4194_s21, 0 }
  0x85   : > { %435 = sbr.rel (%p4201_p2) target bundleno = 5970 (0x1752), region = 64 }
  0x8c   : > { %3452 = dma.done.wait (%p4202_p3), [#allocation3], 1024  }
  0x8d   : > { %3454 = vsyncadd (%p4202_p3), [#allocation3], 4294966272 }
  0x8e   : > { %3456 = dma.done.wait (%p4202_p3), [#allocation5], 2048  }
  0x8f   : > { %3458 = vsyncadd (%p4202_p3), [#allocation5], 4294965248 }
  0x90   : > { %3460 = dma.done.wait (%p4202_p3), [#allocation8], 1280  }
  0x91   : > { %3462 = vsyncadd (%p4202_p3), [#allocation8], 4294966016  ;;  %v3484_v0 = vmov 0.0   ;;  %vm3485_vm0 = vmmov 0   ;;  %v3144_v1 = vld [vmem:[#allocation2] sm:$0xff]   ;;  %p510_p5 = scmp.lt.s32.totalorder %s3465_s17, 1  ;;  %v546_v14 = vlaneseq }
  0x92   : > { %2853 = vmatprep.subr.bf16.mxu0 %v3484_v0  ;;  %2869 = vmatprep.mubr.msk.bf16.mxu0 %vm3485_vm0, %v3484_v0  ;;  %v3145_v2 = vld [vmem:[#allocation2 + $0x8] sm:$0xff]   ;;  %v3146_v3 = vld [vmem:[#allocation2 + $0x10] sm:$0xff]   ;;  %v3147_v4 = vld [vmem:[#allocation2 + $0x18] sm:$0xff]   ;;  %vm673_vm1 = vcmask 261120   ;;  %vm723_vm3 = vcmask 130048   ;;  %s3486_s16 = smov 96  }
  0x93   : > { %2873 = vmatprep.subr.bf16.mxu1 %v3484_v0  ;;  %2875 = vmatprep.mubr.msk.bf16.mxu1 %vm3485_vm0, %v3484_v0  ;;  %s4210_s17 = smov (!%p510_p5, %s3465_s17), 1  ;;  %v3148_v5 = vld [vmem:[#allocation2 + $0x20] sm:$0xff]   ;;  %v3149_v6 = vld [vmem:[#allocation2 + $0x28] sm:$0xff]   ;;  %v3150_v7 = vld [vmem:[#allocation2 + $0x30] sm:$0xff]   ;;  %v3769_v15 = vshrl.u32 %v546_v14, 7  ;;  %v3784_v26 = vand.u32 127, %v546_v14 }
  0x94   : > { %2854 = vmatpush3.bf16.msra.mxu0 %v3144_v1  ;;  %s3737_s21 = sshll.u32 %s4210_s17, 4  ;;  %v3151_v8 = vld [vmem:[#allocation2 + $0x38] sm:$0xff]   ;;  %v3774_v17 = vld [vmem:[#allocation9] sm:$0xff]  ;;  %s3487_s23 = smov 64   ;;  %vm1191_vm5 = vcmask 523264   ;;  %vm1194_vm6 = vcmask 785408  }
  0x95   : > { %2855 = vmatprep.subr.bf16.mxu0 %v3484_v0  ;;  %s517_s15 = scalar_lea.vmem %s4175_s0, %s3737_s21  ;;  %s3761_s12 = scalar_lea.vmem %s4176_s1, %s3737_s21  ;;  %v3772_v16 = vsub.s32 0, %v3769_v15  ;;  %v3787_v27 = vadd.s32 8, %v3769_v15  ;;  %vm554_vm2 = vcmp.le.s32.totalorder %v3784_v26, %v3769_v15 }
  0x96   : > { %v3747_v9 = vld [vmem:[%s517_s15] sm:$0xff]  ;;  %v3749_v10 = vld [vmem:[%s517_s15 + $0x8] sm:$0xff]  ;;  %s3488_s24 = smov 32   ;;  %s3939_s28 = scalar_lea.vmem %s4177_s2, %s3737_s21 }
  0x97   : > { %v544_v11 = vpack.c.bf16 %v3749_v10, %v3747_v9  ;;  %v3764_v12 = vld [vmem:[%s3761_s12] ss:$8 sps:$4 sm:$0xff]   ;;  %v575_v18 = vrot.slane %v3774_v17, %v3772_v16  ;;  %vm555_vm4 = vcmp.le.s32.totalorder %v3784_v26, %v3787_v27  ;;  %v3808_v46 = vld [vmem:[%s3761_s12 + $0x4] ss:$8 sps:$4 sm:$0xff]  }
  0x98   : > { %2856 = vmatpush3.bf16.msra.mxu0 %v3145_v2  ;;  %v678_v13 = vsel %vm673_vm1, %v3764_v12, 0 }
  0x99   : > { %2857 = vmatprep.subr.bf16.mxu0 %v3484_v0  ;;  %2874 = vmatpush3.bf16.xpose.msra.mxu1 %v678_v13 }
  0x9a   : > { %2879 = vmatprep.subr.bf16.mxu1 %v3484_v0 }
  0x9c   : > { %2858 = vmatpush3.bf16.msra.mxu0 %v3146_v3 }
  0x9d   : > { %2859 = vmatprep.subr.bf16.mxu0 %v3484_v0 }
  0xa0   : > { %2860 = vmatpush3.bf16.msra.mxu0 %v3147_v4 }
  0xa1   : > { %2861 = vmatprep.subr.bf16.mxu0 %v3484_v0 }
  0xa4   : > { %2862 = vmatpush3.bf16.msra.mxu0 %v3148_v5 }
  0xa5   : > { %2863 = vmatprep.subr.bf16.mxu0 %v3484_v0 }
  0xa8   : > { %2864 = vmatpush3.bf16.msra.mxu0 %v3149_v6 }
  0xa9   : > { %2865 = vmatprep.subr.bf16.mxu0 %v3484_v0 }
  0xac   : > { %2866 = vmatpush3.bf16.msra.mxu0 %v3150_v7 }
  0xad   : > { %2867 = vmatprep.subr.bf16.mxu0 %v3484_v0 }
  0xb0   : > { %2868 = vmatpush3.bf16.msra.mxu0 %v3151_v8 }
  0xb1   : > { %2921 = vmatprep.subr.bf16.mxu0 %v3484_v0 }
  0xb3   : > { %2870 = vmatmul.mubr.bf16.vlgmr.msra.gmra.mrb[0].mxu0 %v544_v11 }
  0xb4   : > { %2937 = vmatprep.mubr.msk.bf16.mxu0 %vm3485_vm0, %v3484_v0 }
 0x186   : > { %v658_v19 = vpop.f32.mrb[0].mxu0 }
 0x187   : > { %v2871_v20 = vpop.f32.mrb[1].mxu0  ;;  %v659_v22 = vadd.f32 %v658_v19, %v575_v18 }
 0x188   : > { %v661_v21 = vpop.f32.mrb[2].mxu0 }
 0x189   : > { %v662_v23 = vadd.f32 %v661_v21, %v575_v18  ;;  %v2872_v24 = vpop.f32.mrb[3].mxu0 }
 0x18b   : > { %v3778_v25 = vpack.c.bf16 %v662_v23, %v659_v22 }
 0x18d   : > { %2876 = vmatmul.mubr.msk.bf16.vlgmr.msra.gmra.mrb[0].mxu1 %vm673_vm1, %v3778_v25 }
 0x18e   : > { %2881 = vmatprep.mubr.msk.bf16.mxu1 %vm3485_vm0, %v3484_v0  ;;  %2880 = vmatpush3.bf16.msra.mxu1 %v3808_v46 }
 0x18f   : > { %2885 = vmatprep.subr.bf16.mxu1 %v3484_v0 }
 0x260   : > { %v714_v28 = vpop.f32.mrb[0].mxu1 }
 0x261   : > { %v721_v29 = vsel %vm554_vm2, %v714_v28, -1e+30  ;;  %v2877_v30 = vpop.f32.mrb[1].mxu1 }
 0x262   : > { %v717_v31 = vpop.f32.mrb[2].mxu1  ;;  %v724_v32 = vsel %vm723_vm3, %v721_v29, -inf }
 0x263   : > { %v722_v33 = vsel %vm555_vm4, %v717_v31, -1e+30  ;;  %725 = vmax.xlane.f32.xlu0 %v724_v32  ;;  %v2878_v34 = vpop.f32.mrb[3].mxu1 }
 0x264   : > { %v727_v35 = vsel %vm723_vm3, %v722_v33, -inf }
 0x267   : > { %728 = vmax.xlane.f32.xlu0 %v727_v35 }
 0x27d   : > { %798 = vrot.lane.b32.xlu0 %v3764_v12, %s3486_s16 }
 0x2f0   : > { %v726_v36 = vpop.xlane.xlu0 %725 }
 0x2f1   : > { %v730_v37 = vsub.f32 %v721_v29, %v726_v36 }
 0x2f3   : > { %v732_v38 = vmul.f32 1.442695, %v730_v37 }
 0x2f4   : > { %v729_v39 = vpop.xlane.xlu0 %728 }
 0x2f5   : > { %3222 = vpow2.f32 %v732_v38  ;;  %v731_v40 = vsub.f32 %v722_v33, %v729_v39 }
 0x2f7   : > { %v734_v41 = vmul.f32 1.442695, %v731_v40 }
 0x2f8   : > { %v799_v51 = vpop.permute.xlu0 %798 }
 0x2f9   : > { %3224 = vpow2.f32 %v734_v41  ;;  %v804_v54 = vsel %vm673_vm1, %v799_v51, 0 }
 0x2ff   : > { %v3223_v42 = vpop.eup %3222 }
 0x300   : > { %v736_v43 = vsel %vm723_vm3, %v3223_v42, 0.0 }
 0x301   : > { %737 = vadd.xlane.f32.xlu1 %v736_v43 }
 0x303   : > { %v3225_v44 = vpop.eup %3224 }
 0x304   : > { %v739_v45 = vsel %vm723_vm3, %v3225_v44, 0.0 }
 0x305   : > { %740 = vadd.xlane.f32.xlu1 %v739_v45 }
 0x316   : > { %796 = vrot.lane.b32.xlu1 %v3778_v25, %s3486_s16 }
 0x38e   : > { %v738_v47 = vpop.xlane.xlu1 %737 }
 0x38f   : > { %3226 = vrcp.f32 %v738_v47 }
 0x392   : > { %v741_v48 = vpop.xlane.xlu1 %740 }
 0x393   : > { %3228 = vrcp.f32 %v741_v48 }
 0x396   : > { %v797_v56 = vpop.permute.xlu1 %796 }
 0x399   : > { %v3227_v49 = vpop.eup %3226 }
 0x39a   : > { %v744_v52 = vmul.f32 %v3227_v49, %v3223_v42 }
 0x39d   : > { %v3229_v50 = vpop.eup %3228 }
 0x39e   : > { %v745_v53 = vmul.f32 %v3229_v50, %v3225_v44 }
 0x3a0   : > { %v746_v55 = vpack.c.bf16 %v745_v53, %v744_v52 }
 0x3a2   : > { %2882 = vmatmul.mubr.msk.bf16.vlgmr.msra.gmra.mrb[4].mxu1 %vm723_vm3, %v746_v55 }
 0x3a3   : > { %2886 = vmatpush3.bf16.xpose.msra.mxu1 %v804_v54  ;;  %2887 = vmatprep.mubr.msk.bf16.mxu1 %vm3485_vm0, %v3484_v0 }
 0x3a4   : > { %2891 = vmatprep.subr.bf16.mxu1 %v3484_v0 }
 0x3aa   : > { %2888 = vmatmul.mubr.msk.bf16.vlgmr.msra.gmra.mrb[8].mxu1 %vm673_vm1, %v797_v56 }
 0x3ab   : > { %2893 = vmatprep.mubr.msk.bf16.mxu1 %vm3485_vm0, %v3484_v0 }
 0x475   : > { %v3820_v57 = vpop.f32.mrb[4].mxu1 }
 0x476   : > { %v2883_v58 = vpop.f32.mrb[5].mxu1 }
 0x477   : > { %v3822_v59 = vpop.f32.mrb[6].mxu1 }
 0x478   : > { %v2884_v60 = vpop.f32.mrb[7].mxu1 }
 0x47d   : > { %v840_v61 = vpop.f32.mrb[8].mxu1 }
 0x47e   : > { %v847_v62 = vsel %vm554_vm2, %v840_v61, -1e+30  ;;  %v2889_v63 = vpop.f32.mrb[9].mxu1 }
 0x47f   : > { %v843_v1 = vpop.f32.mrb[10].mxu1  ;;  %v849_v2 = vsel %vm723_vm3, %v847_v62, -inf }
 0x480   : > { %v848_v3 = vsel %vm555_vm4, %v843_v1, -1e+30  ;;  %850 = vmax.xlane.f32.xlu1 %v849_v2  ;;  %v2890_v4 = vpop.f32.mrb[11].mxu1 }
 0x481   : > { %v852_v5 = vsel %vm723_vm3, %v848_v3, -inf }
 0x482   : > { %853 = vmax.xlane.f32.xlu0 %v852_v5 }
 0x50d   : > { %v851_v6 = vpop.xlane.xlu1 %850 }
 0x50e   : > { %v855_v7 = vsub.f32 %v847_v62, %v851_v6 }
 0x50f   : > { %v854_v8 = vpop.xlane.xlu0 %853 }
 0x510   : > { %v857_v11 = vmul.f32 1.442695, %v855_v7  ;;  %v856_v13 = vsub.f32 %v848_v3, %v854_v8 }
 0x512   : > { %3230 = vpow2.f32 %v857_v11  ;;  %v859_v14 = vmul.f32 1.442695, %v856_v13 }
 0x514   : > { %3232 = vpow2.f32 %v859_v14 }
 0x51c   : > { %v3231_v18 = vpop.eup %3230 }
 0x51d   : > { %v861_v19 = vsel %vm723_vm3, %v3231_v18, 0.0 }
 0x51e   : > { %v3233_v20 = vpop.eup %3232  ;;  %862 = vadd.xlane.f32.xlu0 %v861_v19 }
 0x51f   : > { %v864_v21 = vsel %vm723_vm3, %v3233_v20, 0.0 }
 0x520   : > { %865 = vadd.xlane.f32.xlu1 %v864_v21 }
 0x531   : > { %921 = vrot.lane.b32.xlu1 %v3764_v12, %s3487_s23 }
 0x534   : > { %872 = vrot.lane.b32.xlu0 %v3808_v46, %s3486_s16 }
 0x535   : > { %919 = vrot.lane.b32.xlu1 %v3778_v25, %s3487_s23 }
 0x5ab   : > { %v863_v22 = vpop.xlane.xlu0 %862 }
 0x5ac   : > { %3234 = vrcp.f32 %v863_v22 }
 0x5ad   : > { %v866_v23 = vpop.xlane.xlu1 %865 }
 0x5ae   : > { %3236 = vrcp.f32 %v866_v23 }
 0x5af   : > { %v873_v24 = vpop.permute.xlu0 %872 }
 0x5b0   : > { %2892 = vmatpush3.bf16.msra.mxu1 %v873_v24 }
 0x5b1   : > { %2897 = vmatprep.subr.bf16.mxu1 %v3484_v0  ;;  %v922_v32 = vpop.permute.xlu1 %921 }
 0x5b2   : > { %v927_v33 = vsel %vm673_vm1, %v922_v32, 0 }
 0x5b5   : > { %v920_v35 = vpop.permute.xlu1 %919 }
 0x5b6   : > { %v3235_v28 = vpop.eup %3234 }
 0x5b7   : > { %v869_v30 = vmul.f32 %v3235_v28, %v3231_v18 }
 0x5b8   : > { %v3237_v29 = vpop.eup %3236 }
 0x5b9   : > { %v870_v31 = vmul.f32 %v3237_v29, %v3233_v20 }
 0x5bb   : > { %v871_v34 = vpack.c.bf16 %v870_v31, %v869_v30 }
 0x5bd   : > { %2894 = vmatmul.mubr.msk.bf16.vlgmr.msra.gmra.mrb[12].mxu1 %vm723_vm3, %v871_v34 }
 0x5be   : > { %2898 = vmatpush3.bf16.xpose.msra.mxu1 %v927_v33  ;;  %2899 = vmatprep.mubr.msk.bf16.mxu1 %vm3485_vm0, %v3484_v0 }
 0x5bf   : > { %2903 = vmatprep.subr.bf16.mxu1 %v3484_v0 }
 0x5c5   : > { %2900 = vmatmul.mubr.msk.bf16.vlgmr.msra.gmra.mrb[16].mxu1 %vm673_vm1, %v920_v35 }
 0x5c6   : > { %2905 = vmatprep.mubr.msk.bf16.mxu1 %vm3485_vm0, %v3484_v0 }
 0x690   : > { %v3849_v36 = vpop.f32.mrb[12].mxu1 }
 0x691   : > { %v2895_v37 = vpop.f32.mrb[13].mxu1 }
 0x692   : > { %v3851_v38 = vpop.f32.mrb[14].mxu1 }
 0x693   : > { %v3114_v39 = vpack.i.bf16 %v3851_v38, %v3849_v36  ;;  %v2896_v40 = vpop.f32.mrb[15].mxu1  ;;  %v3156_v36 = vld [vmem:[#allocation4 + $0x8] sm:$0xff]   ;;  %v3157_v38 = vld [vmem:[#allocation4 + $0x10] sm:$0xff]  }
 0x698   : > { %v963_v41 = vpop.f32.mrb[16].mxu1 }
 0x699   : > { %v970_v42 = vsel %vm554_vm2, %v963_v41, -1e+30  ;;  %v2901_v43 = vpop.f32.mrb[17].mxu1 }
 0x69a   : > { %v966_v44 = vpop.f32.mrb[18].mxu1  ;;  %v972_v45 = vsel %vm723_vm3, %v970_v42, -inf }
 0x69b   : > { %v971_v47 = vsel %vm555_vm4, %v966_v44, -1e+30  ;;  %973 = vmax.xlane.f32.xlu1 %v972_v45  ;;  %v2902_v48 = vpop.f32.mrb[19].mxu1 }
 0x69c   : > { %v975_v49 = vsel %vm723_vm3, %v971_v47, -inf }
 0x69d   : > { %976 = vmax.xlane.f32.xlu0 %v975_v49 }
 0x6ac   : > { %995 = vrot.lane.b32.xlu1 %v3808_v46, %s3487_s23 }
 0x6b0   : > { %1042 = vrot.lane.b32.xlu1 %v3778_v25, %s3488_s24 }
 0x728   : > { %v974_v50 = vpop.xlane.xlu1 %973 }
 0x729   : > { %v978_v51 = vsub.f32 %v970_v42, %v974_v50  ;;  %v3159_v50 = vld [vmem:[#allocation4 + $0x20] sm:$0xff]  }
 0x72a   : > { %v977_v52 = vpop.xlane.xlu0 %976 }
 0x72b   : > { %v980_v53 = vmul.f32 1.442695, %v978_v51  ;;  %v979_v54 = vsub.f32 %v971_v47, %v977_v52  ;;  %v3160_v51 = vld [vmem:[#allocation4 + $0x28] sm:$0xff]   ;;  %v3161_v52 = vld [vmem:[#allocation4 + $0x30] sm:$0xff]  }
 0x72c   : > { %v996_v55 = vpop.permute.xlu1 %995 }
 0x72d   : > { %3238 = vpow2.f32 %v980_v53  ;;  %v982_v56 = vmul.f32 1.442695, %v979_v54  ;;  %2904 = vmatpush3.bf16.msra.mxu1 %v996_v55  ;;  %v3162_v53 = vld [vmem:[#allocation4 + $0x38] sm:$0xff]  }
 0x72e   : > { %2909 = vmatprep.subr.bf16.mxu1 %v3484_v0 }
 0x72f   : > { %3240 = vpow2.f32 %v982_v56 }
 0x737   : > { %v3239_v58 = vpop.eup %3238 }
 0x738   : > { %v984_v60 = vsel %vm723_vm3, %v3239_v58, 0.0 }
 0x739   : > { %v3241_v61 = vpop.eup %3240  ;;  %985 = vadd.xlane.f32.xlu0 %v984_v60 }
 0x73a   : > { %v987_v62 = vsel %vm723_vm3, %v3241_v61, 0.0 }
 0x73d   : > { %988 = vadd.xlane.f32.xlu0 %v987_v62 }
 0x753   : > { %1044 = vrot.lane.b32.xlu0 %v3764_v12, %s3488_s24  ;;  %v1043_v12 = vpop.permute.xlu1 %1042 }
 0x7c6   : > { %v986_v25 = vpop.xlane.xlu0 %985 }
 0x7c7   : > { %3242 = vrcp.f32 %v986_v25 }
 0x7ca   : > { %v989_v63 = vpop.xlane.xlu0 %988 }
 0x7cb   : > { %3244 = vrcp.f32 %v989_v63 }
 0x7ce   : > { %v1045_v3 = vpop.permute.xlu0 %1044 }
 0x7cf   : > { %v1050_v6 = vsel %vm673_vm1, %v1045_v3, 0 }
 0x7d1   : > { %v3243_v1 = vpop.eup %3242 }
 0x7d2   : > { %v992_v4 = vmul.f32 %v3243_v1, %v3239_v58 }
 0x7d5   : > { %v3245_v2 = vpop.eup %3244 }
 0x7d6   : > { %v993_v5 = vmul.f32 %v3245_v2, %v3241_v61 }
 0x7d8   : > { %v994_v7 = vpack.c.bf16 %v993_v5, %v992_v4 }
 0x7da   : > { %2906 = vmatmul.mubr.msk.bf16.vlgmr.msra.gmra.mrb[20].mxu1 %vm723_vm3, %v994_v7 }
 0x7db   : > { %2910 = vmatpush3.bf16.xpose.msra.mxu1 %v1050_v6  ;;  %2911 = vmatprep.mubr.msk.bf16.mxu1 %vm3485_vm0, %v3484_v0 }
 0x7dc   : > { %2915 = vmatprep.subr.bf16.mxu1 %v3484_v0 }
 0x7e2   : > { %2912 = vmatmul.mubr.msk.bf16.vlgmr.msra.gmra.mrb[24].mxu1 %vm673_vm1, %v1043_v12 }
 0x7e3   : > { %2917 = vmatprep.mubr.msk.bf16.mxu1 %vm3485_vm0, %v3484_v0 }
 0x8ad   : > { %v1035_v8 = vpop.f32.mrb[20].mxu1 }
 0x8ae   : > { %v2907_v11 = vpop.f32.mrb[21].mxu1 }
 0x8af   : > { %v1038_v13 = vpop.f32.mrb[22].mxu1 }
 0x8b0   : > { %v3119_v14 = vpack.i.bf16 %v1038_v13, %v1035_v8  ;;  %v2908_v18 = vpop.f32.mrb[23].mxu1 }
 0x8b5   : > { %v1086_v19 = vpop.f32.mrb[24].mxu1 }
 0x8b6   : > { %v1093_v20 = vsel %vm554_vm2, %v1086_v19, -1e+30  ;;  %v2913_v21 = vpop.f32.mrb[25].mxu1 }
 0x8b7   : > { %v1089_v22 = vpop.f32.mrb[26].mxu1  ;;  %v1095_v23 = vsel %vm723_vm3, %v1093_v20, -inf }
 0x8b8   : > { %v1094_v24 = vsel %vm555_vm4, %v1089_v22, -1e+30  ;;  %1096 = vmax.xlane.f32.xlu1 %v1095_v23  ;;  %v2914_v28 = vpop.f32.mrb[27].mxu1 }
 0x8b9   : > { %v1098_v29 = vsel %vm723_vm3, %v1094_v24, -inf }
 0x8ba   : > { %1099 = vmax.xlane.f32.xlu0 %v1098_v29  ;;  %v3163_v29 = vld [vmem:[#allocation6] sm:$0xff]  }
 0x945   : > { %v1097_v30 = vpop.xlane.xlu1 %1096 }
 0x946   : > { %v1101_v31 = vsub.f32 %v1093_v20, %v1097_v30 }
 0x947   : > { %v1100_v32 = vpop.xlane.xlu0 %1099 }
 0x948   : > { %v1103_v33 = vmul.f32 1.442695, %v1101_v31  ;;  %v1102_v34 = vsub.f32 %v1094_v24, %v1100_v32 }
 0x94a   : > { %3246 = vpow2.f32 %v1103_v33  ;;  %v1105_v35 = vmul.f32 1.442695, %v1102_v34 }
 0x94c   : > { %3248 = vpow2.f32 %v1105_v35 }
 0x954   : > { %v3247_v37 = vpop.eup %3246 }
 0x955   : > { %v1107_v40 = vsel %vm723_vm3, %v3247_v37, 0.0 }
 0x956   : > { %v3249_v41 = vpop.eup %3248  ;;  %1108 = vadd.xlane.f32.xlu0 %v1107_v40 }
 0x957   : > { %v1110_v26 = vsel %vm723_vm3, %v3249_v41, 0.0 }
 0x958   : > { %1111 = vadd.xlane.f32.xlu1 %v1110_v26  ;;  %v3167_v26 = vld [vmem:[#allocation6 + $0x20] sm:$0xff]  }
 0x969   : > { %3115 = vrot.lane.b32.xlu1 %v3114_v39, %s3488_s24  ;;  %v3158_v39 = vld [vmem:[#allocation4 + $0x18] sm:$0xff]  }
 0x96c   : > { %1118 = vrot.lane.b32.xlu0 %v3808_v46, %s3488_s24  ;;  %v3155_v46 = vld [vmem:[#allocation4] sm:$0xff]  }
 0x96d   : > { %3120 = vrot.lane.b32.xlu1 %v3119_v14, %s3487_s23  ;;  %2922 = vmatpush3.bf16.msra.mxu0 %v3155_v46 }
 0x96e   : > { %2923 = vmatprep.subr.bf16.mxu0 %v3484_v0 }
 0x971   : > { %2924 = vmatpush3.bf16.msra.mxu0 %v3156_v36 }
 0x972   : > { %2925 = vmatprep.subr.bf16.mxu0 %v3484_v0 }
 0x975   : > { %2926 = vmatpush3.bf16.msra.mxu0 %v3157_v38  ;;  %v1334_v38 = vsub.s32 2, %v3769_v15 }
 0x976   : > { %2927 = vmatprep.subr.bf16.mxu0 %v3484_v0 }
 0x979   : > { %2928 = vmatpush3.bf16.msra.mxu0 %v3158_v39 }
 0x97a   : > { %2929 = vmatprep.subr.bf16.mxu0 %v3484_v0 }
 0x97d   : > { %2930 = vmatpush3.bf16.msra.mxu0 %v3159_v50 }
 0x97e   : > { %2931 = vmatprep.subr.bf16.mxu0 %v3484_v0 }
 0x981   : > { %2932 = vmatpush3.bf16.msra.mxu0 %v3160_v51  ;;  %v1335_v51 = vrot.slane %v3774_v17, %v1334_v38 }
 0x982   : > { %2933 = vmatprep.subr.bf16.mxu0 %v3484_v0 }
 0x985   : > { %2934 = vmatpush3.bf16.msra.mxu0 %v3161_v52  ;;  %v1340_v52 = vsub.s32 3, %v3769_v15 }
 0x986   : > { %2935 = vmatprep.subr.bf16.mxu0 %v3484_v0 }
 0x989   : > { %2936 = vmatpush3.bf16.msra.mxu0 %v3162_v53 }
 0x98a   : > { %2961 = vmatprep.subr.bf16.mxu0 %v3484_v0 }
 0x9e3   : > { %v1109_v27 = vpop.xlane.xlu0 %1108 }
 0x9e4   : > { %3250 = vrcp.f32 %v1109_v27  ;;  %v3168_v27 = vld [vmem:[#allocation6 + $0x28] sm:$0xff]  }
 0x9e5   : > { %v1112_v42 = vpop.xlane.xlu1 %1111 }
 0x9e6   : > { %3252 = vrcp.f32 %v1112_v42  ;;  %v3169_v42 = vld [vmem:[#allocation6 + $0x30] sm:$0xff]  }
 0x9e7   : > { %v1119_v43 = vpop.permute.xlu0 %1118 }
 0x9e8   : > { %2916 = vmatpush3.bf16.msra.mxu1 %v1119_v43  ;;  %v3170_v43 = vld [vmem:[#allocation6 + $0x38] sm:$0xff]  }
 0x9e9   : > { %2941 = vmatprep.subr.bf16.mxu1 %v3484_v0  ;;  %v3116_v61 = vpop.permute.xlu1 %3115 }
 0x9ea   : > { %v3118_v25 = vunpack.i.h.bf16 %v3116_v61  ;;  %v3117_v63 = vunpack.i.l.bf16 %v3116_v61 }
 0x9ec   : > { %v1190_v4 = vsel %vm673_vm1, %v3822_v59, %v3118_v25  ;;  %v1189_v5 = vsel %vm673_vm1, %v3820_v57, %v3117_v63  ;;  %v3921_v59 = vsub.s32 1, %v3769_v15  ;;  %v1363_v63 = vsub.s32 4, %v3769_v15 }
 0x9ed   : > { %v3121_v62 = vpop.permute.xlu1 %3120 }
 0x9ee   : > { %v3251_v44 = vpop.eup %3250  ;;  %v3123_v1 = vunpack.i.h.bf16 %v3121_v62  ;;  %v3122_v2 = vunpack.i.l.bf16 %v3121_v62  ;;  %v1217_v57 = vrot.slane %v3774_v17, %v3921_v59 }
 0x9ef   : > { %v1115_v47 = vmul.f32 %v3251_v44, %v3247_v37  ;;  %v3171_v44 = vld [vmem:[%s3939_s28] ss:$8 sps:$4 sm:$0xff]  }
 0x9f0   : > { %v3253_v45 = vpop.eup %3252  ;;  %v1192_v12 = vsel %vm1191_vm5, %v1189_v5, %v3122_v2  ;;  %v1193_v8 = vsel %vm1191_vm5, %v1190_v4, %v3123_v1  ;;  %v1466_v25 = vsel %vm673_vm1, %v3171_v44, 0  ;;  %v1364_v1 = vrot.slane %v3774_v17, %v1363_v63 }
 0x9f1   : > { %v1116_v48 = vmul.f32 %v3253_v45, %v3249_v41  ;;  %v3164_v41 = vld [vmem:[#allocation6 + $0x8] sm:$0xff]  }
 0x9f3   : > { %v1117_v49 = vpack.c.bf16 %v1116_v48, %v1115_v47 }
 0x9f5   : > { %2918 = vmatmul.mubr.msk.bf16.vlgmr.msra.gmra.mrb[28].mxu1 %vm723_vm3, %v1117_v49 }
 0x9f6   : > { %2957 = vmatprep.mubr.msk.bf16.mxu1 %vm3485_vm0, %v3484_v0  ;;  %2942 = vmatpush3.bf16.msra.mxu1 %v3163_v29 }
 0x9f7   : > { %2943 = vmatprep.subr.bf16.mxu1 %v3484_v0 }
 0x9fa   : > { %2944 = vmatpush3.bf16.msra.mxu1 %v3164_v41 }
 0x9fb   : > { %2945 = vmatprep.subr.bf16.mxu1 %v3484_v0 }
 0xac8   : > { %v1158_v54 = vpop.f32.mrb[28].mxu1 }
 0xac9   : > { %v2919_v55 = vpop.f32.mrb[29].mxu1 }
 0xaca   : > { %v1161_v56 = vpop.f32.mrb[30].mxu1 }
 0xacb   : > { %v3124_v58 = vpack.i.bf16 %v1161_v56, %v1158_v54  ;;  %v2920_v60 = vpop.f32.mrb[31].mxu1  ;;  %v1341_v56 = vrot.slane %v3774_v17, %v1340_v52 }
 0xacd   : > { %3125 = vrot.lane.b32.xlu1 %v3124_v58, %s3486_s16 }
 0xb3f   : > { %v3126_v3 = vpop.permute.xlu1 %3125 }
 0xb40   : > { %v3128_v6 = vunpack.i.h.bf16 %v3126_v3  ;;  %v3127_v7 = vunpack.i.l.bf16 %v3126_v3 }
 0xb42   : > { %v1196_v11 = vsel %vm1194_vm6, %v1193_v8, %v3128_v6  ;;  %v1195_v13 = vsel %vm1194_vm6, %v1192_v12, %v3127_v7 }
 0xb43   : > { %v1197_v14 = vpack.c.bf16 %v1196_v11, %v1195_v13 }
 0xb45   : > { %2938 = vmatmul.mubr.bf16.vlgmr.msra.gmra.mrb[4].mxu0 %v1197_v14 }
 0xb46   : > { %2963 = vmatprep.mubr.msk.bf16.mxu0 %vm3485_vm0, %v3484_v0  ;;  %2962 = vmatpush3.bf16.xpose.msra.mxu0 %v1466_v25 }
 0xb47   : > { %2973 = vmatprep.subr.bf16.mxu0 %v3484_v0 }
 0xc18   : > { %v1300_v18 = vpop.f32.mrb[4].mxu0 }
 0xc19   : > { %v1301_v19 = vadd.f32 %v1300_v18, %v1217_v57  ;;  %v2939_v20 = vpop.f32.mrb[5].mxu0 }
 0xc1a   : > { %v1303_v21 = vpop.f32.mrb[6].mxu0 }
 0xc1b   : > { %v1304_v22 = vadd.f32 %v1303_v21, %v1217_v57  ;;  %v2940_v23 = vpop.f32.mrb[7].mxu0  ;;  %v1307_v24 = vadd.f32 %v1301_v19, %v3747_v9  ;;  %v3165_v9 = vld [vmem:[#allocation6 + $0x10] sm:$0xff]  }
 0xc1c   : > { %2946 = vmatpush3.bf16.msra.mxu1 %v3165_v9 }
 0xc1d   : > { %1309 = vadd.xlane.f32.xlu0 %v1307_v24  ;;  %v1308_v28 = vadd.f32 %v1304_v22, %v3749_v10  ;;  %2947 = vmatprep.subr.bf16.mxu1 %v3484_v0  ;;  %v3166_v10 = vld [vmem:[#allocation6 + $0x18] sm:$0xff]  }
 0xc1f   : > { %1311 = vadd.xlane.f32.xlu1 %v1308_v28 }
 0xc20   : > { %2948 = vmatpush3.bf16.msra.mxu1 %v3166_v10 }
 0xc21   : > { %2949 = vmatprep.subr.bf16.mxu1 %v3484_v0 }
 0xc24   : > { %2950 = vmatpush3.bf16.msra.mxu1 %v3167_v26 }
 0xc25   : > { %2951 = vmatprep.subr.bf16.mxu1 %v3484_v0 }
 0xc28   : > { %2952 = vmatpush3.bf16.msra.mxu1 %v3168_v27 }
 0xc29   : > { %2953 = vmatprep.subr.bf16.mxu1 %v3484_v0 }
 0xc2c   : > { %2954 = vmatpush3.bf16.msra.mxu1 %v3169_v42 }
 0xc2d   : > { %2955 = vmatprep.subr.bf16.mxu1 %v3484_v0 }
 0xc30   : > { %2956 = vmatpush3.bf16.msra.mxu1 %v3170_v43 }
 0xc31   : > { %2967 = vmatprep.subr.bf16.mxu1 %v3484_v0 }
 0xcaa   : > { %v1310_v30 = vpop.xlane.xlu0 %1309 }
 0xcab   : > { %v1314_v31 = vmul.f32 0.0078125, %v1310_v30 }
 0xcac   : > { %v1312_v32 = vpop.xlane.xlu1 %1311 }
 0xcad   : > { %v1316_v33 = vsub.f32 %v1307_v24, %v1314_v31  ;;  %v1315_v34 = vmul.f32 0.0078125, %v1312_v32 }
 0xcaf   : > { %v1317_v35 = vsub.f32 %v1308_v28, %v1315_v34  ;;  %v1318_v37 = vmul.f32 %v1316_v33, %v1316_v33 }
 0xcb1   : > { %1320 = vadd.xlane.f32.xlu0 %v1318_v37  ;;  %v1319_v40 = vmul.f32 %v1317_v35, %v1317_v35 }
 0xcb5   : > { %1322 = vadd.xlane.f32.xlu0 %v1319_v40 }
 0xccb   : > { %1583 = vrot.lane.b32.xlu0 %v3171_v44, %s3486_s16 }
 0xccf   : > { %1825 = vrot.lane.b32.xlu0 %v3171_v44, %s3488_s24 }
 0xd3e   : > { %v1321_v45 = vpop.xlane.xlu0 %1320 }
 0xd3f   : > { %v1324_v47 = vmul.f32 0.0078125, %v1321_v45 }
 0xd41   : > { %v1326_v48 = vadd.f32 1e-05, %v1324_v47 }
 0xd42   : > { %v1323_v49 = vpop.xlane.xlu0 %1322 }
 0xd43   : > { %3254 = vrsqrt.f32 %v1326_v48  ;;  %v1325_v46 = vmul.f32 0.0078125, %v1323_v49 }
 0xd45   : > { %v1327_v36 = vadd.f32 1e-05, %v1325_v46 }
 0xd46   : > { %v1584_v5 = vpop.permute.xlu0 %1583 }
 0xd47   : > { %3256 = vrsqrt.f32 %v1327_v36  ;;  %v1589_v11 = vsel %vm673_vm1, %v1584_v5, 0 }
 0xd4a   : > { %v1826_v57 = vpop.permute.xlu0 %1825 }
 0xd4b   : > { %v1831_v18 = vsel %vm673_vm1, %v1826_v57, 0 }
 0xd4d   : > { %v3255_v39 = vpop.eup %3254 }
 0xd4e   : > { %v1330_v50 = vmul.f32 %v3255_v39, %v1316_v33 }
 0xd50   : > { %v1336_v55 = vmul.f32 %v1335_v51, %v1330_v50 }
 0xd51   : > { %v3257_v53 = vpop.eup %3256 }
 0xd52   : > { %v1331_v54 = vmul.f32 %v3257_v53, %v1317_v35  ;;  %v3950_v60 = vadd.f32 %v1341_v56, %v1336_v55  ;;  %v3173_v55 = vld [vmem:[%s3939_s28 + $0x4] ss:$8 sps:$4 sm:$0xff]  }
 0xd54   : > { %v1337_v58 = vmul.f32 %v1335_v51, %v1331_v54 }
 0xd56   : > { %v3952_v61 = vadd.f32 %v1341_v56, %v1337_v58 }
 0xd58   : > { %v1344_v62 = vpack.c.bf16 %v3952_v61, %v3950_v60 }
 0xd5a   : > { %2958 = vmatmul.mubr.bf16.vlgmr.msra.gmra.mrb[32].mxu1 %v1344_v62 }
 0xd5b   : > { %2969 = vmatprep.mubr.msk.bf16.mxu1 %vm3485_vm0, %v3484_v0  ;;  %2968 = vmatpush3.bf16.msra.mxu1 %v3173_v55 }
 0xd5c   : > { %2979 = vmatprep.subr.bf16.mxu1 %v3484_v0 }
 0xe2d   : > { %v1447_v2 = vpop.f32.mrb[32].mxu1 }
 0xe2e   : > { %v2959_v3 = vpop.f32.mrb[33].mxu1  ;;  %v1448_v6 = vadd.f32 %v1447_v2, %v1364_v1 }
 0xe2f   : > { %v1450_v4 = vpop.f32.mrb[34].mxu1 }
 0xe30   : > { %v1451_v7 = vadd.f32 %v1450_v4, %v1364_v1  ;;  %v2960_v12 = vpop.f32.mrb[35].mxu1 }
 0xe32   : > { %v1456_v8 = vpack.c.bf16 %v1451_v7, %v1448_v6 }
 0xe34   : > { %1581 = vrot.lane.b32.xlu1 %v1456_v8, %s3486_s16  ;;  %2964 = vmatmul.mubr.msk.bf16.vlgmr.msra.gmra.mrb[8].mxu0 %vm673_vm1, %v1456_v8 }
 0xe35   : > { %2974 = vmatpush3.bf16.xpose.msra.mxu0 %v1589_v11  ;;  %2975 = vmatprep.mubr.msk.bf16.mxu0 %vm3485_vm0, %v3484_v0 }
 0xe36   : > { %2985 = vmatprep.subr.bf16.mxu0 %v3484_v0 }
 0xe38   : > { %1704 = vrot.lane.b32.xlu1 %v3171_v44, %s3487_s23 }
 0xe3c   : > { %1702 = vrot.lane.b32.xlu1 %v1456_v8, %s3487_s23 }
 0xe40   : > { %1823 = vrot.lane.b32.xlu1 %v1456_v8, %s3488_s24 }
 0xea6   : > { %v1582_v17 = vpop.permute.xlu1 %1581 }
 0xea7   : > { %2976 = vmatmul.mubr.msk.bf16.vlgmr.msra.gmra.mrb[12].mxu0 %vm673_vm1, %v1582_v17 }
 0xea8   : > { %2987 = vmatprep.mubr.msk.bf16.mxu0 %vm3485_vm0, %v3484_v0 }
 0xeaa   : > { %v1705_v13 = vpop.permute.xlu1 %1704 }
 0xeab   : > { %v1710_v14 = vsel %vm673_vm1, %v1705_v13, 0 }
 0xeac   : > { %2986 = vmatpush3.bf16.xpose.msra.mxu0 %v1710_v14 }
 0xead   : > { %2997 = vmatprep.subr.bf16.mxu0 %v3484_v0 }
 0xeae   : > { %v1703_v19 = vpop.permute.xlu1 %1702 }
 0xeb2   : > { %v1824_v20 = vpop.permute.xlu1 %1823 }
 0xeb3   : > { %2988 = vmatmul.mubr.msk.bf16.vlgmr.msra.gmra.mrb[16].mxu0 %vm673_vm1, %v1703_v19 }
 0xeb4   : > { %2998 = vmatpush3.bf16.xpose.msra.mxu0 %v1831_v18  ;;  %2999 = vmatprep.mubr.msk.bf16.mxu0 %vm3485_vm0, %v3484_v0 }
 0xeb5   : > { %3009 = vmatprep.subr.bf16.mxu0 %v3484_v0 }
 0xebb   : > { %3000 = vmatmul.mubr.msk.bf16.vlgmr.msra.gmra.mrb[20].mxu0 %vm673_vm1, %v1824_v20 }
 0xebc   : > { %3025 = vmatprep.mubr.msk.bf16.mxu0 %vm3485_vm0, %v3484_v0 }
 0xf07   : > { %v1502_v21 = vpop.f32.mrb[8].mxu0 }
 0xf08   : > { %v2965_v22 = vpop.f32.mrb[9].mxu0  ;;  %v1509_v23 = vsel %vm723_vm3, %v1502_v21, -inf }
 0xf09   : > { %1510 = vmax.xlane.f32.xlu0 %v1509_v23  ;;  %v1505_v24 = vpop.f32.mrb[10].mxu0 }
 0xf0a   : > { %v2966_v28 = vpop.f32.mrb[11].mxu0  ;;  %v1512_v29 = vsel %vm723_vm3, %v1505_v24, -inf }
 0xf0b   : > { %1513 = vmax.xlane.f32.xlu1 %v1512_v29 }
 0xf7a   : > { %v1625_v30 = vpop.f32.mrb[12].mxu0 }
 0xf7b   : > { %v2977_v31 = vpop.f32.mrb[13].mxu0  ;;  %v1632_v32 = vsel %vm723_vm3, %v1625_v30, -inf }
 0xf7c   : > { %1633 = vmax.xlane.f32.xlu0 %v1632_v32  ;;  %v1628_v33 = vpop.f32.mrb[14].mxu0 }
 0xf7d   : > { %v2978_v34 = vpop.f32.mrb[15].mxu0  ;;  %v1635_v35 = vsel %vm723_vm3, %v1628_v33, -inf }
 0xf80   : > { %1636 = vmax.xlane.f32.xlu0 %v1635_v35 }
 0xf86   : > { %v1746_v37 = vpop.f32.mrb[16].mxu0 }
 0xf87   : > { %v2989_v40 = vpop.f32.mrb[17].mxu0  ;;  %v1753_v41 = vsel %vm723_vm3, %v1746_v37, -inf }
 0xf88   : > { %1754 = vmax.xlane.f32.xlu0 %v1753_v41  ;;  %v1749_v9 = vpop.f32.mrb[18].mxu0 }
 0xf89   : > { %v2990_v10 = vpop.f32.mrb[19].mxu0  ;;  %v1756_v26 = vsel %vm723_vm3, %v1749_v9, -inf }
 0xf8a   : > { %1757 = vmax.xlane.f32.xlu1 %v1756_v26 }
 0xf8e   : > { %v1867_v27 = vpop.f32.mrb[20].mxu0 }
 0xf8f   : > { %v3001_v42 = vpop.f32.mrb[21].mxu0  ;;  %v1874_v43 = vsel %vm723_vm3, %v1867_v27, -inf }
 0xf90   : > { %1875 = vmax.xlane.f32.xlu0 %v1874_v43  ;;  %v3991_v44 = vpop.f32.mrb[22].mxu0 }
 0xf91   : > { %v3002_v45 = vpop.f32.mrb[23].mxu0  ;;  %v1877_v47 = vsel %vm723_vm3, %v3991_v44, -inf }
 0xf92   : > { %1878 = vmax.xlane.f32.xlu1 %v1877_v47 }
 0xf96   : > { %v1511_v48 = vpop.xlane.xlu0 %1510 }
 0xf97   : > { %v1515_v49 = vsub.f32 %v1502_v21, %v1511_v48 }
 0xf98   : > { %v1514_v46 = vpop.xlane.xlu1 %1513 }
 0xf99   : > { %v1517_v36 = vmul.f32 1.442695, %v1515_v49  ;;  %v1516_v39 = vsub.f32 %v1505_v24, %v1514_v46 }
 0xf9b   : > { %3258 = vpow2.f32 %v1517_v36  ;;  %v1519_v50 = vmul.f32 1.442695, %v1516_v39 }
 0xf9d   : > { %3260 = vpow2.f32 %v1519_v50 }
 0xfa5   : > { %v3259_v51 = vpop.eup %3258 }
 0xfa6   : > { %v1521_v52 = vsel %vm723_vm3, %v3259_v51, 0.0 }
 0xfa7   : > { %v3261_v53 = vpop.eup %3260  ;;  %1522 = vadd.xlane.f32.xlu0 %v1521_v52 }
 0xfa8   : > { %v1524_v54 = vsel %vm723_vm3, %v3261_v53, 0.0 }
 0xfa9   : > { %1525 = vadd.xlane.f32.xlu1 %v1524_v54 }
0x1009   : > { %v1634_v56 = vpop.xlane.xlu0 %1633 }
0x100a   : > { %v1638_v58 = vsub.f32 %v1625_v30, %v1634_v56 }
0x100c   : > { %v1640_v62 = vmul.f32 1.442695, %v1638_v58 }
0x100d   : > { %v1637_v25 = vpop.xlane.xlu0 %1636 }
0x100e   : > { %3262 = vpow2.f32 %v1640_v62  ;;  %v1639_v63 = vsub.f32 %v1628_v33, %v1637_v25 }
0x1010   : > { %v1642_v1 = vmul.f32 1.442695, %v1639_v63 }
0x1012   : > { %3264 = vpow2.f32 %v1642_v1 }
0x1015   : > { %v1755_v2 = vpop.xlane.xlu0 %1754 }
0x1016   : > { %v1759_v3 = vsub.f32 %v1746_v37, %v1755_v2 }
0x1017   : > { %v1758_v4 = vpop.xlane.xlu1 %1757 }
0x1018   : > { %v3263_v5 = vpop.eup %3262  ;;  %v1761_v6 = vmul.f32 1.442695, %v1759_v3  ;;  %v1760_v7 = vsub.f32 %v1749_v9, %v1758_v4 }
0x1019   : > { %v1644_v12 = vsel %vm723_vm3, %v3263_v5, 0.0 }
0x101a   : > { %3266 = vpow2.f32 %v1761_v6  ;;  %v1763_v8 = vmul.f32 1.442695, %v1760_v7  ;;  %1645 = vadd.xlane.f32.xlu0 %v1644_v12  ;;  %v3174_v7 = vld [vmem:[#allocation7] sm:$0xff]  }
0x101b   : > { %3010 = vmatpush3.bf16.msra.mxu0 %v3174_v7  ;;  %v3188_v7 = vld [vmem:[%s4182_s7 + $0x20] ss:$8 sps:$4 sm:$0xff]  }
0x101c   : > { %v3265_v11 = vpop.eup %3264  ;;  %3268 = vpow2.f32 %v1763_v8  ;;  %3011 = vmatprep.subr.bf16.mxu0 %v3484_v0 }
0x101d   : > { %v1876_v17 = vpop.xlane.xlu0 %1875  ;;  %v1647_v13 = vsel %vm723_vm3, %v3265_v11, 0.0 }
0x101e   : > { %v1880_v14 = vsub.f32 %v1867_v27, %v1876_v17  ;;  %1648 = vadd.xlane.f32.xlu1 %v1647_v13  ;;  %v3176_v13 = vld [vmem:[#allocation7 + $0x10] sm:$0xff]  }
0x101f   : > { %v1879_v24 = vpop.xlane.xlu1 %1878 }
0x1020   : > { %v1882_v57 = vmul.f32 1.442695, %v1880_v14  ;;  %v1881_v35 = vsub.f32 %v3991_v44, %v1879_v24  ;;  %v3181_v24 = vld [vmem:[#allocation7 + $0x38] sm:$0xff]  }
0x1022   : > { %3270 = vpow2.f32 %v1882_v57  ;;  %v1884_v37 = vmul.f32 1.442695, %v1881_v35 }
0x1024   : > { %v3267_v18 = vpop.eup %3266 }
0x1025   : > { %v1765_v19 = vsel %vm723_vm3, %v3267_v18, 0.0 }
0x1026   : > { %v3269_v20 = vpop.eup %3268  ;;  %1766 = vadd.xlane.f32.xlu0 %v1765_v19 }
0x1027   : > { %v1768_v21 = vsel %vm723_vm3, %v3269_v20, 0.0 }
0x1028   : > { %1769 = vadd.xlane.f32.xlu1 %v1768_v21  ;;  %v3178_v21 = vld [vmem:[#allocation7 + $0x20] sm:$0xff]  }
0x102c   : > { %v3271_v22 = vpop.eup %3270 }
0x102d   : > { %v1886_v23 = vsel %vm723_vm3, %v3271_v22, 0.0 }
0x102e   : > { %1887 = vadd.xlane.f32.xlu0 %v1886_v23  ;;  %v3180_v23 = vld [vmem:[#allocation7 + $0x30] sm:$0xff]  }
0x1034   : > { %v1523_v28 = vpop.xlane.xlu0 %1522 }
0x1035   : > { %3272 = vrcp.f32 %v1523_v28 }
0x1036   : > { %v1526_v29 = vpop.xlane.xlu1 %1525 }
0x1037   : > { %3274 = vrcp.f32 %v1526_v29 }
0x1038   : > { %3276 = vpow2.f32 %v1884_v37 }
0x1039   : > { %1776 = vrot.lane.b32.xlu1 %v3173_v55, %s3487_s23 }
0x103f   : > { %v3273_v30 = vpop.eup %3272 }
0x1040   : > { %v1529_v32 = vmul.f32 %v3273_v30, %v3259_v51 }
0x1041   : > { %v3275_v31 = vpop.eup %3274 }
0x1042   : > { %v1530_v33 = vmul.f32 %v3275_v31, %v3261_v53  ;;  %v3277_v40 = vpop.eup %3276 }
0x1043   : > { %v1889_v41 = vsel %vm723_vm3, %v3277_v40, 0.0 }
0x1044   : > { %v1531_v34 = vpack.c.bf16 %v1530_v33, %v1529_v32  ;;  %1655 = vrot.lane.b32.xlu0 %v3173_v55, %s3486_s16 }
0x1046   : > { %2970 = vmatmul.mubr.msk.bf16.vlgmr.msra.gmra.mrb[36].mxu1 %vm723_vm3, %v1531_v34 }
0x1047   : > { %2981 = vmatprep.mubr.msk.bf16.mxu1 %vm3485_vm0, %v3484_v0 }
0x105d   : > { %1890 = vadd.xlane.f32.xlu1 %v1889_v41 }
0x106e   : > { %1897 = vrot.lane.b32.xlu1 %v3173_v55, %s3488_s24 }
0x10a7   : > { %v1646_v10 = vpop.xlane.xlu0 %1645 }
0x10ab   : > { %v1649_v9 = vpop.xlane.xlu1 %1648 }
0x10ac   : > { %3278 = vrcp.f32 %v1649_v9 }
0x10ad   : > { %3280 = vrcp.f32 %v1646_v10 }
0x10b3   : > { %v1767_v27 = vpop.xlane.xlu0 %1766 }
0x10b5   : > { %v1770_v26 = vpop.xlane.xlu1 %1769 }
0x10b6   : > { %3282 = vrcp.f32 %v1770_v26  ;;  %v3279_v42 = vpop.eup %3278 }
0x10b7   : > { %3284 = vrcp.f32 %v1767_v27  ;;  %v3281_v44 = vpop.eup %3280  ;;  %v1653_v45 = vmul.f32 %v3279_v42, %v3265_v11  ;;  %v3175_v11 = vld [vmem:[#allocation7 + $0x8] sm:$0xff]  }
0x10b8   : > { %v1652_v47 = vmul.f32 %v3281_v44, %v3263_v5  ;;  %3012 = vmatpush3.bf16.msra.mxu0 %v3175_v11  ;;  %v3196_v11 = vld [vmem:[%s4182_s7 + $0x44] ss:$8 sps:$4 sm:$0xff]  }
0x10b9   : > { %v1777_v36 = vpop.permute.xlu1 %1776  ;;  %3013 = vmatprep.subr.bf16.mxu0 %v3484_v0 }
0x10ba   : > { %v1654_v49 = vpack.c.bf16 %v1653_v45, %v1652_v47 }
0x10bb   : > { %v1888_v43 = vpop.xlane.xlu0 %1887 }
0x10bc   : > { %3286 = vrcp.f32 %v1888_v43  ;;  %3014 = vmatpush3.bf16.msra.mxu0 %v3176_v13  ;;  %v3199_v13 = vld [vmem:[%s4182_s7 + $0x54] ss:$8 sps:$4 sm:$0xff]  }
0x10bd   : > { %3015 = vmatprep.subr.bf16.mxu0 %v3484_v0 }
0x10bf   : > { %v1656_v48 = vpop.permute.xlu0 %1655 }
0x10c0   : > { %2980 = vmatpush3.bf16.msra.mxu1 %v1656_v48  ;;  %v3283_v46 = vpop.eup %3282  ;;  %v1993_v48 = vsub.s32 5, %v3769_v15 }
0x10c1   : > { %2991 = vmatprep.subr.bf16.mxu1 %v3484_v0  ;;  %v3285_v39 = vpop.eup %3284  ;;  %v1774_v50 = vmul.f32 %v3283_v46, %v3269_v20  ;;  %v3177_v20 = vld [vmem:[#allocation7 + $0x18] sm:$0xff]  }
0x10c2   : > { %v1773_v51 = vmul.f32 %v3285_v39, %v3267_v18  ;;  %3016 = vmatpush3.bf16.msra.mxu0 %v3177_v20  ;;  %v3203_v20 = vld [vmem:[%s4182_s7 + $0x70] ss:$8 sps:$4 sm:$0xff]  }
0x10c3   : > { %2982 = vmatmul.mubr.msk.bf16.vlgmr.msra.gmra.mrb[40].mxu1 %vm723_vm3, %v1654_v49  ;;  %3017 = vmatprep.subr.bf16.mxu0 %v3484_v0  ;;  %v4038_v49 = vld [vmem:[#allocation9] sm:$0xff] }
0x10c4   : > { %2992 = vmatpush3.bf16.msra.mxu1 %v1777_v36  ;;  %2993 = vmatprep.mubr.msk.bf16.mxu1 %vm3485_vm0, %v3484_v0  ;;  %v1775_v52 = vpack.c.bf16 %v1774_v50, %v1773_v51  ;;  %v1994_v46 = vrot.slane %v4038_v49, %v1993_v48 }
0x10c5   : > { %3003 = vmatprep.subr.bf16.mxu1 %v3484_v0 }
0x10c6   : > { %v3287_v55 = vpop.eup %3286  ;;  %3018 = vmatpush3.bf16.msra.mxu0 %v3178_v21  ;;  %v3489_v21 = vmov 0  }
0x10c7   : > { %v1894_v58 = vmul.f32 %v3287_v55, %v3271_v22  ;;  %v3179_v22 = vld [vmem:[#allocation7 + $0x28] sm:$0xff]   ;;  %3019 = vmatprep.subr.bf16.mxu0 %v3484_v0 }
0x10ca   : > { %3020 = vmatpush3.bf16.msra.mxu0 %v3179_v22  ;;  %v3206_v22 = vld [vmem:[%s4183_s8 + $0x40] sm:$0xff]  }
0x10cb   : > { %2994 = vmatmul.mubr.msk.bf16.vlgmr.msra.gmra.mrb[44].mxu1 %vm723_vm3, %v1775_v52  ;;  %3021 = vmatprep.subr.bf16.mxu0 %v3484_v0 }
0x10cc   : > { %3005 = vmatprep.mubr.msk.bf16.mxu1 %vm3485_vm0, %v3484_v0 }
0x10ce   : > { %3022 = vmatpush3.bf16.msra.mxu0 %v3180_v23  ;;  %v3207_v23 = vld [vmem:[%s4183_s8] sm:$0xff]  }
0x10cf   : > { %3023 = vmatprep.subr.bf16.mxu0 %v3484_v0 }
0x10d2   : > { %3024 = vmatpush3.bf16.msra.mxu0 %v3181_v24  ;;  %v3208_v24 = vld [vmem:[%s4183_s8 + $0x48] sm:$0xff]  }
0x10d3   : > { %2831 = vmatprep.subr.bf16.mxu0 %v3206_v22 }
0x10ea   : > { %v1891_v53 = vpop.xlane.xlu1 %1890 }
0x10eb   : > { %3288 = vrcp.f32 %v1891_v53 }
0x10ee   : > { %v1898_v54 = vpop.permute.xlu1 %1897 }
0x10ef   : > { %3004 = vmatpush3.bf16.msra.mxu1 %v1898_v54 }
0x10f5   : > { %v3289_v56 = vpop.eup %3288 }
0x10f6   : > { %v1895_v62 = vmul.f32 %v3289_v56, %v3277_v40  ;;  %v3182_v56 = vld [vmem:[%s4182_s7] ss:$8 sps:$4 sm:$0xff]  }
0x10f8   : > { %v1896_v25 = vpack.c.bf16 %v1895_v62, %v1894_v58  ;;  %v3184_v58 = vld [vmem:[%s4182_s7 + $0x4] ss:$8 sps:$4 sm:$0xff]   ;;  %v3187_v62 = vld [vmem:[%s4182_s7 + $0x14] ss:$8 sps:$4 sm:$0xff]  }
0x10f9   : > { %2229 = vmatprep.subr.bf16.mxu1 %v3184_v58 }
0x10fa   : > { %3006 = vmatmul.mubr.msk.bf16.vlgmr.msra.gmra.mrb[48].mxu1 %vm723_vm3, %v1896_v25 }
0x10fb   : > { %2230 = vmatpush1.bf16.msra.mxu1 %v3182_v56  ;;  %2261 = vmatprep.mubr.bf16.mxu1 %v3489_v21  ;;  %v2137_v56 = vld [vmem:[%s4185_s10] sm:$0x3] }
0x10fc   : > { %2231 = vmatprep.subr.bf16.mxu1 %v3187_v62  ;;  %v2142_v58 = vrot.slane %v2137_v56, %v3772_v16  ;;  %v2146_v62 = vrot.slane %v2137_v56, %v3921_v59 }
0x1119   : > { %v1573_v63 = vpop.f32.mrb[36].mxu1 }
0x111a   : > { %v2971_v1 = vpop.f32.mrb[37].mxu1 }
0x111b   : > { %v1576_v2 = vpop.f32.mrb[38].mxu1 }
0x111c   : > { %v2972_v3 = vpop.f32.mrb[39].mxu1 }
0x1196   : > { %v1695_v4 = vpop.f32.mrb[40].mxu1 }
0x1197   : > { %v2983_v5 = vpop.f32.mrb[41].mxu1 }
0x1198   : > { %v1698_v6 = vpop.f32.mrb[42].mxu1 }
0x1199   : > { %v3129_v12 = vpack.i.bf16 %v1698_v6, %v1695_v4  ;;  %v2984_v8 = vpop.f32.mrb[43].mxu1  ;;  %v3190_v6 = vld [vmem:[%s4182_s7 + $0x24] ss:$8 sps:$4 sm:$0xff]  }
0x119a   : > { %v3191_v8 = vld [vmem:[%s4182_s7 + $0x30] ss:$8 sps:$4 sm:$0xff]  }
0x119b   : > { %3130 = vrot.lane.b32.xlu1 %v3129_v12, %s3488_s24  ;;  %v3193_v12 = vld [vmem:[%s4182_s7 + $0x34] ss:$8 sps:$4 sm:$0xff]   ;;  %s4203_s24 = sld [smem:[#allocation15_spill]] }
0x119e   : > { %v1816_v17 = vpop.f32.mrb[44].mxu1 }
0x119f   : > { %v2995_v14 = vpop.f32.mrb[45].mxu1 }
0x11a0   : > { %v1819_v57 = vpop.f32.mrb[46].mxu1  ;;  %v3197_v14 = vld [vmem:[%s4182_s7 + $0x50] ss:$8 sps:$4 sm:$0xff]  }
0x11a1   : > { %v3134_v18 = vpack.i.bf16 %v1819_v57, %v1816_v17  ;;  %v2996_v19 = vpop.f32.mrb[47].mxu1  ;;  %v3194_v17 = vld [vmem:[%s4182_s7 + $0x40] ss:$8 sps:$4 sm:$0xff]   ;;  %v3202_v57 = vld [vmem:[%s4182_s7 + $0x64] ss:$8 sps:$4 sm:$0xff]   ;;  %s537_s19 = scalar_lea.vmem %s4203_s24, %s3737_s21 }
0x11a2   : > { %v3205_v19 = vld [vmem:[%s4182_s7 + $0x74] ss:$8 sps:$4 sm:$0xff]  }
0x11a3   : > { %3135 = vrot.lane.b32.xlu0 %v3134_v18, %s3487_s23  ;;  %v3200_v18 = vld [vmem:[%s4182_s7 + $0x60] ss:$8 sps:$4 sm:$0xff]  }
0x11cd   : > { %v1937_v28 = vpop.f32.mrb[48].mxu1 }
0x11ce   : > { %v3007_v29 = vpop.f32.mrb[49].mxu1 }
0x11cf   : > { %v1940_v30 = vpop.f32.mrb[50].mxu1  ;;  %v3210_v29 = vld [vmem:[%s4183_s8 + $0x50] sm:$0xff]  }
0x11d0   : > { %v3139_v31 = vpack.i.bf16 %v1940_v30, %v1937_v28  ;;  %v3008_v32 = vpop.f32.mrb[51].mxu1  ;;  %v3209_v28 = vld [vmem:[%s4183_s8 + $0x8] sm:$0xff]   ;;  %v3211_v30 = vld [vmem:[%s4183_s8 + $0x10] sm:$0xff]  }
0x11d1   : > { %v3213_v32 = vld [vmem:[%s4183_s8 + $0x18] sm:$0xff]  }
0x11d2   : > { %3140 = vrot.lane.b32.xlu1 %v3139_v31, %s3486_s16  ;;  %v3212_v31 = vld [vmem:[%s4183_s8 + $0x58] sm:$0xff]  }
0x120d   : > { %v3131_v33 = vpop.permute.xlu1 %3130 }
0x120e   : > { %v3133_v35 = vunpack.i.h.bf16 %v3131_v33  ;;  %v3132_v37 = vunpack.i.l.bf16 %v3131_v33  ;;  %v3214_v33 = vld [vmem:[%s4183_s8 + $0x60] sm:$0xff]  }
0x1210   : > { %v1969_v10 = vsel %vm673_vm1, %v1576_v2, %v3133_v35  ;;  %v1968_v0 = vsel %vm673_vm1, %v1573_v63, %v3132_v37  ;;  %v3216_v35 = vld [vmem:[%s4183_s8 + $0x68] sm:$0xff]  }
0x1215   : > { %v3136_v34 = vpop.permute.xlu0 %3135 }
0x1216   : > { %v3138_v40 = vunpack.i.h.bf16 %v3136_v34  ;;  %v3137_v41 = vunpack.i.l.bf16 %v3136_v34  ;;  %v3215_v34 = vld [vmem:[%s4183_s8 + $0x20] sm:$0xff]  }
0x1218   : > { %v1971_v42 = vsel %vm1191_vm5, %v1969_v10, %v3138_v40  ;;  %v1970_v43 = vsel %vm1191_vm5, %v1968_v0, %v3137_v41 }
0x1244   : > { %v3141_v9 = vpop.permute.xlu1 %3140 }
0x1245   : > { %v3143_v26 = vunpack.i.h.bf16 %v3141_v9  ;;  %v3142_v27 = vunpack.i.l.bf16 %v3141_v9 }
0x1247   : > { %v1973_v44 = vsel %vm1194_vm6, %v1971_v42, %v3143_v26  ;;  %v1972_v45 = vsel %vm1194_vm6, %v1970_v43, %v3142_v27  ;;  %v2110_v26 = vsub.s32 6, %v3769_v15 }
0x1248   : > { %v1974_v47 = vpack.c.bf16 %v1973_v44, %v1972_v45  ;;  %v2116_v44 = vsub.s32 7, %v3769_v15 }
0x1249   : > { %v2111_v43 = vrot.slane %v4038_v49, %v2110_v26 }
0x124a   : > { %3026 = vmatmul.mubr.bf16.vlgmr.msra.gmra.mrb[24].mxu0 %v1974_v47 }
0x124b   : > { %2832 = vmatpush3.bf16.msra.mxu0 %v3207_v23 }
0x124c   : > { %2833 = vmatprep.subr.bf16.mxu0 %v3208_v24 }
0x124f   : > { %2834 = vmatpush3.bf16.msra.mxu0 %v3209_v28 }
0x1250   : > { %2835 = vmatprep.subr.bf16.mxu0 %v3210_v29 }
0x1253   : > { %2836 = vmatpush3.bf16.msra.mxu0 %v3211_v30 }
0x1254   : > { %2837 = vmatprep.subr.bf16.mxu0 %v3212_v31 }
0x1257   : > { %2838 = vmatpush3.bf16.msra.mxu0 %v3213_v32 }
0x1258   : > { %2839 = vmatprep.subr.bf16.mxu0 %v3214_v33 }
0x125b   : > { %2840 = vmatpush3.bf16.msra.mxu0 %v3215_v34 }
0x125c   : > { %2841 = vmatprep.subr.bf16.mxu0 %v3216_v35 }
0x131d   : > { %v2077_v36 = vpop.f32.mrb[24].mxu0 }
0x131e   : > { %v2078_v39 = vadd.f32 %v2077_v36, %v1994_v46  ;;  %v3027_v50 = vpop.f32.mrb[25].mxu0 }
0x131f   : > { %v2080_v51 = vpop.f32.mrb[26].mxu0 }
0x1320   : > { %v2081_v52 = vadd.f32 %v2080_v51, %v1994_v46  ;;  %v3028_v53 = vpop.f32.mrb[27].mxu0  ;;  %v2084_v54 = vadd.f32 %v2078_v39, %v3950_v60  ;;  %v3185_v60 = vld [vmem:[%s4182_s7 + $0x10] ss:$8 sps:$4 sm:$0xff]   ;;  %v2117_v46 = vrot.slane %v4038_v49, %v2116_v44 }
0x1321   : > { %2232 = vmatpush1.bf16.msra.mxu1 %v3185_v60  ;;  %v3218_v53 = vld [vmem:[%s4183_s8 + $0x70] sm:$0xff]   ;;  %v3220_v49 = vld [vmem:[%s4183_s8 + $0x78] sm:$0xff]  }
0x1322   : > { %2086 = vadd.xlane.f32.xlu0 %v2084_v54  ;;  %v2085_v55 = vadd.f32 %v2081_v52, %v3952_v61  ;;  %2233 = vmatprep.subr.bf16.mxu1 %v3190_v6  ;;  %v3217_v52 = vld [vmem:[%s4183_s8 + $0x28] sm:$0xff]  }
0x1323   : > { %2842 = vmatpush3.bf16.msra.mxu0 %v3217_v52 }
0x1324   : > { %2088 = vadd.xlane.f32.xlu1 %v2085_v55  ;;  %2843 = vmatprep.subr.bf16.mxu0 %v3218_v53 }
0x1325   : > { %2234 = vmatpush1.bf16.msra.mxu1 %v3188_v7 }
0x1326   : > { %2235 = vmatprep.subr.bf16.mxu1 %v3193_v12 }
0x1329   : > { %2236 = vmatpush1.bf16.msra.mxu1 %v3191_v8 }
0x132a   : > { %2237 = vmatprep.subr.bf16.mxu1 %v3196_v11 }
0x132d   : > { %2238 = vmatpush1.bf16.msra.mxu1 %v3194_v17  ;;  %v541_v17 = vld [vmem:[#allocation9 + $0x8] sm:$0x7] }
0x132e   : > { %2239 = vmatprep.subr.bf16.mxu1 %v3199_v13  ;;  %v2478_v26 = vrot.slane %v541_v17, %v3921_v59 }
0x1331   : > { %2240 = vmatpush1.bf16.msra.mxu1 %v3197_v14  ;;  %v2313_v14 = vrot.slane %v541_v17, %v3772_v16 }
0x1332   : > { %2241 = vmatprep.subr.bf16.mxu1 %v3202_v57 }
0x1335   : > { %2242 = vmatpush1.bf16.msra.mxu1 %v3200_v18 }
0x1336   : > { %2243 = vmatprep.subr.bf16.mxu1 %v3205_v19 }
0x1339   : > { %2244 = vmatpush1.bf16.msra.mxu1 %v3203_v20 }
0x13af   : > { %v2087_v61 = vpop.xlane.xlu0 %2086 }
0x13b0   : > { %v2090_v25 = vmul.f32 0.0078125, %v2087_v61 }
0x13b1   : > { %v2089_v63 = vpop.xlane.xlu1 %2088 }
0x13b2   : > { %v4055_v1 = vsub.f32 %v2084_v54, %v2090_v25  ;;  %v2091_v2 = vmul.f32 0.0078125, %v2089_v63  ;;  %v3219_v54 = vld [vmem:[%s4183_s8 + $0x30] sm:$0xff]  }
0x13b3   : > { %2844 = vmatpush3.bf16.msra.mxu0 %v3219_v54 }
0x13b4   : > { %v4057_v3 = vsub.f32 %v2085_v55, %v2091_v2  ;;  %v2094_v4 = vmul.f32 %v4055_v1, %v4055_v1  ;;  %v3221_v55 = vld [vmem:[%s4183_s8 + $0x38] sm:$0xff]   ;;  %2845 = vmatprep.subr.bf16.mxu0 %v3220_v49 }
0x13b6   : > { %2096 = vadd.xlane.f32.xlu0 %v2094_v4  ;;  %v2095_v5 = vmul.f32 %v4057_v3, %v4057_v3 }
0x13b7   : > { %2846 = vmatpush3.bf16.msra.mxu0 %v3221_v55 }
0x13ba   : > { %2098 = vadd.xlane.f32.xlu0 %v2095_v5 }
0x1443   : > { %v2097_v37 = vpop.xlane.xlu0 %2096 }
0x1444   : > { %v2100_v40 = vmul.f32 0.0078125, %v2097_v37 }
0x1446   : > { %v2102_v41 = vadd.f32 1e-05, %v2100_v40 }
0x1447   : > { %v2099_v9 = vpop.xlane.xlu0 %2098 }
0x1448   : > { %3290 = vrsqrt.f32 %v2102_v41  ;;  %v2101_v10 = vmul.f32 0.0078125, %v2099_v9 }
0x144a   : > { %v2103_v0 = vadd.f32 1e-05, %v2101_v10 }
0x144c   : > { %3292 = vrsqrt.f32 %v2103_v0 }
0x1452   : > { %v3291_v27 = vpop.eup %3290 }
0x1453   : > { %v2106_v42 = vmul.f32 %v3291_v27, %v4055_v1 }
0x1455   : > { %v2112_v48 = vmul.f32 %v2111_v43, %v2106_v42  ;;  %v2484_v42 = vrot.slane %v541_v17, %v1334_v38 }
0x1456   : > { %v3293_v45 = vpop.eup %3292 }
0x1457   : > { %v2107_v47 = vmul.f32 %v3293_v45, %v4057_v3  ;;  %v2118_v39 = vadd.f32 %v2117_v46, %v2112_v48 }
0x1459   : > { %v2113_v36 = vmul.f32 %v2111_v43, %v2107_v47 }
0x145b   : > { %v2119_v50 = vadd.f32 %v2117_v46, %v2113_v36 }
0x145d   : > { %v2120_v51 = vpack.c.bf16 %v2119_v50, %v2118_v39 }
0x145f   : > { %2262 = vmatmul.mubr.bf16.vlgmr.msra.gmra.mrb[52].mxu1 %v2120_v51 }
0x1532   : > { %v2263_v60 = vpop.f32.mrb[52].mxu1 }
0x1533   : > { %v2264_v61 = vadd.f32 %v2263_v60, %v2142_v58  ;;  %v2265_v25 = vpop.f32.mrb[53].mxu1 }
0x1534   : > { %v2266_v63 = vadd.f32 %v2265_v25, %v2146_v62  ;;  %v2267_v1 = vpop.f32.mrb[54].mxu1 }
0x1535   : > { %v2268_v2 = vadd.f32 %v2267_v1, %v2142_v58  ;;  %v2269_v3 = vpop.f32.mrb[55].mxu1  ;;  %v2272_v5 = vmax.f32 %v2264_v61, 0.0 }
0x1536   : > { %v2270_v4 = vadd.f32 %v2269_v3, %v2146_v62  ;;  %v2273_v7 = vmax.f32 %v2266_v63, 0.0 }
0x1537   : > { %v2274_v6 = vmax.f32 %v2268_v2, 0.0 }
0x1538   : > { %v2275_v12 = vmax.f32 %v2270_v4, 0.0 }
0x1539   : > { %v2276_v8 = vpack.c.bf16 %v2274_v6, %v2272_v5 }
0x153a   : > { %v2277_v11 = vpack.c.bf16 %v2275_v12, %v2273_v7 }
0x153c   : > { %2442 = vmatprep.mubr.bf16.mxu0 %v2277_v11 }
0x153d   : > { %2443 = vmatmul.mubr.bf16.vlgmr.msra.gmra.mrb[28].mxu0 %v2276_v8 }
0x1610   : > { %v2847_v13 = vpop.f32.mrb[28].mxu0 }
0x1611   : > { %v2848_v57 = vpop.f32.mrb[29].mxu0 }
0x1612   : > { %v2849_v18 = vadd.f32 %v2848_v57, %v2847_v13  ;;  %v2850_v19 = vpop.f32.mrb[30].mxu0 }
0x1613   : > { %v2851_v20 = vpop.f32.mrb[31].mxu0 }
0x1614   : > { %v2445_v21 = vadd.f32 %v2849_v18, %v2313_v14  ;;  %v2852_v22 = vadd.f32 %v2851_v20, %v2850_v19 }
0x1616   : > { %v2448_v23 = vadd.f32 %v2852_v22, %v2313_v14  ;;  %v2451_v24 = vadd.f32 %v2445_v21, %v2118_v39 }
0x1618   : > { %2453 = vadd.xlane.f32.xlu0 %v2451_v24  ;;  %v2452_v28 = vadd.f32 %v2448_v23, %v2119_v50 }
0x161a   : > { %2455 = vadd.xlane.f32.xlu1 %v2452_v28 }
0x16a5   : > { %v2454_v29 = vpop.xlane.xlu0 %2453 }
0x16a6   : > { %v2457_v30 = vmul.f32 0.0078125, %v2454_v29 }
0x16a7   : > { %v2456_v31 = vpop.xlane.xlu1 %2455 }
0x16a8   : > { %v2459_v32 = vsub.f32 %v2451_v24, %v2457_v30  ;;  %v2458_v33 = vmul.f32 0.0078125, %v2456_v31 }
0x16aa   : > { %v2460_v34 = vsub.f32 %v2452_v28, %v2458_v33  ;;  %v2461_v35 = vmul.f32 %v2459_v32, %v2459_v32 }
0x16ac   : > { %2463 = vadd.xlane.f32.xlu0 %v2461_v35  ;;  %v2462_v16 = vmul.f32 %v2460_v34, %v2460_v34 }
0x16ae   : > { %2465 = vadd.xlane.f32.xlu1 %v2462_v16 }
0x1739   : > { %v2464_v37 = vpop.xlane.xlu0 %2463 }
0x173a   : > { %v2467_v40 = vmul.f32 0.0078125, %v2464_v37 }
0x173b   : > { %v2466_v41 = vpop.xlane.xlu1 %2465 }
0x173c   : > { %v2469_v9 = vadd.f32 1e-05, %v2467_v40  ;;  %v2468_v10 = vmul.f32 0.0078125, %v2466_v41 }
0x173e   : > { %3294 = vrsqrt.f32 %v2469_v9  ;;  %v2470_v0 = vadd.f32 1e-05, %v2468_v10 }
0x1740   : > { %3296 = vrsqrt.f32 %v2470_v0 }
0x1748   : > { %v3295_v27 = vpop.eup %3294 }
0x1749   : > { %v2473_v43 = vmul.f32 %v3295_v27, %v2459_v32 }
0x174a   : > { %v3297_v44 = vpop.eup %3296 }
0x174b   : > { %v2479_v45 = vmul.f32 %v2478_v26, %v2473_v43  ;;  %v2474_v47 = vmul.f32 %v3297_v44, %v2460_v34 }
0x174d   : > { %v2485_v48 = vadd.f32 %v2484_v42, %v2479_v45  ;;  %v2480_v46 = vmul.f32 %v2478_v26, %v2474_v47 }
0x174f   : > { %2487 = vst [vmem:[%s537_s19] sm:$0xff] %v2485_v48  ;;  %v2486_v36 = vadd.f32 %v2484_v42, %v2480_v46 }
0x1751   : > { %2488 = vst [vmem:[%s537_s19 + $0x8] sm:$0xff] %v2486_v36 }
0x1752 PF: > { %s4204_s26 = sld [smem:[#allocation13_spill]]  ;;  %s4205_s17 = smov %s3469_s18 }
0x1753   : > { %s4206_s18 = smov %s4208_s14 }
0x1758   : > { %s24_s19 = sadd.s32 1, %s4204_s26  }
0x1759   : > { %p21_p7 = scmp.ge.s32.totalorder %s24_s19, 4  }
0x175b   :  { %23 = sbr.rel (!%p21_p7) target bundleno = 7 (0x7), region = 121 }
0x1762   :  { %2519 = vsyncpa [#allocation3], 1 }
0x1763   :  { %2521 = vsyncpa [#allocation3 + $0x1], 1 }
0x1764   :  { %2522 = vsyncpa [#allocation5], 1 }
0x1765   :  { %2523 = vsyncpa [#allocation8], 1 }

</bundles_post_ra>
